<compile_context>
chip_gen: v7x
topology: tpu7x:2x2x1
jax: 0.10.0
libtpu: 0.0.40
codegen_flags: <defaults>
</compile_context>

<pallas_src>
import math

import jax
import jax.numpy as jnp
from jax.experimental import pallas as pl
from jax.experimental.pallas import tpu as pltpu

# ---------------- config (small, consistent with the module) ----------------
BATCH = 2
CLIP_SIZE = 32          # clip embedding dim
PREFIX_SIZE = 32        # == bert hidden_size (inputs_embeds dim)
PREFIX_LEN = 8
CONSTANT_LEN = 8
SEQ = PREFIX_LEN + CONSTANT_LEN      # 16
HIDDEN = PREFIX_SIZE                 # 32
NUM_LAYERS = 2
NUM_HEADS = 4
HEAD_DIM = HIDDEN // NUM_HEADS       # 8
INTERMEDIATE = 64
MAX_POS = 32
LN_EPS = 1e-12
DTYPE = jnp.float32
M_TOT = BATCH * SEQ                  # 32 rows, batch folded into sublanes


# ------------------------------ math helpers --------------------------------
def _layernorm(x, g, b):
    # LayerNorm over last dim, biased variance, eps=1e-12 (matches HF BERT).
    m = jnp.mean(x, axis=-1, keepdims=True)
    v = jnp.mean((x - m) ** 2, axis=-1, keepdims=True)
    return (x - m) * jax.lax.rsqrt(v + LN_EPS) * g + b


def _gelu_exact(x):
    # exact erf-based GELU (HF "gelu")
    return 0.5 * x * (1.0 + jax.lax.erf(x * (1.0 / math.sqrt(2.0))))


# ------------------------------ fused kernel --------------------------------
def _bert_mapper_kernel(
    prefix_ref,                 # (B*PREFIX_LEN, P)  prefix rows (Linear output)
    addb_ref,                   # (B*SEQ, H)  pos_emb + type_emb(0), const folded in
    mask_ref,                   # (B*SEQ, B*SEQ) block-diagonal batch mask (0 / -1e30)
    embg_ref, embb_ref,         # (1, H) embeddings LayerNorm
    wqkv_ref, bqkv_ref,         # (NL, H, 3H), (NL, 1, 3H)
    wo_ref, bo_ref,             # (NL, H, H), (NL, 1, H)
    ln1g_ref, ln1b_ref,         # (NL, 1, H)
    wi_ref, bi_ref,             # (NL, H, I), (NL, 1, I)
    wo2_ref, bo2_ref,           # (NL, I, H), (NL, 1, H)
    ln2g_ref, ln2b_ref,         # (NL, 1, H)
    out_ref,                    # (B*CONSTANT_LEN, P)
):
    f32 = jnp.float32
    pref = prefix_ref[...].astype(f32)                      # (B*L, H)

    # Build the (B*SEQ, H) embedding input: per batch, prefix rows followed by
    # zeros (prefix_const is already folded into addb); then add pos/type.
    zeros = jnp.zeros((CONSTANT_LEN, HIDDEN), f32)
    pieces = []
    for b in range(BATCH):
        pieces.append(pref[b * PREFIX_LEN:(b + 1) * PREFIX_LEN])
        pieces.append(zeros)
    seq = jnp.concatenate(pieces, axis=0) + addb_ref[...]
    h = _layernorm(seq, embg_ref[...], embb_ref[...])       # (B*SEQ, H)

    mask = mask_ref[...]
    scale = 1.0 / math.sqrt(HEAD_DIM)
    contract_last = (((1,), (1,)), ((), ()))                # q·k on last dims

    for layer in range(NUM_LAYERS):                         # unrolled (NL=2)
        # fused QKV projection: (M, H) @ (H, 3H) + (1, 3H)
        qkv = (jnp.dot(h, wqkv_ref[layer], preferred_element_type=f32)
               + bqkv_ref[layer])                           # (M, 3H)

        heads = []
        for hh in range(NUM_HEADS):                         # static lane slices
            q0 = hh * HEAD_DIM
            qh = qkv[:, q0:q0 + HEAD_DIM]                   # (M, D)
            kh = qkv[:, HIDDEN + q0:HIDDEN + q0 + HEAD_DIM]
            vh = qkv[:, 2 * HIDDEN + q0:2 * HIDDEN + q0 + HEAD_DIM]
            s = jax.lax.dot_general(qh, kh, contract_last,
                                    preferred_element_type=f32)  # (M, M)
            s = s * scale + mask                            # block-diag batch mask
            s = s - jnp.max(s, axis=-1, keepdims=True)
            p = jnp.exp(s)
            p = p * pl.reciprocal(jnp.sum(p, axis=-1, keepdims=True),
                                  approx=True)
            heads.append(jnp.dot(p, vh, preferred_element_type=f32))  # (M, D)
        ctx = jnp.concatenate(heads, axis=-1)               # (M, H), registers only

        attn = (jnp.dot(ctx, wo_ref[layer], preferred_element_type=f32)
                + bo_ref[layer])
        h1 = _layernorm(attn + h, ln1g_ref[layer], ln1b_ref[layer])

        inter = _gelu_exact(jnp.dot(h1, wi_ref[layer],
                                    preferred_element_type=f32)
                            + bi_ref[layer])
        ffn = (jnp.dot(inter, wo2_ref[layer], preferred_element_type=f32)
               + bo2_ref[layer])
        h = _layernorm(ffn + h1, ln2g_ref[layer], ln2b_ref[layer])

    # last_hidden_state[:, prefix_len:]  -> one full-block store
    out = jnp.concatenate(
        [h[b * SEQ + PREFIX_LEN:(b + 1) * SEQ] for b in range(BATCH)], axis=0)
    out_ref[...] = out.astype(out_ref.dtype)


# ------------------------------ packing (init-time, once) -------------------
def pack_params(params):
    """One-time layout prep: fused QKV, stacked layers, folded embeddings/mask."""
    emb = params["emb"]
    extra = emb["pos_emb"][:SEQ] + emb["type_emb"][0][None, :]        # (S, H)
    # additive base per sequence position; prefix_const folded into const rows
    add_one = jnp.concatenate(
        [extra[:PREFIX_LEN], extra[PREFIX_LEN:] + params["prefix_const"]], axis=0)
    add_base = jnp.tile(add_one, (BATCH, 1))                          # (B*S, H)

    row_b = jnp.arange(M_TOT)[:, None] // SEQ
    col_b = jnp.arange(M_TOT)[None, :] // SEQ
    mask = jnp.where(row_b == col_b, 0.0, -1e30).astype(jnp.float32)  # (B*S, B*S)

    Ls = params["layers"]
    packed = {
        "map_w": params["map_w"],                                     # (CLIP, L*P)
        "map_b": params["map_b"][None, :],                            # (1, L*P)
        "add_base": add_base,
        "mask": mask,
        "emb_g": emb["ln_g"][None, :],
        "emb_b": emb["ln_b"][None, :],
        "wqkv": jnp.stack([jnp.concatenate([p["wq"], p["wk"], p["wv"]], axis=1)
                           for p in Ls]),                             # (NL, H, 3H)
        "bqkv": jnp.stack([jnp.concatenate([p["bq"], p["bk"], p["bv"]])[None, :]
                           for p in Ls]),                             # (NL, 1, 3H)
        "wo": jnp.stack([p["wo"] for p in Ls]),
        "bo": jnp.stack([p["bo"][None, :] for p in Ls]),
        "ln1_g": jnp.stack([p["ln1_g"][None, :] for p in Ls]),
        "ln1_b": jnp.stack([p["ln1_b"][None, :] for p in Ls]),
        "wi": jnp.stack([p["wi"] for p in Ls]),
        "bi": jnp.stack([p["bi"][None, :] for p in Ls]),
        "wo2": jnp.stack([p["wo2"] for p in Ls]),
        "bo2": jnp.stack([p["bo2"][None, :] for p in Ls]),
        "ln2_g": jnp.stack([p["ln2_g"][None, :] for p in Ls]),
        "ln2_b": jnp.stack([p["ln2_b"][None, :] for p in Ls]),
    }
    return packed


# ------------------------------ forward (jitted) -----------------------------
def bert_mapper_forward(x, packed):
    """x: (B, clip_size) -> (B, constant_len, prefix_size). One pallas_call."""
    assert x.shape[0] == BATCH
    # Prefix Linear as one trivial XLA matmul (per perf review); (B, L*P)->(B*L, P)
    prefix = (jnp.dot(x, packed["map_w"]) + packed["map_b"]
              ).reshape(BATCH * PREFIX_LEN, PREFIX_SIZE)

    operands = (prefix, packed["add_base"], packed["mask"],
                packed["emb_g"], packed["emb_b"],
                packed["wqkv"], packed["bqkv"], packed["wo"], packed["bo"],
                packed["ln1_g"], packed["ln1_b"], packed["wi"], packed["bi"],
                packed["wo2"], packed["bo2"], packed["ln2_g"], packed["ln2_b"])

    vmem_spec = pl.BlockSpec(memory_space=pltpu.MemorySpace.VMEM)
    out = pl.pallas_call(
        _bert_mapper_kernel,
        out_shape=jax.ShapeDtypeStruct((BATCH * CONSTANT_LEN, PREFIX_SIZE),
                                       x.dtype),
        in_specs=[vmem_spec] * len(operands),
        out_specs=vmem_spec,
    )(*operands)
    return out.reshape(BATCH, CONSTANT_LEN, PREFIX_SIZE)


# ------------------------------ pure-JAX reference ---------------------------
def bert_mapper_reference(x, params):
    prefix = (x @ params["map_w"] + params["map_b"]).reshape(
        -1, PREFIX_LEN, PREFIX_SIZE)
    const = jnp.broadcast_to(params["prefix_const"],
                             (x.shape[0], CONSTANT_LEN, PREFIX_SIZE))
    h = jnp.concatenate([prefix, const], axis=1)                      # (B,S,H)
    emb = params["emb"]
    h = h + emb["pos_emb"][:SEQ][None] + emb["type_emb"][0][None, None]
    h = _layernorm(h, emb["ln_g"], emb["ln_b"])
    B = x.shape[0]
    for lp in params["layers"]:
        q = h @ lp["wq"] + lp["bq"]
        k = h @ lp["wk"] + lp["bk"]
        v = h @ lp["wv"] + lp["bv"]

        def split(t):
            return t.reshape(B, SEQ, NUM_HEADS, HEAD_DIM).transpose(0, 2, 1, 3)

        q, k, v = split(q), split(k), split(v)
        s = jnp.einsum("bhqd,bhkd->bhqk", q, k) / math.sqrt(HEAD_DIM)
        a = jax.nn.softmax(s, axis=-1)
        ctx = jnp.einsum("bhqk,bhkd->bhqd", a, v).transpose(0, 2, 1, 3)
        ctx = ctx.reshape(B, SEQ, HIDDEN)
        attn = ctx @ lp["wo"] + lp["bo"]
        h1 = _layernorm(attn + h, lp["ln1_g"], lp["ln1_b"])
        inter = _gelu_exact(h1 @ lp["wi"] + lp["bi"])
        ffn = inter @ lp["wo2"] + lp["bo2"]
        h = _layernorm(ffn + h1, lp["ln2_g"], lp["ln2_b"])
    return h[:, PREFIX_LEN:]


# ------------------------------ deterministic params -------------------------
def init_params(key):
    keys = iter(jax.random.split(key, 64))

    def w(shape, scale=0.02):
        return (scale * jax.random.normal(next(keys), shape)).astype(DTYPE)

    params = {
        "map_w": w((CLIP_SIZE, PREFIX_LEN * PREFIX_SIZE)),
        "map_b": jnp.zeros((PREFIX_LEN * PREFIX_SIZE,), DTYPE),
        "prefix_const": jax.random.normal(
            next(keys), (CONSTANT_LEN, PREFIX_SIZE)).astype(DTYPE),
        "emb": {
            "pos_emb": w((MAX_POS, HIDDEN)),
            "type_emb": w((2, HIDDEN)),
            "ln_g": jnp.ones((HIDDEN,), DTYPE),
            "ln_b": jnp.zeros((HIDDEN,), DTYPE),
        },
        "layers": [],
    }
    for _ in range(NUM_LAYERS):
        params["layers"].append({
            "wq": w((HIDDEN, HIDDEN)), "bq": jnp.zeros((HIDDEN,), DTYPE),
            "wk": w((HIDDEN, HIDDEN)), "bk": jnp.zeros((HIDDEN,), DTYPE),
            "wv": w((HIDDEN, HIDDEN)), "bv": jnp.zeros((HIDDEN,), DTYPE),
            "wo": w((HIDDEN, HIDDEN)), "bo": jnp.zeros((HIDDEN,), DTYPE),
            "ln1_g": jnp.ones((HIDDEN,), DTYPE),
            "ln1_b": jnp.zeros((HIDDEN,), DTYPE),
            "wi": w((HIDDEN, INTERMEDIATE)),
            "bi": jnp.zeros((INTERMEDIATE,), DTYPE),
            "wo2": w((INTERMEDIATE, HIDDEN)),
            "bo2": jnp.zeros((HIDDEN,), DTYPE),
            "ln2_g": jnp.ones((HIDDEN,), DTYPE),
            "ln2_b": jnp.zeros((HIDDEN,), DTYPE),
        })
    return params


if __name__ == "__main__":
    key = jax.random.PRNGKey(0)
    k_params, k_x = jax.random.split(key)
    params = init_params(k_params)
    x = jax.random.normal(k_x, (BATCH, CLIP_SIZE)).astype(DTYPE)

    packed = pack_params(params)          # one-time layout prep (outside jit)
    fwd = jax.jit(bert_mapper_forward)
    out = fwd(x, packed)
    out = jax.block_until_ready(out)

    assert out.shape == (BATCH, CONSTANT_LEN, PREFIX_SIZE), out.shape
    assert jnp.all(jnp.isfinite(out))

    ref = bert_mapper_reference(x, params)
    max_err = float(jnp.max(jnp.abs(out - ref)))
    # approx reciprocal in softmax + MXU accumulation order => loose tolerance
    assert max_err < 3e-2, f"max abs error {max_err}"

    print("KERNEL_OK")
</pallas_src>

<mosaic_0001>
module attributes {stable_mosaic.version = 11 : i64} {
  func.func @_bert_mapper_kernel(%arg0: memref<16x32xf32, #tpu.memory_space<vmem>>, %arg1: memref<32x32xf32, #tpu.memory_space<vmem>>, %arg2: memref<32x32xf32, #tpu.memory_space<vmem>>, %arg3: memref<1x32xf32, #tpu.memory_space<vmem>>, %arg4: memref<1x32xf32, #tpu.memory_space<vmem>>, %arg5: memref<2x32x96xf32, #tpu.memory_space<vmem>>, %arg6: memref<2x1x96xf32, #tpu.memory_space<vmem>>, %arg7: memref<2x32x32xf32, #tpu.memory_space<vmem>>, %arg8: memref<2x1x32xf32, #tpu.memory_space<vmem>>, %arg9: memref<2x1x32xf32, #tpu.memory_space<vmem>>, %arg10: memref<2x1x32xf32, #tpu.memory_space<vmem>>, %arg11: memref<2x32x64xf32, #tpu.memory_space<vmem>>, %arg12: memref<2x1x64xf32, #tpu.memory_space<vmem>>, %arg13: memref<2x64x32xf32, #tpu.memory_space<vmem>>, %arg14: memref<2x1x32xf32, #tpu.memory_space<vmem>>, %arg15: memref<2x1x32xf32, #tpu.memory_space<vmem>>, %arg16: memref<2x1x32xf32, #tpu.memory_space<vmem>>, %arg17: memref<16x32xf32, #tpu.memory_space<vmem>>) attributes {dimension_semantics = [], scalar_prefetch = 0 : i64, scratch_operands = 0 : i64, tpu.core_type = #tpu.core_type<tc>} {
    %c0 = arith.constant 0 : index
    %c0_0 = arith.constant 0 : index
    %0 = vector.load %arg0[%c0, %c0_0] : memref<16x32xf32, #tpu.memory_space<vmem>>, vector<16x32xf32>
    %cst = arith.constant 0.000000e+00 : f32
    %1 = vector.broadcast %cst : f32 to vector<8x32xf32>
    %2 = vector.extract_strided_slice %0 {offsets = [0, 0], sizes = [8, 32], strides = [1, 1]} : vector<16x32xf32> to vector<8x32xf32>
    %3 = vector.extract_strided_slice %0 {offsets = [8, 0], sizes = [8, 32], strides = [1, 1]} : vector<16x32xf32> to vector<8x32xf32>
    %4 = tpu.concatenate %2, %1, %3, %1 in 0 : vector<8x32xf32>, vector<8x32xf32>, vector<8x32xf32>, vector<8x32xf32> -> vector<32x32xf32>
    %c0_1 = arith.constant 0 : index
    %c0_2 = arith.constant 0 : index
    %5 = vector.load %arg1[%c0_1, %c0_2] : memref<32x32xf32, #tpu.memory_space<vmem>>, vector<32x32xf32>
    %6 = arith.addf %4, %5 : vector<32x32xf32>
    %c0_3 = arith.constant 0 : index
    %c0_4 = arith.constant 0 : index
    %7 = vector.load %arg3[%c0_3, %c0_4] : memref<1x32xf32, #tpu.memory_space<vmem>>, vector<1x32xf32>
    %c0_5 = arith.constant 0 : index
    %c0_6 = arith.constant 0 : index
    %8 = vector.load %arg4[%c0_5, %c0_6] : memref<1x32xf32, #tpu.memory_space<vmem>>, vector<1x32xf32>
    %cst_7 = arith.constant dense<0.000000e+00> : vector<32xf32>
    %9 = vector.multi_reduction <add>, %6, %cst_7 [1] : vector<32x32xf32> to vector<32xf32>
    %10 = vector.shape_cast %9 : vector<32xf32> to vector<32x1xf32>
    %cst_8 = arith.constant 3.200000e+01 : f32
    %11 = vector.broadcast %cst_8 : f32 to vector<32x1xf32>
    %12 = arith.divf %10, %11 : vector<32x1xf32>
    %13 = vector.broadcast %12 : vector<32x1xf32> to vector<32x32xf32>
    %14 = arith.subf %6, %13 : vector<32x32xf32>
    %15 = arith.mulf %14, %14 : vector<32x32xf32>
    %cst_9 = arith.constant dense<0.000000e+00> : vector<32xf32>
    %16 = vector.multi_reduction <add>, %15, %cst_9 [1] : vector<32x32xf32> to vector<32xf32>
    %17 = vector.shape_cast %16 : vector<32xf32> to vector<32x1xf32>
    %cst_10 = arith.constant 3.200000e+01 : f32
    %18 = vector.broadcast %cst_10 : f32 to vector<32x1xf32>
    %19 = arith.divf %17, %18 : vector<32x1xf32>
    %20 = vector.broadcast %12 : vector<32x1xf32> to vector<32x32xf32>
    %21 = arith.subf %6, %20 : vector<32x32xf32>
    %cst_11 = arith.constant 9.99999996E-13 : f32
    %22 = vector.broadcast %cst_11 : f32 to vector<32x1xf32>
    %23 = arith.addf %19, %22 : vector<32x1xf32>
    %24 = math.rsqrt %23 : vector<32x1xf32>
    %25 = vector.broadcast %24 : vector<32x1xf32> to vector<32x32xf32>
    %26 = arith.mulf %21, %25 : vector<32x32xf32>
    %27 = vector.broadcast %7 : vector<1x32xf32> to vector<32x32xf32>
    %28 = arith.mulf %26, %27 : vector<32x32xf32>
    %29 = vector.broadcast %8 : vector<1x32xf32> to vector<32x32xf32>
    %30 = arith.addf %28, %29 : vector<32x32xf32>
    %c0_12 = arith.constant 0 : index
    %c0_13 = arith.constant 0 : index
    %31 = vector.load %arg2[%c0_12, %c0_13] : memref<32x32xf32, #tpu.memory_space<vmem>>, vector<32x32xf32>
    %c0_14 = arith.constant 0 : index
    %c0_15 = arith.constant 0 : index
    %c0_16 = arith.constant 0 : index
    %32 = vector.load %arg5[%c0_14, %c0_15, %c0_16] : memref<2x32x96xf32, #tpu.memory_space<vmem>>, vector<1x32x96xf32>
    %33 = vector.shape_cast %32 : vector<1x32x96xf32> to vector<32x96xf32>
    %cst_17 = arith.constant dense<0.000000e+00> : vector<32x96xf32>
    %34 = tpu.matmul %30, %33, %cst_17 {dimension_numbers = #tpu.dot_dimension_numbers<[1], [0], [0], [1], [0, 0, 1, 1], [], []>} : vector<32x32xf32>, vector<32x96xf32>, vector<32x96xf32> -> vector<32x96xf32>
    %c0_18 = arith.constant 0 : index
    %c0_19 = arith.constant 0 : index
    %c0_20 = arith.constant 0 : index
    %35 = vector.load %arg6[%c0_18, %c0_19, %c0_20] : memref<2x1x96xf32, #tpu.memory_space<vmem>>, vector<1x1x96xf32>
    %36 = vector.shape_cast %35 : vector<1x1x96xf32> to vector<1x96xf32>
    %37 = vector.broadcast %36 : vector<1x96xf32> to vector<32x96xf32>
    %38 = arith.addf %34, %37 : vector<32x96xf32>
    %39 = vector.extract_strided_slice %38 {offsets = [0, 0], sizes = [32, 8], strides = [1, 1]} : vector<32x96xf32> to vector<32x8xf32>
    %40 = vector.extract_strided_slice %38 {offsets = [0, 32], sizes = [32, 8], strides = [1, 1]} : vector<32x96xf32> to vector<32x8xf32>
    %41 = vector.extract_strided_slice %38 {offsets = [0, 64], sizes = [32, 8], strides = [1, 1]} : vector<32x96xf32> to vector<32x8xf32>
    %cst_21 = arith.constant dense<0.000000e+00> : vector<32x32xf32>
    %42 = tpu.matmul %39, %40, %cst_21 {dimension_numbers = #tpu.dot_dimension_numbers<[1], [1], [0], [0], [0, 0, 1, 0], [], []>} : vector<32x8xf32>, vector<32x8xf32>, vector<32x32xf32> -> vector<32x32xf32>
    %cst_22 = arith.constant 0.353553385 : f32
    %43 = vector.broadcast %cst_22 : f32 to vector<32x32xf32>
    %44 = arith.mulf %42, %43 : vector<32x32xf32>
    %45 = arith.addf %44, %31 : vector<32x32xf32>
    %cst_23 = arith.constant dense<0xFF800000> : vector<32xf32>
    %46 = vector.multi_reduction <maximumf>, %45, %cst_23 [1] : vector<32x32xf32> to vector<32xf32>
    %47 = vector.shape_cast %46 : vector<32xf32> to vector<32x1xf32>
    %48 = vector.broadcast %47 : vector<32x1xf32> to vector<32x32xf32>
    %49 = arith.subf %45, %48 : vector<32x32xf32>
    %50 = math.exp %49 : vector<32x32xf32>
    %cst_24 = arith.constant dense<0.000000e+00> : vector<32xf32>
    %51 = vector.multi_reduction <add>, %50, %cst_24 [1] : vector<32x32xf32> to vector<32xf32>
    %52 = vector.shape_cast %51 : vector<32xf32> to vector<32x1xf32>
    %53 = tpu.reciprocal %52 {approx = true} : vector<32x1xf32> -> vector<32x1xf32>
    %54 = vector.broadcast %53 : vector<32x1xf32> to vector<32x32xf32>
    %55 = arith.mulf %50, %54 : vector<32x32xf32>
    %cst_25 = arith.constant dense<0.000000e+00> : vector<32x8xf32>
    %56 = tpu.matmul %55, %41, %cst_25 {dimension_numbers = #tpu.dot_dimension_numbers<[1], [0], [0], [1], [0, 0, 1, 1], [], []>} : vector<32x32xf32>, vector<32x8xf32>, vector<32x8xf32> -> vector<32x8xf32>
    %57 = vector.extract_strided_slice %38 {offsets = [0, 8], sizes = [32, 8], strides = [1, 1]} : vector<32x96xf32> to vector<32x8xf32>
    %58 = vector.extract_strided_slice %38 {offsets = [0, 40], sizes = [32, 8], strides = [1, 1]} : vector<32x96xf32> to vector<32x8xf32>
    %59 = vector.extract_strided_slice %38 {offsets = [0, 72], sizes = [32, 8], strides = [1, 1]} : vector<32x96xf32> to vector<32x8xf32>
    %cst_26 = arith.constant dense<0.000000e+00> : vector<32x32xf32>
    %60 = tpu.matmul %57, %58, %cst_26 {dimension_numbers = #tpu.dot_dimension_numbers<[1], [1], [0], [0], [0, 0, 1, 0], [], []>} : vector<32x8xf32>, vector<32x8xf32>, vector<32x32xf32> -> vector<32x32xf32>
    %cst_27 = arith.constant 0.353553385 : f32
    %61 = vector.broadcast %cst_27 : f32 to vector<32x32xf32>
    %62 = arith.mulf %60, %61 : vector<32x32xf32>
    %63 = arith.addf %62, %31 : vector<32x32xf32>
    %cst_28 = arith.constant dense<0xFF800000> : vector<32xf32>
    %64 = vector.multi_reduction <maximumf>, %63, %cst_28 [1] : vector<32x32xf32> to vector<32xf32>
    %65 = vector.shape_cast %64 : vector<32xf32> to vector<32x1xf32>
    %66 = vector.broadcast %65 : vector<32x1xf32> to vector<32x32xf32>
    %67 = arith.subf %63, %66 : vector<32x32xf32>
    %68 = math.exp %67 : vector<32x32xf32>
    %cst_29 = arith.constant dense<0.000000e+00> : vector<32xf32>
    %69 = vector.multi_reduction <add>, %68, %cst_29 [1] : vector<32x32xf32> to vector<32xf32>
    %70 = vector.shape_cast %69 : vector<32xf32> to vector<32x1xf32>
    %71 = tpu.reciprocal %70 {approx = true} : vector<32x1xf32> -> vector<32x1xf32>
    %72 = vector.broadcast %71 : vector<32x1xf32> to vector<32x32xf32>
    %73 = arith.mulf %68, %72 : vector<32x32xf32>
    %cst_30 = arith.constant dense<0.000000e+00> : vector<32x8xf32>
    %74 = tpu.matmul %73, %59, %cst_30 {dimension_numbers = #tpu.dot_dimension_numbers<[1], [0], [0], [1], [0, 0, 1, 1], [], []>} : vector<32x32xf32>, vector<32x8xf32>, vector<32x8xf32> -> vector<32x8xf32>
    %75 = vector.extract_strided_slice %38 {offsets = [0, 16], sizes = [32, 8], strides = [1, 1]} : vector<32x96xf32> to vector<32x8xf32>
    %76 = vector.extract_strided_slice %38 {offsets = [0, 48], sizes = [32, 8], strides = [1, 1]} : vector<32x96xf32> to vector<32x8xf32>
    %77 = vector.extract_strided_slice %38 {offsets = [0, 80], sizes = [32, 8], strides = [1, 1]} : vector<32x96xf32> to vector<32x8xf32>
    %cst_31 = arith.constant dense<0.000000e+00> : vector<32x32xf32>
    %78 = tpu.matmul %75, %76, %cst_31 {dimension_numbers = #tpu.dot_dimension_numbers<[1], [1], [0], [0], [0, 0, 1, 0], [], []>} : vector<32x8xf32>, vector<32x8xf32>, vector<32x32xf32> -> vector<32x32xf32>
    %cst_32 = arith.constant 0.353553385 : f32
    %79 = vector.broadcast %cst_32 : f32 to vector<32x32xf32>
    %80 = arith.mulf %78, %79 : vector<32x32xf32>
    %81 = arith.addf %80, %31 : vector<32x32xf32>
    %cst_33 = arith.constant dense<0xFF800000> : vector<32xf32>
    %82 = vector.multi_reduction <maximumf>, %81, %cst_33 [1] : vector<32x32xf32> to vector<32xf32>
    %83 = vector.shape_cast %82 : vector<32xf32> to vector<32x1xf32>
    %84 = vector.broadcast %83 : vector<32x1xf32> to vector<32x32xf32>
    %85 = arith.subf %81, %84 : vector<32x32xf32>
    %86 = math.exp %85 : vector<32x32xf32>
    %cst_34 = arith.constant dense<0.000000e+00> : vector<32xf32>
    %87 = vector.multi_reduction <add>, %86, %cst_34 [1] : vector<32x32xf32> to vector<32xf32>
    %88 = vector.shape_cast %87 : vector<32xf32> to vector<32x1xf32>
    %89 = tpu.reciprocal %88 {approx = true} : vector<32x1xf32> -> vector<32x1xf32>
    %90 = vector.broadcast %89 : vector<32x1xf32> to vector<32x32xf32>
    %91 = arith.mulf %86, %90 : vector<32x32xf32>
    %cst_35 = arith.constant dense<0.000000e+00> : vector<32x8xf32>
    %92 = tpu.matmul %91, %77, %cst_35 {dimension_numbers = #tpu.dot_dimension_numbers<[1], [0], [0], [1], [0, 0, 1, 1], [], []>} : vector<32x32xf32>, vector<32x8xf32>, vector<32x8xf32> -> vector<32x8xf32>
    %93 = vector.extract_strided_slice %38 {offsets = [0, 24], sizes = [32, 8], strides = [1, 1]} : vector<32x96xf32> to vector<32x8xf32>
    %94 = vector.extract_strided_slice %38 {offsets = [0, 56], sizes = [32, 8], strides = [1, 1]} : vector<32x96xf32> to vector<32x8xf32>
    %95 = vector.extract_strided_slice %38 {offsets = [0, 88], sizes = [32, 8], strides = [1, 1]} : vector<32x96xf32> to vector<32x8xf32>
    %cst_36 = arith.constant dense<0.000000e+00> : vector<32x32xf32>
    %96 = tpu.matmul %93, %94, %cst_36 {dimension_numbers = #tpu.dot_dimension_numbers<[1], [1], [0], [0], [0, 0, 1, 0], [], []>} : vector<32x8xf32>, vector<32x8xf32>, vector<32x32xf32> -> vector<32x32xf32>
    %cst_37 = arith.constant 0.353553385 : f32
    %97 = vector.broadcast %cst_37 : f32 to vector<32x32xf32>
    %98 = arith.mulf %96, %97 : vector<32x32xf32>
    %99 = arith.addf %98, %31 : vector<32x32xf32>
    %cst_38 = arith.constant dense<0xFF800000> : vector<32xf32>
    %100 = vector.multi_reduction <maximumf>, %99, %cst_38 [1] : vector<32x32xf32> to vector<32xf32>
    %101 = vector.shape_cast %100 : vector<32xf32> to vector<32x1xf32>
    %102 = vector.broadcast %101 : vector<32x1xf32> to vector<32x32xf32>
    %103 = arith.subf %99, %102 : vector<32x32xf32>
    %104 = math.exp %103 : vector<32x32xf32>
    %cst_39 = arith.constant dense<0.000000e+00> : vector<32xf32>
    %105 = vector.multi_reduction <add>, %104, %cst_39 [1] : vector<32x32xf32> to vector<32xf32>
    %106 = vector.shape_cast %105 : vector<32xf32> to vector<32x1xf32>
    %107 = tpu.reciprocal %106 {approx = true} : vector<32x1xf32> -> vector<32x1xf32>
    %108 = vector.broadcast %107 : vector<32x1xf32> to vector<32x32xf32>
    %109 = arith.mulf %104, %108 : vector<32x32xf32>
    %cst_40 = arith.constant dense<0.000000e+00> : vector<32x8xf32>
    %110 = tpu.matmul %109, %95, %cst_40 {dimension_numbers = #tpu.dot_dimension_numbers<[1], [0], [0], [1], [0, 0, 1, 1], [], []>} : vector<32x32xf32>, vector<32x8xf32>, vector<32x8xf32> -> vector<32x8xf32>
    %111 = tpu.concatenate %56, %74, %92, %110 in 1 : vector<32x8xf32>, vector<32x8xf32>, vector<32x8xf32>, vector<32x8xf32> -> vector<32x32xf32>
    %c0_41 = arith.constant 0 : index
    %c0_42 = arith.constant 0 : index
    %c0_43 = arith.constant 0 : index
    %112 = vector.load %arg7[%c0_41, %c0_42, %c0_43] : memref<2x32x32xf32, #tpu.memory_space<vmem>>, vector<1x32x32xf32>
    %113 = vector.shape_cast %112 : vector<1x32x32xf32> to vector<32x32xf32>
    %cst_44 = arith.constant dense<0.000000e+00> : vector<32x32xf32>
    %114 = tpu.matmul %111, %113, %cst_44 {dimension_numbers = #tpu.dot_dimension_numbers<[1], [0], [0], [1], [0, 0, 1, 1], [], []>} : vector<32x32xf32>, vector<32x32xf32>, vector<32x32xf32> -> vector<32x32xf32>
    %c0_45 = arith.constant 0 : index
    %c0_46 = arith.constant 0 : index
    %c0_47 = arith.constant 0 : index
    %115 = vector.load %arg8[%c0_45, %c0_46, %c0_47] : memref<2x1x32xf32, #tpu.memory_space<vmem>>, vector<1x1x32xf32>
    %116 = vector.shape_cast %115 : vector<1x1x32xf32> to vector<1x32xf32>
    %117 = vector.broadcast %116 : vector<1x32xf32> to vector<32x32xf32>
    %118 = arith.addf %114, %117 : vector<32x32xf32>
    %119 = arith.addf %118, %30 : vector<32x32xf32>
    %c0_48 = arith.constant 0 : index
    %c0_49 = arith.constant 0 : index
    %c0_50 = arith.constant 0 : index
    %120 = vector.load %arg9[%c0_48, %c0_49, %c0_50] : memref<2x1x32xf32, #tpu.memory_space<vmem>>, vector<1x1x32xf32>
    %121 = vector.shape_cast %120 : vector<1x1x32xf32> to vector<1x32xf32>
    %c0_51 = arith.constant 0 : index
    %c0_52 = arith.constant 0 : index
    %c0_53 = arith.constant 0 : index
    %122 = vector.load %arg10[%c0_51, %c0_52, %c0_53] : memref<2x1x32xf32, #tpu.memory_space<vmem>>, vector<1x1x32xf32>
    %123 = vector.shape_cast %122 : vector<1x1x32xf32> to vector<1x32xf32>
    %cst_54 = arith.constant dense<0.000000e+00> : vector<32xf32>
    %124 = vector.multi_reduction <add>, %119, %cst_54 [1] : vector<32x32xf32> to vector<32xf32>
    %125 = vector.shape_cast %124 : vector<32xf32> to vector<32x1xf32>
    %cst_55 = arith.constant 3.200000e+01 : f32
    %126 = vector.broadcast %cst_55 : f32 to vector<32x1xf32>
    %127 = arith.divf %125, %126 : vector<32x1xf32>
    %128 = vector.broadcast %127 : vector<32x1xf32> to vector<32x32xf32>
    %129 = arith.subf %119, %128 : vector<32x32xf32>
    %130 = arith.mulf %129, %129 : vector<32x32xf32>
    %cst_56 = arith.constant dense<0.000000e+00> : vector<32xf32>
    %131 = vector.multi_reduction <add>, %130, %cst_56 [1] : vector<32x32xf32> to vector<32xf32>
    %132 = vector.shape_cast %131 : vector<32xf32> to vector<32x1xf32>
    %cst_57 = arith.constant 3.200000e+01 : f32
    %133 = vector.broadcast %cst_57 : f32 to vector<32x1xf32>
    %134 = arith.divf %132, %133 : vector<32x1xf32>
    %135 = vector.broadcast %127 : vector<32x1xf32> to vector<32x32xf32>
    %136 = arith.subf %119, %135 : vector<32x32xf32>
    %cst_58 = arith.constant 9.99999996E-13 : f32
    %137 = vector.broadcast %cst_58 : f32 to vector<32x1xf32>
    %138 = arith.addf %134, %137 : vector<32x1xf32>
    %139 = math.rsqrt %138 : vector<32x1xf32>
    %140 = vector.broadcast %139 : vector<32x1xf32> to vector<32x32xf32>
    %141 = arith.mulf %136, %140 : vector<32x32xf32>
    %142 = vector.broadcast %121 : vector<1x32xf32> to vector<32x32xf32>
    %143 = arith.mulf %141, %142 : vector<32x32xf32>
    %144 = vector.broadcast %123 : vector<1x32xf32> to vector<32x32xf32>
    %145 = arith.addf %143, %144 : vector<32x32xf32>
    %c0_59 = arith.constant 0 : index
    %c0_60 = arith.constant 0 : index
    %c0_61 = arith.constant 0 : index
    %146 = vector.load %arg11[%c0_59, %c0_60, %c0_61] : memref<2x32x64xf32, #tpu.memory_space<vmem>>, vector<1x32x64xf32>
    %147 = vector.shape_cast %146 : vector<1x32x64xf32> to vector<32x64xf32>
    %cst_62 = arith.constant dense<0.000000e+00> : vector<32x64xf32>
    %148 = tpu.matmul %145, %147, %cst_62 {dimension_numbers = #tpu.dot_dimension_numbers<[1], [0], [0], [1], [0, 0, 1, 1], [], []>} : vector<32x32xf32>, vector<32x64xf32>, vector<32x64xf32> -> vector<32x64xf32>
    %c0_63 = arith.constant 0 : index
    %c0_64 = arith.constant 0 : index
    %c0_65 = arith.constant 0 : index
    %149 = vector.load %arg12[%c0_63, %c0_64, %c0_65] : memref<2x1x64xf32, #tpu.memory_space<vmem>>, vector<1x1x64xf32>
    %150 = vector.shape_cast %149 : vector<1x1x64xf32> to vector<1x64xf32>
    %151 = vector.broadcast %150 : vector<1x64xf32> to vector<32x64xf32>
    %152 = arith.addf %148, %151 : vector<32x64xf32>
    %cst_66 = arith.constant 5.000000e-01 : f32
    %153 = vector.broadcast %cst_66 : f32 to vector<32x64xf32>
    %154 = arith.mulf %153, %152 : vector<32x64xf32>
    %cst_67 = arith.constant 0.707106769 : f32
    %155 = vector.broadcast %cst_67 : f32 to vector<32x64xf32>
    %156 = arith.mulf %152, %155 : vector<32x64xf32>
    %157 = math.erf %156 : vector<32x64xf32>
    %cst_68 = arith.constant 1.000000e+00 : f32
    %158 = vector.broadcast %cst_68 : f32 to vector<32x64xf32>
    %159 = arith.addf %158, %157 : vector<32x64xf32>
    %160 = arith.mulf %154, %159 : vector<32x64xf32>
    %c0_69 = arith.constant 0 : index
    %c0_70 = arith.constant 0 : index
    %c0_71 = arith.constant 0 : index
    %161 = vector.load %arg13[%c0_69, %c0_70, %c0_71] : memref<2x64x32xf32, #tpu.memory_space<vmem>>, vector<1x64x32xf32>
    %162 = vector.shape_cast %161 : vector<1x64x32xf32> to vector<64x32xf32>
    %cst_72 = arith.constant dense<0.000000e+00> : vector<32x32xf32>
    %163 = tpu.matmul %160, %162, %cst_72 {dimension_numbers = #tpu.dot_dimension_numbers<[1], [0], [0], [1], [0, 0, 1, 1], [], []>} : vector<32x64xf32>, vector<64x32xf32>, vector<32x32xf32> -> vector<32x32xf32>
    %c0_73 = arith.constant 0 : index
    %c0_74 = arith.constant 0 : index
    %c0_75 = arith.constant 0 : index
    %164 = vector.load %arg14[%c0_73, %c0_74, %c0_75] : memref<2x1x32xf32, #tpu.memory_space<vmem>>, vector<1x1x32xf32>
    %165 = vector.shape_cast %164 : vector<1x1x32xf32> to vector<1x32xf32>
    %166 = vector.broadcast %165 : vector<1x32xf32> to vector<32x32xf32>
    %167 = arith.addf %163, %166 : vector<32x32xf32>
    %168 = arith.addf %167, %145 : vector<32x32xf32>
    %c0_76 = arith.constant 0 : index
    %c0_77 = arith.constant 0 : index
    %c0_78 = arith.constant 0 : index
    %169 = vector.load %arg15[%c0_76, %c0_77, %c0_78] : memref<2x1x32xf32, #tpu.memory_space<vmem>>, vector<1x1x32xf32>
    %170 = vector.shape_cast %169 : vector<1x1x32xf32> to vector<1x32xf32>
    %c0_79 = arith.constant 0 : index
    %c0_80 = arith.constant 0 : index
    %c0_81 = arith.constant 0 : index
    %171 = vector.load %arg16[%c0_79, %c0_80, %c0_81] : memref<2x1x32xf32, #tpu.memory_space<vmem>>, vector<1x1x32xf32>
    %172 = vector.shape_cast %171 : vector<1x1x32xf32> to vector<1x32xf32>
    %cst_82 = arith.constant dense<0.000000e+00> : vector<32xf32>
    %173 = vector.multi_reduction <add>, %168, %cst_82 [1] : vector<32x32xf32> to vector<32xf32>
    %174 = vector.shape_cast %173 : vector<32xf32> to vector<32x1xf32>
    %cst_83 = arith.constant 3.200000e+01 : f32
    %175 = vector.broadcast %cst_83 : f32 to vector<32x1xf32>
    %176 = arith.divf %174, %175 : vector<32x1xf32>
    %177 = vector.broadcast %176 : vector<32x1xf32> to vector<32x32xf32>
    %178 = arith.subf %168, %177 : vector<32x32xf32>
    %179 = arith.mulf %178, %178 : vector<32x32xf32>
    %cst_84 = arith.constant dense<0.000000e+00> : vector<32xf32>
    %180 = vector.multi_reduction <add>, %179, %cst_84 [1] : vector<32x32xf32> to vector<32xf32>
    %181 = vector.shape_cast %180 : vector<32xf32> to vector<32x1xf32>
    %cst_85 = arith.constant 3.200000e+01 : f32
    %182 = vector.broadcast %cst_85 : f32 to vector<32x1xf32>
    %183 = arith.divf %181, %182 : vector<32x1xf32>
    %184 = vector.broadcast %176 : vector<32x1xf32> to vector<32x32xf32>
    %185 = arith.subf %168, %184 : vector<32x32xf32>
    %cst_86 = arith.constant 9.99999996E-13 : f32
    %186 = vector.broadcast %cst_86 : f32 to vector<32x1xf32>
    %187 = arith.addf %183, %186 : vector<32x1xf32>
    %188 = math.rsqrt %187 : vector<32x1xf32>
    %189 = vector.broadcast %188 : vector<32x1xf32> to vector<32x32xf32>
    %190 = arith.mulf %185, %189 : vector<32x32xf32>
    %191 = vector.broadcast %170 : vector<1x32xf32> to vector<32x32xf32>
    %192 = arith.mulf %190, %191 : vector<32x32xf32>
    %193 = vector.broadcast %172 : vector<1x32xf32> to vector<32x32xf32>
    %194 = arith.addf %192, %193 : vector<32x32xf32>
    %c1 = arith.constant 1 : index
    %c0_87 = arith.constant 0 : index
    %c0_88 = arith.constant 0 : index
    %195 = vector.load %arg5[%c1, %c0_87, %c0_88] : memref<2x32x96xf32, #tpu.memory_space<vmem>>, vector<1x32x96xf32>
    %196 = vector.shape_cast %195 : vector<1x32x96xf32> to vector<32x96xf32>
    %cst_89 = arith.constant dense<0.000000e+00> : vector<32x96xf32>
    %197 = tpu.matmul %194, %196, %cst_89 {dimension_numbers = #tpu.dot_dimension_numbers<[1], [0], [0], [1], [0, 0, 1, 1], [], []>} : vector<32x32xf32>, vector<32x96xf32>, vector<32x96xf32> -> vector<32x96xf32>
    %c1_90 = arith.constant 1 : index
    %c0_91 = arith.constant 0 : index
    %c0_92 = arith.constant 0 : index
    %198 = vector.load %arg6[%c1_90, %c0_91, %c0_92] : memref<2x1x96xf32, #tpu.memory_space<vmem>>, vector<1x1x96xf32>
    %199 = vector.shape_cast %198 : vector<1x1x96xf32> to vector<1x96xf32>
    %200 = vector.broadcast %199 : vector<1x96xf32> to vector<32x96xf32>
    %201 = arith.addf %197, %200 : vector<32x96xf32>
    %202 = vector.extract_strided_slice %201 {offsets = [0, 0], sizes = [32, 8], strides = [1, 1]} : vector<32x96xf32> to vector<32x8xf32>
    %203 = vector.extract_strided_slice %201 {offsets = [0, 32], sizes = [32, 8], strides = [1, 1]} : vector<32x96xf32> to vector<32x8xf32>
    %204 = vector.extract_strided_slice %201 {offsets = [0, 64], sizes = [32, 8], strides = [1, 1]} : vector<32x96xf32> to vector<32x8xf32>
    %cst_93 = arith.constant dense<0.000000e+00> : vector<32x32xf32>
    %205 = tpu.matmul %202, %203, %cst_93 {dimension_numbers = #tpu.dot_dimension_numbers<[1], [1], [0], [0], [0, 0, 1, 0], [], []>} : vector<32x8xf32>, vector<32x8xf32>, vector<32x32xf32> -> vector<32x32xf32>
    %cst_94 = arith.constant 0.353553385 : f32
    %206 = vector.broadcast %cst_94 : f32 to vector<32x32xf32>
    %207 = arith.mulf %205, %206 : vector<32x32xf32>
    %208 = arith.addf %207, %31 : vector<32x32xf32>
    %cst_95 = arith.constant dense<0xFF800000> : vector<32xf32>
    %209 = vector.multi_reduction <maximumf>, %208, %cst_95 [1] : vector<32x32xf32> to vector<32xf32>
    %210 = vector.shape_cast %209 : vector<32xf32> to vector<32x1xf32>
    %211 = vector.broadcast %210 : vector<32x1xf32> to vector<32x32xf32>
    %212 = arith.subf %208, %211 : vector<32x32xf32>
    %213 = math.exp %212 : vector<32x32xf32>
    %cst_96 = arith.constant dense<0.000000e+00> : vector<32xf32>
    %214 = vector.multi_reduction <add>, %213, %cst_96 [1] : vector<32x32xf32> to vector<32xf32>
    %215 = vector.shape_cast %214 : vector<32xf32> to vector<32x1xf32>
    %216 = tpu.reciprocal %215 {approx = true} : vector<32x1xf32> -> vector<32x1xf32>
    %217 = vector.broadcast %216 : vector<32x1xf32> to vector<32x32xf32>
    %218 = arith.mulf %213, %217 : vector<32x32xf32>
    %cst_97 = arith.constant dense<0.000000e+00> : vector<32x8xf32>
    %219 = tpu.matmul %218, %204, %cst_97 {dimension_numbers = #tpu.dot_dimension_numbers<[1], [0], [0], [1], [0, 0, 1, 1], [], []>} : vector<32x32xf32>, vector<32x8xf32>, vector<32x8xf32> -> vector<32x8xf32>
    %220 = vector.extract_strided_slice %201 {offsets = [0, 8], sizes = [32, 8], strides = [1, 1]} : vector<32x96xf32> to vector<32x8xf32>
    %221 = vector.extract_strided_slice %201 {offsets = [0, 40], sizes = [32, 8], strides = [1, 1]} : vector<32x96xf32> to vector<32x8xf32>
    %222 = vector.extract_strided_slice %201 {offsets = [0, 72], sizes = [32, 8], strides = [1, 1]} : vector<32x96xf32> to vector<32x8xf32>
    %cst_98 = arith.constant dense<0.000000e+00> : vector<32x32xf32>
    %223 = tpu.matmul %220, %221, %cst_98 {dimension_numbers = #tpu.dot_dimension_numbers<[1], [1], [0], [0], [0, 0, 1, 0], [], []>} : vector<32x8xf32>, vector<32x8xf32>, vector<32x32xf32> -> vector<32x32xf32>
    %cst_99 = arith.constant 0.353553385 : f32
    %224 = vector.broadcast %cst_99 : f32 to vector<32x32xf32>
    %225 = arith.mulf %223, %224 : vector<32x32xf32>
    %226 = arith.addf %225, %31 : vector<32x32xf32>
    %cst_100 = arith.constant dense<0xFF800000> : vector<32xf32>
    %227 = vector.multi_reduction <maximumf>, %226, %cst_100 [1] : vector<32x32xf32> to vector<32xf32>
    %228 = vector.shape_cast %227 : vector<32xf32> to vector<32x1xf32>
    %229 = vector.broadcast %228 : vector<32x1xf32> to vector<32x32xf32>
    %230 = arith.subf %226, %229 : vector<32x32xf32>
    %231 = math.exp %230 : vector<32x32xf32>
    %cst_101 = arith.constant dense<0.000000e+00> : vector<32xf32>
    %232 = vector.multi_reduction <add>, %231, %cst_101 [1] : vector<32x32xf32> to vector<32xf32>
    %233 = vector.shape_cast %232 : vector<32xf32> to vector<32x1xf32>
    %234 = tpu.reciprocal %233 {approx = true} : vector<32x1xf32> -> vector<32x1xf32>
    %235 = vector.broadcast %234 : vector<32x1xf32> to vector<32x32xf32>
    %236 = arith.mulf %231, %235 : vector<32x32xf32>
    %cst_102 = arith.constant dense<0.000000e+00> : vector<32x8xf32>
    %237 = tpu.matmul %236, %222, %cst_102 {dimension_numbers = #tpu.dot_dimension_numbers<[1], [0], [0], [1], [0, 0, 1, 1], [], []>} : vector<32x32xf32>, vector<32x8xf32>, vector<32x8xf32> -> vector<32x8xf32>
    %238 = vector.extract_strided_slice %201 {offsets = [0, 16], sizes = [32, 8], strides = [1, 1]} : vector<32x96xf32> to vector<32x8xf32>
    %239 = vector.extract_strided_slice %201 {offsets = [0, 48], sizes = [32, 8], strides = [1, 1]} : vector<32x96xf32> to vector<32x8xf32>
    %240 = vector.extract_strided_slice %201 {offsets = [0, 80], sizes = [32, 8], strides = [1, 1]} : vector<32x96xf32> to vector<32x8xf32>
    %cst_103 = arith.constant dense<0.000000e+00> : vector<32x32xf32>
    %241 = tpu.matmul %238, %239, %cst_103 {dimension_numbers = #tpu.dot_dimension_numbers<[1], [1], [0], [0], [0, 0, 1, 0], [], []>} : vector<32x8xf32>, vector<32x8xf32>, vector<32x32xf32> -> vector<32x32xf32>
    %cst_104 = arith.constant 0.353553385 : f32
    %242 = vector.broadcast %cst_104 : f32 to vector<32x32xf32>
    %243 = arith.mulf %241, %242 : vector<32x32xf32>
    %244 = arith.addf %243, %31 : vector<32x32xf32>
    %cst_105 = arith.constant dense<0xFF800000> : vector<32xf32>
    %245 = vector.multi_reduction <maximumf>, %244, %cst_105 [1] : vector<32x32xf32> to vector<32xf32>
    %246 = vector.shape_cast %245 : vector<32xf32> to vector<32x1xf32>
    %247 = vector.broadcast %246 : vector<32x1xf32> to vector<32x32xf32>
    %248 = arith.subf %244, %247 : vector<32x32xf32>
    %249 = math.exp %248 : vector<32x32xf32>
    %cst_106 = arith.constant dense<0.000000e+00> : vector<32xf32>
    %250 = vector.multi_reduction <add>, %249, %cst_106 [1] : vector<32x32xf32> to vector<32xf32>
    %251 = vector.shape_cast %250 : vector<32xf32> to vector<32x1xf32>
    %252 = tpu.reciprocal %251 {approx = true} : vector<32x1xf32> -> vector<32x1xf32>
    %253 = vector.broadcast %252 : vector<32x1xf32> to vector<32x32xf32>
    %254 = arith.mulf %249, %253 : vector<32x32xf32>
    %cst_107 = arith.constant dense<0.000000e+00> : vector<32x8xf32>
    %255 = tpu.matmul %254, %240, %cst_107 {dimension_numbers = #tpu.dot_dimension_numbers<[1], [0], [0], [1], [0, 0, 1, 1], [], []>} : vector<32x32xf32>, vector<32x8xf32>, vector<32x8xf32> -> vector<32x8xf32>
    %256 = vector.extract_strided_slice %201 {offsets = [0, 24], sizes = [32, 8], strides = [1, 1]} : vector<32x96xf32> to vector<32x8xf32>
    %257 = vector.extract_strided_slice %201 {offsets = [0, 56], sizes = [32, 8], strides = [1, 1]} : vector<32x96xf32> to vector<32x8xf32>
    %258 = vector.extract_strided_slice %201 {offsets = [0, 88], sizes = [32, 8], strides = [1, 1]} : vector<32x96xf32> to vector<32x8xf32>
    %cst_108 = arith.constant dense<0.000000e+00> : vector<32x32xf32>
    %259 = tpu.matmul %256, %257, %cst_108 {dimension_numbers = #tpu.dot_dimension_numbers<[1], [1], [0], [0], [0, 0, 1, 0], [], []>} : vector<32x8xf32>, vector<32x8xf32>, vector<32x32xf32> -> vector<32x32xf32>
    %cst_109 = arith.constant 0.353553385 : f32
    %260 = vector.broadcast %cst_109 : f32 to vector<32x32xf32>
    %261 = arith.mulf %259, %260 : vector<32x32xf32>
    %262 = arith.addf %261, %31 : vector<32x32xf32>
    %cst_110 = arith.constant dense<0xFF800000> : vector<32xf32>
    %263 = vector.multi_reduction <maximumf>, %262, %cst_110 [1] : vector<32x32xf32> to vector<32xf32>
    %264 = vector.shape_cast %263 : vector<32xf32> to vector<32x1xf32>
    %265 = vector.broadcast %264 : vector<32x1xf32> to vector<32x32xf32>
    %266 = arith.subf %262, %265 : vector<32x32xf32>
    %267 = math.exp %266 : vector<32x32xf32>
    %cst_111 = arith.constant dense<0.000000e+00> : vector<32xf32>
    %268 = vector.multi_reduction <add>, %267, %cst_111 [1] : vector<32x32xf32> to vector<32xf32>
    %269 = vector.shape_cast %268 : vector<32xf32> to vector<32x1xf32>
    %270 = tpu.reciprocal %269 {approx = true} : vector<32x1xf32> -> vector<32x1xf32>
    %271 = vector.broadcast %270 : vector<32x1xf32> to vector<32x32xf32>
    %272 = arith.mulf %267, %271 : vector<32x32xf32>
    %cst_112 = arith.constant dense<0.000000e+00> : vector<32x8xf32>
    %273 = tpu.matmul %272, %258, %cst_112 {dimension_numbers = #tpu.dot_dimension_numbers<[1], [0], [0], [1], [0, 0, 1, 1], [], []>} : vector<32x32xf32>, vector<32x8xf32>, vector<32x8xf32> -> vector<32x8xf32>
    %274 = tpu.concatenate %219, %237, %255, %273 in 1 : vector<32x8xf32>, vector<32x8xf32>, vector<32x8xf32>, vector<32x8xf32> -> vector<32x32xf32>
    %c1_113 = arith.constant 1 : index
    %c0_114 = arith.constant 0 : index
    %c0_115 = arith.constant 0 : index
    %275 = vector.load %arg7[%c1_113, %c0_114, %c0_115] : memref<2x32x32xf32, #tpu.memory_space<vmem>>, vector<1x32x32xf32>
    %276 = vector.shape_cast %275 : vector<1x32x32xf32> to vector<32x32xf32>
    %cst_116 = arith.constant dense<0.000000e+00> : vector<32x32xf32>
    %277 = tpu.matmul %274, %276, %cst_116 {dimension_numbers = #tpu.dot_dimension_numbers<[1], [0], [0], [1], [0, 0, 1, 1], [], []>} : vector<32x32xf32>, vector<32x32xf32>, vector<32x32xf32> -> vector<32x32xf32>
    %c1_117 = arith.constant 1 : index
    %c0_118 = arith.constant 0 : index
    %c0_119 = arith.constant 0 : index
    %278 = vector.load %arg8[%c1_117, %c0_118, %c0_119] : memref<2x1x32xf32, #tpu.memory_space<vmem>>, vector<1x1x32xf32>
    %279 = vector.shape_cast %278 : vector<1x1x32xf32> to vector<1x32xf32>
    %280 = vector.broadcast %279 : vector<1x32xf32> to vector<32x32xf32>
    %281 = arith.addf %277, %280 : vector<32x32xf32>
    %282 = arith.addf %281, %194 : vector<32x32xf32>
    %c1_120 = arith.constant 1 : index
    %c0_121 = arith.constant 0 : index
    %c0_122 = arith.constant 0 : index
    %283 = vector.load %arg9[%c1_120, %c0_121, %c0_122] : memref<2x1x32xf32, #tpu.memory_space<vmem>>, vector<1x1x32xf32>
    %284 = vector.shape_cast %283 : vector<1x1x32xf32> to vector<1x32xf32>
    %c1_123 = arith.constant 1 : index
    %c0_124 = arith.constant 0 : index
    %c0_125 = arith.constant 0 : index
    %285 = vector.load %arg10[%c1_123, %c0_124, %c0_125] : memref<2x1x32xf32, #tpu.memory_space<vmem>>, vector<1x1x32xf32>
    %286 = vector.shape_cast %285 : vector<1x1x32xf32> to vector<1x32xf32>
    %cst_126 = arith.constant dense<0.000000e+00> : vector<32xf32>
    %287 = vector.multi_reduction <add>, %282, %cst_126 [1] : vector<32x32xf32> to vector<32xf32>
    %288 = vector.shape_cast %287 : vector<32xf32> to vector<32x1xf32>
    %cst_127 = arith.constant 3.200000e+01 : f32
    %289 = vector.broadcast %cst_127 : f32 to vector<32x1xf32>
    %290 = arith.divf %288, %289 : vector<32x1xf32>
    %291 = vector.broadcast %290 : vector<32x1xf32> to vector<32x32xf32>
    %292 = arith.subf %282, %291 : vector<32x32xf32>
    %293 = arith.mulf %292, %292 : vector<32x32xf32>
    %cst_128 = arith.constant dense<0.000000e+00> : vector<32xf32>
    %294 = vector.multi_reduction <add>, %293, %cst_128 [1] : vector<32x32xf32> to vector<32xf32>
    %295 = vector.shape_cast %294 : vector<32xf32> to vector<32x1xf32>
    %cst_129 = arith.constant 3.200000e+01 : f32
    %296 = vector.broadcast %cst_129 : f32 to vector<32x1xf32>
    %297 = arith.divf %295, %296 : vector<32x1xf32>
    %298 = vector.broadcast %290 : vector<32x1xf32> to vector<32x32xf32>
    %299 = arith.subf %282, %298 : vector<32x32xf32>
    %cst_130 = arith.constant 9.99999996E-13 : f32
    %300 = vector.broadcast %cst_130 : f32 to vector<32x1xf32>
    %301 = arith.addf %297, %300 : vector<32x1xf32>
    %302 = math.rsqrt %301 : vector<32x1xf32>
    %303 = vector.broadcast %302 : vector<32x1xf32> to vector<32x32xf32>
    %304 = arith.mulf %299, %303 : vector<32x32xf32>
    %305 = vector.broadcast %284 : vector<1x32xf32> to vector<32x32xf32>
    %306 = arith.mulf %304, %305 : vector<32x32xf32>
    %307 = vector.broadcast %286 : vector<1x32xf32> to vector<32x32xf32>
    %308 = arith.addf %306, %307 : vector<32x32xf32>
    %c1_131 = arith.constant 1 : index
    %c0_132 = arith.constant 0 : index
    %c0_133 = arith.constant 0 : index
    %309 = vector.load %arg11[%c1_131, %c0_132, %c0_133] : memref<2x32x64xf32, #tpu.memory_space<vmem>>, vector<1x32x64xf32>
    %310 = vector.shape_cast %309 : vector<1x32x64xf32> to vector<32x64xf32>
    %cst_134 = arith.constant dense<0.000000e+00> : vector<32x64xf32>
    %311 = tpu.matmul %308, %310, %cst_134 {dimension_numbers = #tpu.dot_dimension_numbers<[1], [0], [0], [1], [0, 0, 1, 1], [], []>} : vector<32x32xf32>, vector<32x64xf32>, vector<32x64xf32> -> vector<32x64xf32>
    %c1_135 = arith.constant 1 : index
    %c0_136 = arith.constant 0 : index
    %c0_137 = arith.constant 0 : index
    %312 = vector.load %arg12[%c1_135, %c0_136, %c0_137] : memref<2x1x64xf32, #tpu.memory_space<vmem>>, vector<1x1x64xf32>
    %313 = vector.shape_cast %312 : vector<1x1x64xf32> to vector<1x64xf32>
    %314 = vector.broadcast %313 : vector<1x64xf32> to vector<32x64xf32>
    %315 = arith.addf %311, %314 : vector<32x64xf32>
    %cst_138 = arith.constant 5.000000e-01 : f32
    %316 = vector.broadcast %cst_138 : f32 to vector<32x64xf32>
    %317 = arith.mulf %316, %315 : vector<32x64xf32>
    %cst_139 = arith.constant 0.707106769 : f32
    %318 = vector.broadcast %cst_139 : f32 to vector<32x64xf32>
    %319 = arith.mulf %315, %318 : vector<32x64xf32>
    %320 = math.erf %319 : vector<32x64xf32>
    %cst_140 = arith.constant 1.000000e+00 : f32
    %321 = vector.broadcast %cst_140 : f32 to vector<32x64xf32>
    %322 = arith.addf %321, %320 : vector<32x64xf32>
    %323 = arith.mulf %317, %322 : vector<32x64xf32>
    %c1_141 = arith.constant 1 : index
    %c0_142 = arith.constant 0 : index
    %c0_143 = arith.constant 0 : index
    %324 = vector.load %arg13[%c1_141, %c0_142, %c0_143] : memref<2x64x32xf32, #tpu.memory_space<vmem>>, vector<1x64x32xf32>
    %325 = vector.shape_cast %324 : vector<1x64x32xf32> to vector<64x32xf32>
    %cst_144 = arith.constant dense<0.000000e+00> : vector<32x32xf32>
    %326 = tpu.matmul %323, %325, %cst_144 {dimension_numbers = #tpu.dot_dimension_numbers<[1], [0], [0], [1], [0, 0, 1, 1], [], []>} : vector<32x64xf32>, vector<64x32xf32>, vector<32x32xf32> -> vector<32x32xf32>
    %c1_145 = arith.constant 1 : index
    %c0_146 = arith.constant 0 : index
    %c0_147 = arith.constant 0 : index
    %327 = vector.load %arg14[%c1_145, %c0_146, %c0_147] : memref<2x1x32xf32, #tpu.memory_space<vmem>>, vector<1x1x32xf32>
    %328 = vector.shape_cast %327 : vector<1x1x32xf32> to vector<1x32xf32>
    %329 = vector.broadcast %328 : vector<1x32xf32> to vector<32x32xf32>
    %330 = arith.addf %326, %329 : vector<32x32xf32>
    %331 = arith.addf %330, %308 : vector<32x32xf32>
    %c1_148 = arith.constant 1 : index
    %c0_149 = arith.constant 0 : index
    %c0_150 = arith.constant 0 : index
    %332 = vector.load %arg15[%c1_148, %c0_149, %c0_150] : memref<2x1x32xf32, #tpu.memory_space<vmem>>, vector<1x1x32xf32>
    %333 = vector.shape_cast %332 : vector<1x1x32xf32> to vector<1x32xf32>
    %c1_151 = arith.constant 1 : index
    %c0_152 = arith.constant 0 : index
    %c0_153 = arith.constant 0 : index
    %334 = vector.load %arg16[%c1_151, %c0_152, %c0_153] : memref<2x1x32xf32, #tpu.memory_space<vmem>>, vector<1x1x32xf32>
    %335 = vector.shape_cast %334 : vector<1x1x32xf32> to vector<1x32xf32>
    %cst_154 = arith.constant dense<0.000000e+00> : vector<32xf32>
    %336 = vector.multi_reduction <add>, %331, %cst_154 [1] : vector<32x32xf32> to vector<32xf32>
    %337 = vector.shape_cast %336 : vector<32xf32> to vector<32x1xf32>
    %cst_155 = arith.constant 3.200000e+01 : f32
    %338 = vector.broadcast %cst_155 : f32 to vector<32x1xf32>
    %339 = arith.divf %337, %338 : vector<32x1xf32>
    %340 = vector.broadcast %339 : vector<32x1xf32> to vector<32x32xf32>
    %341 = arith.subf %331, %340 : vector<32x32xf32>
    %342 = arith.mulf %341, %341 : vector<32x32xf32>
    %cst_156 = arith.constant dense<0.000000e+00> : vector<32xf32>
    %343 = vector.multi_reduction <add>, %342, %cst_156 [1] : vector<32x32xf32> to vector<32xf32>
    %344 = vector.shape_cast %343 : vector<32xf32> to vector<32x1xf32>
    %cst_157 = arith.constant 3.200000e+01 : f32
    %345 = vector.broadcast %cst_157 : f32 to vector<32x1xf32>
    %346 = arith.divf %344, %345 : vector<32x1xf32>
    %347 = vector.broadcast %339 : vector<32x1xf32> to vector<32x32xf32>
    %348 = arith.subf %331, %347 : vector<32x32xf32>
    %cst_158 = arith.constant 9.99999996E-13 : f32
    %349 = vector.broadcast %cst_158 : f32 to vector<32x1xf32>
    %350 = arith.addf %346, %349 : vector<32x1xf32>
    %351 = math.rsqrt %350 : vector<32x1xf32>
    %352 = vector.broadcast %351 : vector<32x1xf32> to vector<32x32xf32>
    %353 = arith.mulf %348, %352 : vector<32x32xf32>
    %354 = vector.broadcast %333 : vector<1x32xf32> to vector<32x32xf32>
    %355 = arith.mulf %353, %354 : vector<32x32xf32>
    %356 = vector.broadcast %335 : vector<1x32xf32> to vector<32x32xf32>
    %357 = arith.addf %355, %356 : vector<32x32xf32>
    %358 = vector.extract_strided_slice %357 {offsets = [8, 0], sizes = [8, 32], strides = [1, 1]} : vector<32x32xf32> to vector<8x32xf32>
    %359 = vector.extract_strided_slice %357 {offsets = [24, 0], sizes = [8, 32], strides = [1, 1]} : vector<32x32xf32> to vector<8x32xf32>
    %360 = tpu.concatenate %358, %359 in 0 : vector<8x32xf32>, vector<8x32xf32> -> vector<16x32xf32>
    %c0_159 = arith.constant 0 : index
    %c0_160 = arith.constant 0 : index
    %361 = vector.load %arg17[%c0_159, %c0_160] : memref<16x32xf32, #tpu.memory_space<vmem>>, vector<16x32xf32>
    tpu.vector_store %arg17[%c0_159, %c0_160], %360 {strides = array<i32>} : memref<16x32xf32, #tpu.memory_space<vmem>>, vector<16x32xf32>,
    return
  }
}

</mosaic_0001>

<bundles_post_ra>
// kernel: bert_mapper_forward.1
= control target key start
LH: loop header
LB: loop body
LE: loop exit
PB: predicated region body
PF: predicated region fallthrough
CT: control target
= control target key end

     0   :  { %s6350_s0 = inlined_call_operand.vmem [shape: f32[16,32], index: 0, kind: input, shape index: {}]   ;;  %s6351_s1 = inlined_call_operand.vmem [shape: f32[32,32], index: 1, kind: input, shape index: {}]   ;;  %s6352_s2 = inlined_call_operand.vmem [shape: f32[32,32], index: 2, kind: input, shape index: {}]   ;;  %s6353_s3 = inlined_call_operand.vmem [shape: f32[1,32], index: 3, kind: input, shape index: {}]   ;;  %s6354_s4 = inlined_call_operand.hbm [shape: f32[1,32], index: 4, kind: input, shape index: {}]   ;;  %s6355_s5 = inlined_call_operand.vmem [shape: f32[2,32,96], index: 5, kind: input, shape index: {}]   ;;  %s6356_s6 = inlined_call_operand.hbm [shape: f32[2,1,96], index: 6, kind: input, shape index: {}]   ;;  %s6357_s7 = inlined_call_operand.vmem [shape: f32[2,32,32], index: 7, kind: input, shape index: {}]   ;;  %s6358_s8 = inlined_call_operand.hbm [shape: f32[2,1,32], index: 8, kind: input, shape index: {}]   ;;  %s6359_s9 = inlined_call_operand.hbm [shape: f32[2,1,32], index: 9, kind: input, shape index: {}]   ;;  %s6360_s10 = inlined_call_operand.hbm [shape: f32[2,1,32], index: 10, kind: input, shape index: {}]   ;;  %s6361_s11 = inlined_call_operand.vmem [shape: f32[2,32,64], index: 11, kind: input, shape index: {}]   ;;  %s6362_s12 = inlined_call_operand.hbm [shape: f32[2,1,64], index: 12, kind: input, shape index: {}]   ;;  %s6363_s13 = inlined_call_operand.vmem [shape: f32[2,64,32], index: 13, kind: input, shape index: {}]   ;;  %s6364_s14 = inlined_call_operand.hbm [shape: f32[2,1,32], index: 14, kind: input, shape index: {}]   ;;  %s6365_s15 = inlined_call_operand.vmem [shape: f32[2,1,32], index: 15, kind: input, shape index: {}]   ;;  %s6366_s16 = inlined_call_operand.vmem [shape: f32[2,1,32], index: 16, kind: input, shape index: {}]   ;;  %s6367_s17 = inlined_call_operand.hbm [shape: f32[16,32], index: 17, kind: output, shape index: {}]  }
   0x1   :  { %6371 = sst [smem:[#allocation20_spill]] %s6350_s0 }
   0x2   :  { %6372 = sst [smem:[#allocation21_spill]] %s6351_s1 }
   0x3   :  { %6373 = sst [smem:[#allocation22_spill]] %s6367_s17 }
   0x4   :  { %22 = vsyncpa [#allocation3], 0 }
   0x5   :  { %23 = vsyncpa [#allocation6], 0 }
   0x6   :  { %24 = vsyncpa [#allocation9], 0 }
   0x7   :  { %25 = vsyncpa [#allocation12], 0 }
   0x8   :  { %26 = vsyncpa [#allocation4], 0  ;;  %s5318_s24 = smov [#allocation5]   ;;  %s5132_s28 = scalar_lea.hbm %s6356_s6, 32 }
   0x9   :  { %s52_s25 = sshll.u32 %s5318_s24, 4  ;;  %p5133_p0 = scmp.ne.s32.totalorder %s6356_s6, %s5132_s28  ;;  %s53_s25 = int_to_ptr.vmem [resolvable:$true] %s52_s25 }
   0xa   :  { %p5136_p1 = scmp.lt.u32.totalorder %s5132_s28, %s6356_s6 }
   0xc   :  { %p5138_p2 = pnand %p5136_p1, %p5133_p0 }
   0xe   :  { %5141 = shalt.err (!%p5138_p2)
}
   0xf   :  { %s5142_s19 = scalar_lea.vmem %s53_s25, 32  ;;  %p5147_p4 = scmp.lt.s32.totalorder %s53_s25, %s53_s25 }
  0x10   :  { %p5143_p3 = scmp.ne.s32.totalorder %s53_s25, %s5142_s19  ;;  %p5148_p5 = scmp.lt.s32.totalorder %s5142_s19, %s5142_s19 }
  0x12   :  { %p5149_p6 = por %p5148_p5, %p5147_p4 }
  0x14   :  { %p5150_p7 = pnand %p5149_p6, %p5143_p3 }
  0x16   :  { %5153 = shalt.err (!%p5150_p7)
}
  0x17   :  { %s5319_s1 = smov 16   ;;  %s5320_s20 = smov 1  }
  0x18   :  { %58 = dma.hbm_to_vmem [thread:$0]  %s6356_s6, 32, %s53_s25, [#allocation6], %s5319_s1, %s5319_s1, %s5320_s20  }
  0x19   :  { %s5321_s23 = smov [#allocation8]   ;;  %s5322_s26 = smov [#allocation11]  }
  0x1a   :  { %s78_s24 = sshll.u32 %s5321_s23, 4  ;;  %s104_s27 = sshll.u32 %s5322_s26, 4  ;;  %s79_s24 = int_to_ptr.vmem [resolvable:$true] %s78_s24  ;;  %s105_s27 = int_to_ptr.vmem [resolvable:$true] %s104_s27 }
  0x1b   :  { %s5154_s0 = scalar_lea.hbm %s6359_s9, 32 }
  0x1c   :  { %p5155_p8 = scmp.ne.s32.totalorder %s6359_s9, %s5154_s0  ;;  %p5158_p9 = scmp.lt.u32.totalorder %s5154_s0, %s6359_s9 }
  0x1e   :  { %p5160_p10 = pnand %p5158_p9, %p5155_p8 }
  0x20   :  { %5163 = shalt.err (!%p5160_p10)
}
  0x21   :  { %s5164_s6 = scalar_lea.vmem %s79_s24, 32  ;;  %p5169_p12 = scmp.lt.s32.totalorder %s79_s24, %s79_s24 }
  0x22   :  { %p5165_p11 = scmp.ne.s32.totalorder %s79_s24, %s5164_s6  ;;  %p5170_p13 = scmp.lt.s32.totalorder %s5164_s6, %s5164_s6 }
  0x24   :  { %p5171_p0 = por %p5170_p13, %p5169_p12 }
  0x26   :  { %p5172_p1 = pnand %p5171_p0, %p5165_p11 }
  0x28   :  { %5175 = shalt.err (!%p5172_p1)
}
  0x29   :  { %84 = dma.hbm_to_vmem [thread:$0]  %s6359_s9, 32, %s79_s24, [#allocation9], %s5319_s1, %s5319_s1, %s5320_s20  }
  0x2a   :  { %s5176_s23 = scalar_lea.hbm %s6362_s12, 32 }
  0x2b   :  { %p5177_p2 = scmp.ne.s32.totalorder %s6362_s12, %s5176_s23  ;;  %p5180_p3 = scmp.lt.u32.totalorder %s5176_s23, %s6362_s12 }
  0x2d   :  { %p5182_p4 = pnand %p5180_p3, %p5177_p2 }
  0x2f   :  { %5185 = shalt.err (!%p5182_p4)
}
  0x30   :  { %s5186_s30 = scalar_lea.vmem %s105_s27, 32  ;;  %p5191_p6 = scmp.lt.s32.totalorder %s105_s27, %s105_s27 }
  0x31   :  { %p5187_p5 = scmp.ne.s32.totalorder %s105_s27, %s5186_s30  ;;  %p5192_p7 = scmp.lt.s32.totalorder %s5186_s30, %s5186_s30 }
  0x33   :  { %p5193_p8 = por %p5192_p7, %p5191_p6 }
  0x35   :  { %p5194_p9 = pnand %p5193_p8, %p5187_p5 }
  0x37   :  { %5197 = shalt.err (!%p5194_p9)
}
  0x38   :  { %110 = dma.hbm_to_vmem [thread:$0]  %s6362_s12, 32, %s105_s27, [#allocation12], %s5319_s1, %s5319_s1, %s5320_s20  }
  0x39   :  { %s5323_s18 = smov [#allocation2]   ;;  %s5324_s6 = smov [#allocation7]  }
  0x3a   :  { %s41_s19 = sshll.u32 %s5323_s18, 4  ;;  %s66_s25 = sshll.u32 %s5324_s6, 4  ;;  %s42_s19 = int_to_ptr.vmem [resolvable:$true] %s41_s19  ;;  %s67_s25 = int_to_ptr.vmem [resolvable:$true] %s66_s25 }
  0x3b   :  { %s5198_s17 = scalar_lea.hbm %s6354_s4, 16 }
  0x3c   :  { %p5199_p10 = scmp.ne.s32.totalorder %s6354_s4, %s5198_s17  ;;  %p5202_p11 = scmp.lt.u32.totalorder %s5198_s17, %s6354_s4 }
  0x3e   :  { %p5204_p12 = pnand %p5202_p11, %p5199_p10 }
  0x40   :  { %5207 = shalt.err (!%p5204_p12)
}
  0x41   :  { %s5208_s12 = scalar_lea.vmem %s42_s19, 16  ;;  %s5212_s27 = scalar_lea.vmem %s42_s19, 32 }
  0x42   :  { %p5209_p13 = scmp.ne.s32.totalorder %s42_s19, %s5208_s12  ;;  %p5213_p0 = scmp.lt.s32.totalorder %s42_s19, %s42_s19 }
  0x43   :  { %p5214_p1 = scmp.lt.s32.totalorder %s5212_s27, %s5208_s12 }
  0x45   :  { %p5215_p2 = por %p5214_p1, %p5213_p0 }
  0x47   :  { %p5216_p3 = pnand %p5215_p2, %p5209_p13 }
  0x49   :  { %5219 = shalt.err (!%p5216_p3)
}
  0x4a   :  { %44 = dma.hbm_to_vmem [thread:$0]  %s6354_s4, 16, %s42_s19, [#allocation3]  }
  0x4b   :  { %s5220_s18 = scalar_lea.hbm %s6358_s8, 32 }
  0x4c   :  { %p5221_p4 = scmp.ne.s32.totalorder %s6358_s8, %s5220_s18  ;;  %p5224_p5 = scmp.lt.u32.totalorder %s5220_s18, %s6358_s8 }
  0x4e   :  { %p5226_p6 = pnand %p5224_p5, %p5221_p4 }
  0x50   :  { %5229 = shalt.err (!%p5226_p6)
}
  0x51   :  { %s5230_s23 = scalar_lea.vmem %s67_s25, 32  ;;  %p5235_p8 = scmp.lt.s32.totalorder %s67_s25, %s67_s25 }
  0x52   :  { %p5231_p7 = scmp.ne.s32.totalorder %s67_s25, %s5230_s23  ;;  %p5236_p9 = scmp.lt.s32.totalorder %s5230_s23, %s5230_s23 }
  0x54   :  { %p5237_p10 = por %p5236_p9, %p5235_p8 }
  0x56   :  { %p5238_p11 = pnand %p5237_p10, %p5231_p7 }
  0x58   :  { %5241 = shalt.err (!%p5238_p11)
}
  0x59   :  { %72 = dma.hbm_to_vmem [thread:$0]  %s6358_s8, 32, %s67_s25, [#allocation6], %s5319_s1, %s5319_s1, %s5320_s20  }
  0x5a   :  { %s5325_s26 = smov [#allocation10]   ;;  %s5326_s29 = smov [#allocation13]  }
  0x5b   :  { %s90_s28 = sshll.u32 %s5325_s26, 4  ;;  %s118_s12 = sshll.u32 %s5326_s29, 4  ;;  %s91_s28 = int_to_ptr.vmem [resolvable:$true] %s90_s28  ;;  %s119_s12 = int_to_ptr.vmem [resolvable:$true] %s118_s12 }
  0x5c   :  { %s5242_s30 = scalar_lea.hbm %s6360_s10, 32 }
  0x5d   :  { %p5243_p12 = scmp.ne.s32.totalorder %s6360_s10, %s5242_s30  ;;  %p5246_p13 = scmp.lt.u32.totalorder %s5242_s30, %s6360_s10 }
  0x5f   :  { %p5248_p0 = pnand %p5246_p13, %p5243_p12 }
  0x61   :  { %5251 = shalt.err (!%p5248_p0)
}
  0x62   :  { %s5252_s8 = scalar_lea.vmem %s91_s28, 32  ;;  %p5257_p2 = scmp.lt.s32.totalorder %s91_s28, %s91_s28 }
  0x63   :  { %p5253_p1 = scmp.ne.s32.totalorder %s91_s28, %s5252_s8  ;;  %p5258_p3 = scmp.lt.s32.totalorder %s5252_s8, %s5252_s8 }
  0x65   :  { %p5259_p4 = por %p5258_p3, %p5257_p2 }
  0x67   :  { %p5260_p5 = pnand %p5259_p4, %p5253_p1 }
  0x69   :  { %5263 = shalt.err (!%p5260_p5)
}
  0x6a   :  { %96 = dma.hbm_to_vmem [thread:$0]  %s6360_s10, 32, %s91_s28, [#allocation9], %s5319_s1, %s5319_s1, %s5320_s20  }
  0x6b   :  { %s5264_s23 = scalar_lea.hbm %s6364_s14, 32 }
  0x6c   :  { %p5265_p6 = scmp.ne.s32.totalorder %s6364_s14, %s5264_s23  ;;  %p5268_p7 = scmp.lt.u32.totalorder %s5264_s23, %s6364_s14 }
  0x6e   :  { %p5270_p8 = pnand %p5268_p7, %p5265_p6 }
  0x70   :  { %5273 = shalt.err (!%p5270_p8)
}
  0x71   :  { %s5274_s27 = scalar_lea.vmem %s119_s12, 32  ;;  %p5279_p10 = scmp.lt.s32.totalorder %s119_s12, %s119_s12 }
  0x72   :  { %p5275_p9 = scmp.ne.s32.totalorder %s119_s12, %s5274_s27  ;;  %p5280_p11 = scmp.lt.s32.totalorder %s5274_s27, %s5274_s27 }
  0x74   :  { %p5281_p12 = por %p5280_p11, %p5279_p10 }
  0x76   :  { %p5282_p13 = pnand %p5281_p12, %p5275_p9 }
  0x78   :  { %5285 = shalt.err (!%p5282_p13)
}
  0x79   :  { %124 = dma.hbm_to_vmem [thread:$0]  %s6364_s14, 32, %s119_s12, [#allocation12], %s5319_s1, %s5319_s1, %s5320_s20  }
  0x7a   :  { %5308 = dma.done.wait [#allocation3], 16  }
  0x7b   :  { %5309 = vsyncadd [#allocation3], 4294967280 }
  0x7c   :  { %5310 = dma.done.wait [#allocation6], 64  }
  0x7d   :  { %5311 = vsyncadd [#allocation6], 4294967232 }
  0x7e   :  { %5312 = dma.done.wait [#allocation9], 64  }
  0x7f   :  { %5313 = vsyncadd [#allocation9], 4294967232 }
  0x80   :  { %5314 = dma.done.wait [#allocation12], 64  }
  0x81   :  { %5315 = vsyncadd [#allocation12], 4294967232  ;;  %s6374_s9 = sld [smem:[#allocation20_spill]]  ;;  %s6375_s6 = sld [smem:[#allocation21_spill]]  ;;  %vm162_vm0 = vcmask 261120   ;;  %v240_v32 = vld [vmem:[%s6355_s5] sm:$0xff] }
  0x82   :  { %v241_v33 = vld [vmem:[%s6355_s5 + $0x8] sm:$0xff]  ;;  %v242_v34 = vld [vmem:[%s6355_s5 + $0x10] sm:$0xff]  ;;  %v243_v36 = vld [vmem:[%s6355_s5 + $0x18] sm:$0xff]  ;;  %vm360_vm1 = vcmask 64512   ;;  %s5328_s12 = smov 64   ;;  %s5329_s21 = smov 88  }
  0x83   :  { %v4524_v35 = vpack.c.bf16 %v241_v33, %v240_v32  ;;  %v4528_v37 = vpack.c.bf16 %v243_v36, %v242_v34  ;;  %v3804_v51 = vld [vmem:[%s6353_s3] ss:$0 sm:$0xff]  ;;  %s5327_s3 = smov 96   ;;  %vm5615_vm2 = vmpackc.low %vm360_vm1, %vm360_vm1  ;;  %v5648_v33 = vld [vmem:[%s6352_s2 + $0x18] sm:$0xff]  ;;  %s5330_s22 = smov 120   ;;  %vm1509_vm3 = vcmask 130048  }
  0x84   :  { %v3805_v53 = vld [vmem:[#allocation2] ss:$0 sm:$0xff]  ;;  %s5331_s17 = smov 56   ;;  %s5332_s23 = smov 80   ;;  %vm1514_vm4 = vcmask 195584   ;;  %vm1848_vm5 = vcmask 523264  }
  0x85   :  { %4525 = vmatprep.subr.bf16.mxu1 %v4524_v35  ;;  %s5333_s4 = smov 112   ;;  %s5334_s19 = smov 48  }
  0x86   :  { %4527 = vmatpush3.bf16.msra.mxu1 %v4524_v35  ;;  %s5335_s26 = smov 72   ;;  %s5336_s29 = smov 104  }
  0x87   :  { %v150_v0 = vld [vmem:[%s6374_s9] sm:$0xff]  ;;  %v151_v2 = vld [vmem:[%s6374_s9 + $0x8] sm:$0xff]  ;;  %v154_v4 = vld [vmem:[%s6375_s6 + $0x10] sm:$0xff]  ;;  %4529 = vmatprep.subr.bf16.mxu1 %v4528_v37  ;;  %s5337_s27 = smov 40   ;;  %s5338_s10 = smov 8  }
  0x88   :  { %v152_v1 = vld [vmem:[%s6375_s6] sm:$0xff]  ;;  %v158_v5 = vadd.f32 %v154_v4, %v151_v2  ;;  %v153_v6 = vld [vmem:[%s6375_s6 + $0x8] sm:$0xff]  ;;  %v155_v8 = vld [vmem:[%s6375_s6 + $0x18] sm:$0xff]  ;;  %s5339_s25 = smov 24  }
  0x89   :  { %v156_v3 = vadd.f32 %v152_v1, %v150_v0  ;;  %v166_v10 = vsel %vm162_vm0, %v153_v6, 0.0  ;;  %v172_v11 = vsel %vm162_vm0, %v155_v8, 0.0  ;;  %v3806_v4 = vld [vmem:[#allocation5] ss:$0 sm:$0xff] }
  0x8a   :  { %v169_v9 = vsel %vm162_vm0, %v158_v5, 0.0  ;;  %4531 = vmatpush3.bf16.msra.mxu1 %v4528_v37  ;;  %v5654_v37 = vld [vmem:[%s6352_s2 + $0x10] sm:$0xff] }
  0x8b   :  { %v163_v7 = vsel %vm162_vm0, %v156_v3, 0.0  ;;  %170 = vadd.xlane.f32.xlu1 %v169_v9 }
  0x8c   :  { %164 = vadd.xlane.f32.xlu0 %v163_v7 }
  0x8f   :  { %173 = vadd.xlane.f32.xlu1 %v172_v11 }
  0x90   :  { %167 = vadd.xlane.f32.xlu0 %v166_v10 }
 0x118   :  { %v171_v14 = vpop.xlane.xlu1 %170 }
 0x119   :  { %v165_v12 = vpop.xlane.xlu0 %164  ;;  %v178_v15 = vmul.f32 0.03125, %v171_v14 }
 0x11a   :  { %v176_v13 = vmul.f32 0.03125, %v165_v12 }
 0x11b   :  { %v182_v17 = vsub.f32 %v158_v5, %v178_v15 }
 0x11c   :  { %v180_v16 = vsub.f32 %v156_v3, %v176_v13  ;;  %v174_v20 = vpop.xlane.xlu1 %173 }
 0x11d   :  { %v168_v18 = vpop.xlane.xlu0 %167  ;;  %v179_v22 = vmul.f32 0.03125, %v174_v20  ;;  %v186_v23 = vmul.f32 %v182_v17, %v182_v17 }
 0x11e   :  { %v177_v19 = vmul.f32 0.03125, %v168_v18  ;;  %v184_v21 = vmul.f32 %v180_v16, %v180_v16 }
 0x11f   :  { %v183_v26 = vsub.f32 %v155_v8, %v179_v22  ;;  %v194_v27 = vsel %vm162_vm0, %v186_v23, 0.0 }
 0x120   :  { %v181_v24 = vsub.f32 %v153_v6, %v177_v19  ;;  %v188_v25 = vsel %vm162_vm0, %v184_v21, 0.0 }
 0x121   :  { %189 = vadd.xlane.f32.xlu0 %v188_v25  ;;  %v187_v29 = vmul.f32 %v183_v26, %v183_v26  ;;  %v5636_v25 = vld [vmem:[%s6352_s2 + $0x8] sm:$0xff] }
 0x122   :  { %v185_v28 = vmul.f32 %v181_v24, %v181_v24 }
 0x123   :  { %v197_v31 = vsel %vm162_vm0, %v187_v29, 0.0 }
 0x124   :  { %v191_v30 = vsel %vm162_vm0, %v185_v28, 0.0  ;;  %v5641_v28 = vld [vmem:[%s6352_s2] sm:$0xff] }
 0x125   :  { %195 = vadd.xlane.f32.xlu0 %v194_v27  ;;  %192 = vadd.xlane.f32.xlu1 %v191_v30 }
 0x129   :  { %198 = vadd.xlane.f32.xlu1 %v197_v31 }
 0x1ae   :  { %v190_v38 = vpop.xlane.xlu0 %189 }
 0x1af   :  { %v200_v39 = vmul.f32 0.03125, %v190_v38 }
 0x1b1   :  { %v204_v40 = vadd.f32 1e-12, %v200_v39 }
 0x1b2   :  { %v193_v41 = vpop.xlane.xlu1 %192  ;;  %v196_v42 = vpop.xlane.xlu0 %195 }
 0x1b3   :  { %4948 = vrsqrt.f32 %v204_v40  ;;  %v201_v43 = vmul.f32 0.03125, %v193_v41  ;;  %v202_v44 = vmul.f32 0.03125, %v196_v42 }
 0x1b5   :  { %v205_v45 = vadd.f32 1e-12, %v201_v43  ;;  %v206_v46 = vadd.f32 1e-12, %v202_v44 }
 0x1b6   :  { %v199_v47 = vpop.xlane.xlu1 %198 }
 0x1b7   :  { %4950 = vrsqrt.f32 %v205_v45  ;;  %v203_v48 = vmul.f32 0.03125, %v199_v47 }
 0x1b8   :  { %4952 = vrsqrt.f32 %v206_v46 }
 0x1b9   :  { %v207_v49 = vadd.f32 1e-12, %v203_v48 }
 0x1bb   :  { %4954 = vrsqrt.f32 %v207_v49 }
 0x1bd   :  { %v4949_v50 = vpop.eup %4948 }
 0x1be   :  { %v212_v52 = vmul.f32 %v4949_v50, %v180_v16 }
 0x1c0   :  { %v222_v54 = vmul.f32 %v3804_v51, %v212_v52 }
 0x1c1   :  { %v4951_v55 = vpop.eup %4950 }
 0x1c2   :  { %v4953_v56 = vpop.eup %4952  ;;  %v5575_v57 = vadd.f32 %v3805_v53, %v222_v54  ;;  %v213_v58 = vmul.f32 %v4951_v55, %v181_v24 }
 0x1c3   :  { %v214_v59 = vmul.f32 %v4953_v56, %v182_v17 }
 0x1c4   :  { %4180 = vmatprep.mubr.msk.f32.mxu1 %vm162_vm0, %v5575_v57  ;;  %v223_v60 = vmul.f32 %v3804_v51, %v213_v58 }
 0x1c5   :  { %v4955_v61 = vpop.eup %4954  ;;  %v224_v62 = vmul.f32 %v3804_v51, %v214_v59 }
 0x1c6   :  { %v5579_v63 = vadd.f32 %v3805_v53, %v223_v60  ;;  %v215_v0 = vmul.f32 %v4955_v61, %v183_v26 }
 0x1c7   :  { %v5581_v1 = vadd.f32 %v3805_v53, %v224_v62 }
 0x1c8   :  { %4181 = vmatmul.mubr.msk.f32.vlgmr.msra.gmra.mrb[0].mxu1 %vm162_vm0, %v5579_v63  ;;  %v225_v2 = vmul.f32 %v3804_v51, %v215_v0 }
 0x1c9   :  { %4183 = vmatprep.mubr.msk.f32.mxu1 %vm162_vm0, %v5581_v1 }
 0x1ca   :  { %v5587_v3 = vadd.f32 %v3805_v53, %v225_v2 }
 0x1cc   :  { %4184 = vmatmul.mubr.msk.f32.gmra.mrb[2].mxu1 %vm162_vm0, %v5587_v3 }
 0x29b   :  { %v4182_v5 = vpop.f32.mrb[0].mxu1 }
 0x29c   :  { %v5591_v6 = vadd.f32 %v4182_v5, %v3806_v4  ;;  %v329_v7 = vpop.f32.mrb[1].mxu1 }
 0x29d   :  { %v5593_v8 = vadd.f32 %v3806_v4, %v329_v7 }
 0x29f   :  { %v4185_v9 = vpop.f32.mrb[2].mxu1  ;;  %4194 = vmatprep.mubr.msk.f32.mxu1 %vm360_vm1, %v5593_v8  ;;  %v5599_v10 = vpack.i.bf16 %v5591_v6, %v5593_v8 }
 0x2a0   :  { %v5601_v11 = vadd.f32 %v4185_v9, %v3806_v4  ;;  %v339_v12 = vpop.f32.mrb[3].mxu1 }
 0x2a1   :  { %v5603_v13 = vadd.f32 %v3806_v4, %v339_v12  ;;  %4789 = vrot.lane.b32.xlu0 %v5599_v10, %s5327_s3 }
 0x2a3   :  { %v5609_v14 = vpack.i.bf16 %v5601_v11, %v5603_v13 }
 0x2a5   :  { %4794 = vrot.lane.b32.xlu1 %v5609_v14, %s5327_s3 }
 0x313   :  { %v4790_v15 = vpop.permute.xlu0 %4789 }
 0x314   :  { %v4792_v16 = vunpack.i.h.bf16 %v4790_v15  ;;  %v4791_v17 = vunpack.i.l.bf16 %v4790_v15 }
 0x316   :  { %v4532_v19 = vpack.c.bf16 %v4792_v16, %v4791_v17 }
 0x317   :  { %v4795_v20 = vpop.permute.xlu1 %4794 }
 0x318   :  { %v4797_v21 = vunpack.i.h.bf16 %v4795_v20  ;;  %v4796_v22 = vunpack.i.l.bf16 %v4795_v20  ;;  %4534 = vmatprep.subr.msk.bf16.mxu1 %vm5615_vm2, %v4532_v19 }
 0x319   :  { %4537 = vmatpush3.bf16.xpose.msk.msra.mxu1 %vm5615_vm2, %v4532_v19 }
 0x31a   :  { %v4538_v23 = vpack.c.bf16 %v4797_v21, %v4796_v22 }
 0x31c   :  { %4540 = vmatprep.subr.msk.bf16.mxu1 %vm5615_vm2, %v4538_v23 }
 0x321   :  { %4543 = vmatpush3.bf16.xpose.msk.msra.mxu1 %vm5615_vm2, %v4538_v23 }
 0x328   :  { %4195 = vmatmul.mubr.msk.f32.vlgmr.msra.gmra.mrb[4].mxu1 %vm360_vm1, %v5591_v6 }
 0x329   :  { %4197 = vmatprep.mubr.msk.f32.mxu1 %vm360_vm1, %v5603_v13 }
 0x32c   :  { %4198 = vmatmul.mubr.msk.f32.gmra.mrb[6].mxu1 %vm360_vm1, %v5601_v11 }
 0x3fb   :  { %v4196_v24 = vpop.f32.mrb[4].mxu1 }
 0x3fc   :  { %v463_v26 = vmul.f32 0.35355338, %v4196_v24  ;;  %v443_v27 = vpop.f32.mrb[5].mxu1 }
 0x3fd   :  { %v462_v29 = vmul.f32 0.35355338, %v443_v27 }
 0x3fe   :  { %v467_v30 = vadd.f32 %v463_v26, %v5636_v25 }
 0x3ff   :  { %v4199_v31 = vpop.f32.mrb[6].mxu1  ;;  %v466_v32 = vadd.f32 %v462_v29, %v5641_v28 }
 0x400   :  { %v465_v34 = vmul.f32 0.35355338, %v4199_v31  ;;  %v453_v35 = vpop.f32.mrb[7].mxu1  ;;  %v473_v36 = vsel %vm162_vm0, %v467_v30, -inf }
 0x401   :  { %v464_v38 = vmul.f32 0.35355338, %v453_v35  ;;  %474 = vmax.xlane.f32.xlu0 %v473_v36  ;;  %v470_v39 = vsel %vm162_vm0, %v466_v32, -inf }
 0x402   :  { %471 = vmax.xlane.f32.xlu1 %v470_v39  ;;  %v469_v40 = vadd.f32 %v465_v34, %v5648_v33 }
 0x403   :  { %v468_v41 = vadd.f32 %v464_v38, %v5654_v37 }
 0x404   :  { %v479_v42 = vsel %vm162_vm0, %v469_v40, -inf }
 0x405   :  { %v476_v43 = vsel %vm162_vm0, %v468_v41, -inf }
 0x406   :  { %480 = vmax.xlane.f32.xlu1 %v479_v42  ;;  %477 = vmax.xlane.f32.xlu0 %v476_v43 }
 0x48e   :  { %v475_v44 = vpop.xlane.xlu0 %474 }
 0x48f   :  { %v483_v45 = vsub.f32 %v467_v30, %v475_v44  ;;  %v472_v46 = vpop.xlane.xlu1 %471 }
 0x490   :  { %v482_v47 = vsub.f32 %v466_v32, %v472_v46 }
 0x491   :  { %v488_v48 = vmul.f32 1.442695, %v483_v45 }
 0x492   :  { %v486_v49 = vmul.f32 1.442695, %v482_v47 }
 0x493   :  { %4956 = vpow2.f32 %v488_v48  ;;  %v478_v54 = vpop.xlane.xlu0 %477  ;;  %v481_v56 = vpop.xlane.xlu1 %480 }
 0x494   :  { %4958 = vpow2.f32 %v486_v49  ;;  %v484_v55 = vsub.f32 %v468_v41, %v478_v54  ;;  %v485_v59 = vsub.f32 %v469_v40, %v481_v56 }
 0x496   :  { %v490_v58 = vmul.f32 1.442695, %v484_v55  ;;  %v492_v60 = vmul.f32 1.442695, %v485_v59 }
 0x498   :  { %4960 = vpow2.f32 %v490_v58 }
 0x499   :  { %4962 = vpow2.f32 %v492_v60 }
 0x49d   :  { %v4957_v50 = vpop.eup %4956 }
 0x49e   :  { %v4959_v51 = vpop.eup %4958  ;;  %v497_v52 = vsel %vm162_vm0, %v4957_v50, 0.0 }
 0x49f   :  { %498 = vadd.xlane.f32.xlu1 %v497_v52  ;;  %v494_v53 = vsel %vm162_vm0, %v4959_v51, 0.0 }
 0x4a0   :  { %495 = vadd.xlane.f32.xlu0 %v494_v53 }
 0x4a2   :  { %v4961_v61 = vpop.eup %4960 }
 0x4a3   :  { %v500_v62 = vsel %vm162_vm0, %v4961_v61, 0.0  ;;  %v4963_v0 = vpop.eup %4962 }
 0x4a4   :  { %v503_v2 = vsel %vm162_vm0, %v4963_v0, 0.0 }
 0x4b0   :  { %4804 = vrot.lane.b32.xlu1 %v5609_v14, %s5328_s12 }
 0x4b4   :  { %4809 = vrot.lane.b32.xlu1 %v5599_v10, %s5329_s21 }
 0x4b6   :  { %4799 = vrot.lane.b32.xlu0 %v5599_v10, %s5328_s12 }
 0x4b8   :  { %4814 = vrot.lane.b32.xlu1 %v5609_v14, %s5329_s21 }
 0x4d5   :  { %501 = vadd.xlane.f32.xlu0 %v500_v62 }
 0x4dc   :  { %504 = vadd.xlane.f32.xlu1 %v503_v2 }
 0x4eb   :  { %623 = vrot.lane.b32.xlu0 %v5593_v8, %s5330_s22 }
 0x4ed   :  { %625 = vrot.lane.b32.xlu1 %v5591_v6, %s5330_s22 }
 0x4ef   :  { %627 = vrot.lane.b32.xlu0 %v5603_v13, %s5330_s22 }
 0x4f1   :  { %629 = vrot.lane.b32.xlu1 %v5601_v11, %s5330_s22 }
 0x52c   :  { %v499_v4 = vpop.xlane.xlu1 %498 }
 0x52d   :  { %v496_v5 = vpop.xlane.xlu0 %495 }
 0x52e   :  { %4964 = vrcp.f32 %v496_v5 }
 0x52f   :  { %4966 = vrcp.f32 %v499_v4 }
 0x530   :  { %v4805_v7 = vpop.permute.xlu1 %4804 }
 0x531   :  { %v4800_v9 = vpop.permute.xlu0 %4799  ;;  %v4807_v12 = vunpack.i.h.bf16 %v4805_v7  ;;  %v4806_v15 = vunpack.i.l.bf16 %v4805_v7 }
 0x532   :  { %v4802_v16 = vunpack.i.h.bf16 %v4800_v9  ;;  %v4801_v17 = vunpack.i.l.bf16 %v4800_v9 }
 0x533   :  { %v4548_v23 = vpack.c.bf16 %v4807_v12, %v4806_v15 }
 0x534   :  { %v4810_v19 = vpop.permute.xlu1 %4809  ;;  %v4544_v20 = vpack.c.bf16 %v4802_v16, %v4801_v17 }
 0x535   :  { %v4812_v21 = vunpack.i.h.bf16 %v4810_v19  ;;  %v4811_v22 = vunpack.i.l.bf16 %v4810_v19 }
 0x536   :  { %4545 = vmatprep.subr.bf16.mxu0 %v4544_v20 }
 0x537   :  { %4547 = vmatpush3.bf16.msra.mxu0 %v4544_v20  ;;  %v4552_v29 = vpack.c.bf16 %v4812_v21, %v4811_v22 }
 0x538   :  { %v4965_v24 = vpop.eup %4964  ;;  %4549 = vmatprep.subr.bf16.mxu0 %v4548_v23  ;;  %v4815_v30 = vpop.permute.xlu1 %4814 }
 0x539   :  { %v4967_v26 = vpop.eup %4966  ;;  %v510_v27 = vmul.f32 %v4965_v24, %v4959_v51  ;;  %v4817_v32 = vunpack.i.h.bf16 %v4815_v30  ;;  %v4816_v34 = vunpack.i.l.bf16 %v4815_v30 }
 0x53a   :  { %v511_v31 = vmul.f32 %v4967_v26, %v4957_v50 }
 0x53b   :  { %4551 = vmatpush3.bf16.msra.mxu0 %v4548_v23  ;;  %4208 = vmatprep.mubr.msk.f32.mxu0 %vm162_vm0, %v510_v27  ;;  %v4558_v35 = vpack.c.bf16 %v4817_v32, %v4816_v34 }
 0x53c   :  { %4554 = vmatprep.subr.msk.bf16.mxu0 %vm5615_vm2, %v4552_v29 }
 0x53e   :  { %4209 = vmatmul.mubr.msk.f32.vlgmr.msra.gmra.mrb[0].mxu0 %vm162_vm0, %v511_v31 }
 0x544   :  { %4557 = vmatpush3.bf16.xpose.msk.msra.mxu0 %vm5615_vm2, %v4552_v29 }
 0x545   :  { %4560 = vmatprep.subr.msk.bf16.mxu0 %vm5615_vm2, %v4558_v35 }
 0x54c   :  { %4563 = vmatpush3.bf16.xpose.msk.msra.mxu0 %vm5615_vm2, %v4558_v35 }
 0x562   :  { %v502_v36 = vpop.xlane.xlu0 %501 }
 0x563   :  { %4968 = vrcp.f32 %v502_v36 }
 0x566   :  { %v624_v42 = vpop.permute.xlu0 %623 }
 0x569   :  { %v505_v38 = vpop.xlane.xlu1 %504 }
 0x56a   :  { %4970 = vrcp.f32 %v505_v38  ;;  %v628_v45 = vpop.permute.xlu0 %627 }
 0x56d   :  { %v4969_v39 = vpop.eup %4968  ;;  %v626_v44 = vpop.permute.xlu1 %625 }
 0x56e   :  { %v512_v40 = vmul.f32 %v4969_v39, %v4961_v61 }
 0x570   :  { %4211 = vmatprep.mubr.msk.f32.mxu0 %vm162_vm0, %v512_v40 }
 0x571   :  { %v630_v46 = vpop.permute.xlu1 %629 }
 0x574   :  { %v4971_v41 = vpop.eup %4970 }
 0x575   :  { %v513_v43 = vmul.f32 %v4971_v41, %v4963_v0 }
 0x577   :  { %4212 = vmatmul.mubr.msk.f32.gmra.mrb[2].mxu0 %vm162_vm0, %v513_v43 }
 0x578   :  { %4222 = vmatprep.mubr.msk.f32.mxu0 %vm360_vm1, %v624_v42 }
 0x57b   :  { %4223 = vmatmul.mubr.msk.f32.vlgmr.msra.gmra.mrb[4].mxu0 %vm360_vm1, %v626_v44 }
 0x57c   :  { %4225 = vmatprep.mubr.msk.f32.mxu0 %vm360_vm1, %v628_v45 }
 0x57f   :  { %4226 = vmatmul.mubr.msk.f32.gmra.mrb[6].mxu0 %vm360_vm1, %v630_v46 }
 0x611   :  { %v5697_v47 = vpop.f32.mrb[0].mxu0 }
 0x612   :  { %v5699_v48 = vpop.f32.mrb[1].mxu0 }
 0x64a   :  { %v5701_v49 = vpop.f32.mrb[2].mxu0 }
 0x64b   :  { %v5703_v50 = vpop.f32.mrb[3].mxu0 }
 0x64e   :  { %v4224_v51 = vpop.f32.mrb[4].mxu0 }
 0x64f   :  { %v741_v52 = vmul.f32 0.35355338, %v4224_v51  ;;  %v721_v53 = vpop.f32.mrb[5].mxu0 }
 0x650   :  { %v740_v54 = vmul.f32 0.35355338, %v721_v53 }
 0x651   :  { %v745_v55 = vadd.f32 %v741_v52, %v5636_v25 }
 0x652   :  { %v4227_v56 = vpop.f32.mrb[6].mxu0  ;;  %v744_v58 = vadd.f32 %v740_v54, %v5641_v28 }
 0x653   :  { %v731_v59 = vpop.f32.mrb[7].mxu0  ;;  %v751_v60 = vsel %vm162_vm0, %v745_v55, -inf  ;;  %v743_v61 = vmul.f32 0.35355338, %v4227_v56 }
 0x654   :  { %v742_v62 = vmul.f32 0.35355338, %v731_v59  ;;  %752 = vmax.xlane.f32.xlu1 %v751_v60  ;;  %v748_v0 = vsel %vm162_vm0, %v744_v58, -inf }
 0x655   :  { %749 = vmax.xlane.f32.xlu0 %v748_v0  ;;  %v747_v5 = vadd.f32 %v743_v61, %v5648_v33 }
 0x656   :  { %v746_v2 = vadd.f32 %v742_v62, %v5654_v37 }
 0x657   :  { %v757_v7 = vsel %vm162_vm0, %v747_v5, -inf }
 0x658   :  { %v754_v4 = vsel %vm162_vm0, %v746_v2, -inf }
 0x659   :  { %755 = vmax.xlane.f32.xlu0 %v754_v4 }
 0x65d   :  { %758 = vmax.xlane.f32.xlu0 %v757_v7 }
 0x6e1   :  { %v753_v9 = vpop.xlane.xlu1 %752 }
 0x6e2   :  { %v761_v12 = vsub.f32 %v745_v55, %v753_v9  ;;  %v750_v15 = vpop.xlane.xlu0 %749 }
 0x6e3   :  { %v760_v16 = vsub.f32 %v744_v58, %v750_v15 }
 0x6e4   :  { %v766_v17 = vmul.f32 1.442695, %v761_v12 }
 0x6e5   :  { %v764_v19 = vmul.f32 1.442695, %v760_v16 }
 0x6e6   :  { %4972 = vpow2.f32 %v766_v17  ;;  %v756_v24 = vpop.xlane.xlu0 %755 }
 0x6e7   :  { %4974 = vpow2.f32 %v764_v19  ;;  %v762_v26 = vsub.f32 %v746_v2, %v756_v24 }
 0x6e9   :  { %v768_v27 = vmul.f32 1.442695, %v762_v26 }
 0x6ea   :  { %v759_v29 = vpop.xlane.xlu0 %758 }
 0x6eb   :  { %v763_v30 = vsub.f32 %v747_v5, %v759_v29  ;;  %4976 = vpow2.f32 %v768_v27 }
 0x6ed   :  { %v770_v31 = vmul.f32 1.442695, %v763_v30 }
 0x6ef   :  { %4978 = vpow2.f32 %v770_v31 }
 0x6f0   :  { %v4973_v20 = vpop.eup %4972 }
 0x6f1   :  { %v4975_v21 = vpop.eup %4974  ;;  %v775_v22 = vsel %vm162_vm0, %v4973_v20, 0.0 }
 0x6f2   :  { %776 = vadd.xlane.f32.xlu1 %v775_v22  ;;  %v772_v23 = vsel %vm162_vm0, %v4975_v21, 0.0 }
 0x6f3   :  { %773 = vadd.xlane.f32.xlu0 %v772_v23 }
 0x6f5   :  { %v4977_v32 = vpop.eup %4976 }
 0x6f6   :  { %v778_v34 = vsel %vm162_vm0, %v4977_v32, 0.0 }
 0x6f9   :  { %v4979_v35 = vpop.eup %4978 }
 0x6fa   :  { %v781_v36 = vsel %vm162_vm0, %v4979_v35, 0.0 }
 0x703   :  { %4824 = vrot.lane.b32.xlu1 %v5609_v14, %s5331_s17 }
 0x707   :  { %4829 = vrot.lane.b32.xlu1 %v5599_v10, %s5332_s23 }
 0x709   :  { %4819 = vrot.lane.b32.xlu0 %v5599_v10, %s5331_s17 }
 0x70b   :  { %4834 = vrot.lane.b32.xlu1 %v5609_v14, %s5332_s23 }
 0x728   :  { %779 = vadd.xlane.f32.xlu0 %v778_v34 }
 0x72f   :  { %782 = vadd.xlane.f32.xlu1 %v781_v36 }
 0x73e   :  { %901 = vrot.lane.b32.xlu0 %v5593_v8, %s5333_s4 }
 0x740   :  { %903 = vrot.lane.b32.xlu1 %v5591_v6, %s5333_s4 }
 0x742   :  { %905 = vrot.lane.b32.xlu0 %v5603_v13, %s5333_s4 }
 0x744   :  { %907 = vrot.lane.b32.xlu1 %v5601_v11, %s5333_s4 }
 0x77f   :  { %v777_v38 = vpop.xlane.xlu1 %776 }
 0x780   :  { %v774_v39 = vpop.xlane.xlu0 %773 }
 0x781   :  { %4980 = vrcp.f32 %v774_v39 }
 0x782   :  { %4982 = vrcp.f32 %v777_v38 }
 0x783   :  { %v4825_v40 = vpop.permute.xlu1 %4824 }
 0x784   :  { %v4820_v41 = vpop.permute.xlu0 %4819  ;;  %v4827_v42 = vunpack.i.h.bf16 %v4825_v40  ;;  %v4826_v43 = vunpack.i.l.bf16 %v4825_v40 }
 0x785   :  { %v4822_v44 = vunpack.i.h.bf16 %v4820_v41  ;;  %v4821_v45 = vunpack.i.l.bf16 %v4820_v41 }
 0x786   :  { %v4568_v54 = vpack.c.bf16 %v4827_v42, %v4826_v43 }
 0x787   :  { %v4830_v46 = vpop.permute.xlu1 %4829  ;;  %v4564_v51 = vpack.c.bf16 %v4822_v44, %v4821_v45 }
 0x788   :  { %v4832_v52 = vunpack.i.h.bf16 %v4830_v46  ;;  %v4831_v53 = vunpack.i.l.bf16 %v4830_v46 }
 0x789   :  { %4565 = vmatprep.subr.bf16.mxu1 %v4564_v51 }
 0x78a   :  { %4567 = vmatpush3.bf16.msra.mxu1 %v4564_v51  ;;  %v4572_v59 = vpack.c.bf16 %v4832_v52, %v4831_v53 }
 0x78b   :  { %v4981_v55 = vpop.eup %4980  ;;  %4569 = vmatprep.subr.bf16.mxu1 %v4568_v54  ;;  %v4835_v61 = vpop.permute.xlu1 %4834 }
 0x78c   :  { %v4983_v56 = vpop.eup %4982  ;;  %v788_v58 = vmul.f32 %v4981_v55, %v4975_v21  ;;  %v4837_v62 = vunpack.i.h.bf16 %v4835_v61  ;;  %v4836_v0 = vunpack.i.l.bf16 %v4835_v61 }
 0x78d   :  { %v789_v60 = vmul.f32 %v4983_v56, %v4973_v20 }
 0x78e   :  { %4571 = vmatpush3.bf16.msra.mxu1 %v4568_v54  ;;  %4236 = vmatprep.mubr.msk.f32.mxu1 %vm162_vm0, %v788_v58  ;;  %v4578_v2 = vpack.c.bf16 %v4837_v62, %v4836_v0 }
 0x78f   :  { %4574 = vmatprep.subr.msk.bf16.mxu1 %vm5615_vm2, %v4572_v59 }
 0x791   :  { %4237 = vmatmul.mubr.msk.f32.vlgmr.msra.gmra.mrb[8].mxu1 %vm162_vm0, %v789_v60 }
 0x797   :  { %4577 = vmatpush3.bf16.xpose.msk.msra.mxu1 %vm5615_vm2, %v4572_v59 }
 0x798   :  { %4580 = vmatprep.subr.msk.bf16.mxu1 %vm5615_vm2, %v4578_v2 }
 0x79f   :  { %4583 = vmatpush3.bf16.xpose.msk.msra.mxu1 %vm5615_vm2, %v4578_v2 }
 0x7b5   :  { %v780_v4 = vpop.xlane.xlu0 %779 }
 0x7b6   :  { %4984 = vrcp.f32 %v780_v4 }
 0x7b9   :  { %v902_v15 = vpop.permute.xlu0 %901 }
 0x7bc   :  { %v783_v5 = vpop.xlane.xlu1 %782 }
 0x7bd   :  { %4986 = vrcp.f32 %v783_v5  ;;  %v906_v19 = vpop.permute.xlu0 %905 }
 0x7c0   :  { %v4985_v7 = vpop.eup %4984  ;;  %v904_v17 = vpop.permute.xlu1 %903 }
 0x7c1   :  { %v790_v9 = vmul.f32 %v4985_v7, %v4977_v32 }
 0x7c3   :  { %4239 = vmatprep.mubr.msk.f32.mxu1 %vm162_vm0, %v790_v9 }
 0x7c4   :  { %v908_v20 = vpop.permute.xlu1 %907 }
 0x7c7   :  { %v4987_v12 = vpop.eup %4986 }
 0x7c8   :  { %v791_v16 = vmul.f32 %v4987_v12, %v4979_v35 }
 0x7ca   :  { %4240 = vmatmul.mubr.msk.f32.gmra.mrb[10].mxu1 %vm162_vm0, %v791_v16 }
 0x7cb   :  { %4250 = vmatprep.mubr.msk.f32.mxu1 %vm360_vm1, %v902_v15 }
 0x7ce   :  { %4251 = vmatmul.mubr.msk.f32.vlgmr.msra.gmra.mrb[12].mxu1 %vm360_vm1, %v904_v17 }
 0x7cf   :  { %4253 = vmatprep.mubr.msk.f32.mxu1 %vm360_vm1, %v906_v19 }
 0x7d2   :  { %4254 = vmatmul.mubr.msk.f32.gmra.mrb[14].mxu1 %vm360_vm1, %v908_v20 }
 0x864   :  { %v5749_v21 = vpop.f32.mrb[8].mxu1 }
 0x865   :  { %v5751_v22 = vpop.f32.mrb[9].mxu1 }
 0x89d   :  { %v5753_v23 = vpop.f32.mrb[10].mxu1 }
 0x89e   :  { %v5755_v24 = vpop.f32.mrb[11].mxu1 }
 0x8a1   :  { %v4252_v26 = vpop.f32.mrb[12].mxu1 }
 0x8a2   :  { %v1019_v27 = vmul.f32 0.35355338, %v4252_v26  ;;  %v999_v29 = vpop.f32.mrb[13].mxu1 }
 0x8a3   :  { %v1018_v30 = vmul.f32 0.35355338, %v999_v29 }
 0x8a4   :  { %v1023_v31 = vadd.f32 %v1019_v27, %v5636_v25 }
 0x8a5   :  { %v4255_v32 = vpop.f32.mrb[14].mxu1  ;;  %v1022_v34 = vadd.f32 %v1018_v30, %v5641_v28 }
 0x8a6   :  { %v1009_v35 = vpop.f32.mrb[15].mxu1  ;;  %v1029_v36 = vsel %vm162_vm0, %v1023_v31, -inf  ;;  %v1021_v38 = vmul.f32 0.35355338, %v4255_v32 }
 0x8a7   :  { %v1020_v39 = vmul.f32 0.35355338, %v1009_v35  ;;  %1030 = vmax.xlane.f32.xlu1 %v1029_v36  ;;  %v1026_v40 = vsel %vm162_vm0, %v1022_v34, -inf }
 0x8a8   :  { %1027 = vmax.xlane.f32.xlu0 %v1026_v40  ;;  %v1025_v43 = vadd.f32 %v1021_v38, %v5648_v33 }
 0x8a9   :  { %v1024_v41 = vadd.f32 %v1020_v39, %v5654_v37 }
 0x8aa   :  { %v1035_v44 = vsel %vm162_vm0, %v1025_v43, -inf }
 0x8ab   :  { %v1032_v42 = vsel %vm162_vm0, %v1024_v41, -inf }
 0x8ac   :  { %1033 = vmax.xlane.f32.xlu0 %v1032_v42 }
 0x8b0   :  { %1036 = vmax.xlane.f32.xlu0 %v1035_v44 }
 0x934   :  { %v1031_v45 = vpop.xlane.xlu1 %1030 }
 0x935   :  { %v1039_v46 = vsub.f32 %v1023_v31, %v1031_v45  ;;  %v1028_v51 = vpop.xlane.xlu0 %1027 }
 0x936   :  { %v1038_v52 = vsub.f32 %v1022_v34, %v1028_v51 }
 0x937   :  { %v1044_v53 = vmul.f32 1.442695, %v1039_v46 }
 0x938   :  { %v1042_v54 = vmul.f32 1.442695, %v1038_v52 }
 0x939   :  { %4988 = vpow2.f32 %v1044_v53  ;;  %v1034_v60 = vpop.xlane.xlu0 %1033 }
 0x93a   :  { %4990 = vpow2.f32 %v1042_v54  ;;  %v1040_v61 = vsub.f32 %v1024_v41, %v1034_v60 }
 0x93c   :  { %v1046_v62 = vmul.f32 1.442695, %v1040_v61 }
 0x93d   :  { %v1037_v0 = vpop.xlane.xlu0 %1036 }
 0x93e   :  { %v1041_v2 = vsub.f32 %v1025_v43, %v1037_v0  ;;  %4992 = vpow2.f32 %v1046_v62 }
 0x940   :  { %v1048_v4 = vmul.f32 1.442695, %v1041_v2 }
 0x942   :  { %4994 = vpow2.f32 %v1048_v4 }
 0x943   :  { %v4989_v55 = vpop.eup %4988 }
 0x944   :  { %v4991_v56 = vpop.eup %4990  ;;  %v1053_v58 = vsel %vm162_vm0, %v4989_v55, 0.0 }
 0x945   :  { %1054 = vadd.xlane.f32.xlu1 %v1053_v58  ;;  %v1050_v59 = vsel %vm162_vm0, %v4991_v56, 0.0 }
 0x946   :  { %1051 = vadd.xlane.f32.xlu0 %v1050_v59 }
 0x948   :  { %v4993_v5 = vpop.eup %4992 }
 0x949   :  { %v1056_v7 = vsel %vm162_vm0, %v4993_v5, 0.0 }
 0x94c   :  { %v4995_v9 = vpop.eup %4994 }
 0x94d   :  { %v1059_v12 = vsel %vm162_vm0, %v4995_v9, 0.0 }
 0x956   :  { %4844 = vrot.lane.b32.xlu1 %v5609_v14, %s5334_s19 }
 0x95a   :  { %4849 = vrot.lane.b32.xlu1 %v5599_v10, %s5335_s26 }
 0x95c   :  { %4839 = vrot.lane.b32.xlu0 %v5599_v10, %s5334_s19 }
 0x95e   :  { %4854 = vrot.lane.b32.xlu1 %v5609_v14, %s5335_s26 }
 0x97b   :  { %1057 = vadd.xlane.f32.xlu0 %v1056_v7 }
 0x982   :  { %1060 = vadd.xlane.f32.xlu1 %v1059_v12 }
 0x991   :  { %1179 = vrot.lane.b32.xlu0 %v5593_v8, %s5336_s29 }
 0x993   :  { %1181 = vrot.lane.b32.xlu1 %v5591_v6, %s5336_s29 }
 0x995   :  { %1183 = vrot.lane.b32.xlu0 %v5603_v13, %s5336_s29 }
 0x997   :  { %1185 = vrot.lane.b32.xlu1 %v5601_v11, %s5336_s29 }
 0x9d2   :  { %v1055_v15 = vpop.xlane.xlu1 %1054 }
 0x9d3   :  { %v1052_v16 = vpop.xlane.xlu0 %1051 }
 0x9d4   :  { %4996 = vrcp.f32 %v1052_v16 }
 0x9d5   :  { %4998 = vrcp.f32 %v1055_v15 }
 0x9d6   :  { %v4845_v17 = vpop.permute.xlu1 %4844 }
 0x9d7   :  { %v4840_v19 = vpop.permute.xlu0 %4839  ;;  %v4847_v20 = vunpack.i.h.bf16 %v4845_v17  ;;  %v4846_v26 = vunpack.i.l.bf16 %v4845_v17 }
 0x9d8   :  { %v4842_v27 = vunpack.i.h.bf16 %v4840_v19  ;;  %v4841_v29 = vunpack.i.l.bf16 %v4840_v19 }
 0x9d9   :  { %v4588_v32 = vpack.c.bf16 %v4847_v20, %v4846_v26 }
 0x9da   :  { %v4850_v8 = vpop.permute.xlu1 %4849  ;;  %v4584_v30 = vpack.c.bf16 %v4842_v27, %v4841_v29 }
 0x9db   :  { %v4852_v31 = vunpack.i.h.bf16 %v4850_v8  ;;  %v4851_v6 = vunpack.i.l.bf16 %v4850_v8 }
 0x9dc   :  { %4585 = vmatprep.subr.bf16.mxu0 %v4584_v30 }
 0x9dd   :  { %4587 = vmatpush3.bf16.msra.mxu0 %v4584_v30  ;;  %v4592_v35 = vpack.c.bf16 %v4852_v31, %v4851_v6 }
 0x9de   :  { %v4997_v13 = vpop.eup %4996  ;;  %4589 = vmatprep.subr.bf16.mxu0 %v4588_v32  ;;  %v4855_v38 = vpop.permute.xlu1 %4854 }
 0x9df   :  { %v4999_v11 = vpop.eup %4998  ;;  %v1066_v34 = vmul.f32 %v4997_v13, %v4991_v56  ;;  %v4857_v39 = vunpack.i.h.bf16 %v4855_v38  ;;  %v4856_v40 = vunpack.i.l.bf16 %v4855_v38 }
 0x9e0   :  { %v1067_v36 = vmul.f32 %v4999_v11, %v4989_v55 }
 0x9e1   :  { %4591 = vmatpush3.bf16.msra.mxu0 %v4588_v32  ;;  %4264 = vmatprep.mubr.msk.f32.mxu0 %vm162_vm0, %v1066_v34  ;;  %v4598_v41 = vpack.c.bf16 %v4857_v39, %v4856_v40 }
 0x9e2   :  { %4594 = vmatprep.subr.msk.bf16.mxu0 %vm5615_vm2, %v4592_v35 }
 0x9e4   :  { %4265 = vmatmul.mubr.msk.f32.vlgmr.msra.gmra.mrb[8].mxu0 %vm162_vm0, %v1067_v36 }
 0x9ea   :  { %4597 = vmatpush3.bf16.xpose.msk.msra.mxu0 %vm5615_vm2, %v4592_v35 }
 0x9eb   :  { %4600 = vmatprep.subr.msk.bf16.mxu0 %vm5615_vm2, %v4598_v41 }
 0x9f2   :  { %4603 = vmatpush3.bf16.xpose.msk.msra.mxu0 %vm5615_vm2, %v4598_v41 }
 0xa08   :  { %v1058_v42 = vpop.xlane.xlu0 %1057 }
 0xa09   :  { %5000 = vrcp.f32 %v1058_v42 }
 0xa0c   :  { %v1180_v51 = vpop.permute.xlu0 %1179 }
 0xa0f   :  { %v1061_v43 = vpop.xlane.xlu1 %1060 }
 0xa10   :  { %5002 = vrcp.f32 %v1061_v43  ;;  %v1184_v54 = vpop.permute.xlu0 %1183 }
 0xa13   :  { %v5001_v44 = vpop.eup %5000  ;;  %v1182_v53 = vpop.permute.xlu1 %1181 }
 0xa14   :  { %v1068_v45 = vmul.f32 %v5001_v44, %v4993_v5 }
 0xa16   :  { %4267 = vmatprep.mubr.msk.f32.mxu0 %vm162_vm0, %v1068_v45 }
 0xa17   :  { %v1186_v55 = vpop.permute.xlu1 %1185 }
 0xa1a   :  { %v5003_v46 = vpop.eup %5002 }
 0xa1b   :  { %v1069_v52 = vmul.f32 %v5003_v46, %v4995_v9 }
 0xa1d   :  { %4268 = vmatmul.mubr.msk.f32.gmra.mrb[10].mxu0 %vm162_vm0, %v1069_v52 }
 0xa1e   :  { %4278 = vmatprep.mubr.msk.f32.mxu0 %vm360_vm1, %v1180_v51 }
 0xa21   :  { %4279 = vmatmul.mubr.msk.f32.vlgmr.msra.gmra.mrb[12].mxu0 %vm360_vm1, %v1182_v53 }
 0xa22   :  { %4281 = vmatprep.mubr.msk.f32.mxu0 %vm360_vm1, %v1184_v54 }
 0xa25   :  { %4282 = vmatmul.mubr.msk.f32.gmra.mrb[14].mxu0 %vm360_vm1, %v1186_v55 }
 0xab7   :  { %v4266_v56 = vpop.f32.mrb[8].mxu0 }
 0xab8   :  { %v1160_v58 = vpop.f32.mrb[9].mxu0 }
 0xaf0   :  { %v5801_v59 = vpop.f32.mrb[10].mxu0 }
 0xaf1   :  { %v5803_v60 = vpop.f32.mrb[11].mxu0 }
 0xaf4   :  { %v4280_v61 = vpop.f32.mrb[12].mxu0 }
 0xaf5   :  { %v1297_v62 = vmul.f32 0.35355338, %v4280_v61  ;;  %v1277_v0 = vpop.f32.mrb[13].mxu0 }
 0xaf6   :  { %v1296_v2 = vmul.f32 0.35355338, %v1277_v0 }
 0xaf7   :  { %v1301_v4 = vadd.f32 %v1297_v62, %v5636_v25 }
 0xaf8   :  { %v4283_v5 = vpop.f32.mrb[14].mxu0  ;;  %v1300_v7 = vadd.f32 %v1296_v2, %v5641_v28  ;;  %v1519_v2 = vld [vmem:[%s6357_s7] sm:$0xff] }
 0xaf9   :  { %v1287_v9 = vpop.f32.mrb[15].mxu0  ;;  %v1307_v12 = vsel %vm162_vm0, %v1301_v4, -inf  ;;  %v1299_v15 = vmul.f32 0.35355338, %v4283_v5  ;;  %v1521_v5 = vld [vmem:[%s6357_s7 + $0x10] sm:$0xff] }
 0xafa   :  { %v1298_v16 = vmul.f32 0.35355338, %v1287_v9  ;;  %1308 = vmax.xlane.f32.xlu1 %v1307_v12  ;;  %v1304_v17 = vsel %vm162_vm0, %v1300_v7, -inf  ;;  %v1522_v9 = vld [vmem:[%s6357_s7 + $0x18] sm:$0xff] }
 0xafb   :  { %1305 = vmax.xlane.f32.xlu0 %v1304_v17  ;;  %v1303_v26 = vadd.f32 %v1299_v15, %v5648_v33  ;;  %v4616_v12 = vpack.c.bf16 %v1522_v9, %v1521_v5 }
 0xafc   :  { %v1302_v19 = vadd.f32 %v1298_v16, %v5654_v37 }
 0xafd   :  { %v1313_v25 = vsel %vm162_vm0, %v1303_v26, -inf }
 0xafe   :  { %v1310_v20 = vsel %vm162_vm0, %v1302_v19, -inf }
 0xaff   :  { %1311 = vmax.xlane.f32.xlu0 %v1310_v20 }
 0xb03   :  { %1314 = vmax.xlane.f32.xlu0 %v1313_v25 }
 0xb87   :  { %v1309_v28 = vpop.xlane.xlu1 %1308 }
 0xb88   :  { %v1317_v27 = vsub.f32 %v1301_v4, %v1309_v28  ;;  %v1306_v29 = vpop.xlane.xlu0 %1305  ;;  %v1520_v4 = vld [vmem:[%s6357_s7 + $0x8] sm:$0xff] }
 0xb89   :  { %v1316_v8 = vsub.f32 %v1300_v7, %v1306_v29  ;;  %v4612_v7 = vpack.c.bf16 %v1520_v4, %v1519_v2 }
 0xb8a   :  { %v1322_v30 = vmul.f32 1.442695, %v1317_v27 }
 0xb8b   :  { %v1320_v31 = vmul.f32 1.442695, %v1316_v8 }
 0xb8c   :  { %5004 = vpow2.f32 %v1322_v30  ;;  %v1312_v6 = vpop.xlane.xlu0 %1311 }
 0xb8d   :  { %5006 = vpow2.f32 %v1320_v31  ;;  %v1318_v32 = vsub.f32 %v1302_v19, %v1312_v6 }
 0xb8f   :  { %v1324_v13 = vmul.f32 1.442695, %v1318_v32 }
 0xb90   :  { %v1315_v37 = vpop.xlane.xlu0 %1314 }
 0xb91   :  { %5008 = vpow2.f32 %v1324_v13  ;;  %v1319_v11 = vsub.f32 %v1303_v26, %v1315_v37 }
 0xb93   :  { %v1326_v34 = vmul.f32 1.442695, %v1319_v11 }
 0xb95   :  { %5010 = vpow2.f32 %v1326_v34 }
 0xb96   :  { %v5005_v33 = vpop.eup %5004 }
 0xb97   :  { %v5007_v35 = vpop.eup %5006  ;;  %v1331_v36 = vsel %vm162_vm0, %v5005_v33, 0.0 }
 0xb98   :  { %1332 = vadd.xlane.f32.xlu1 %v1331_v36  ;;  %v1328_v38 = vsel %vm162_vm0, %v5007_v35, 0.0 }
 0xb99   :  { %1329 = vadd.xlane.f32.xlu0 %v1328_v38 }
 0xb9b   :  { %v5009_v39 = vpop.eup %5008 }
 0xb9c   :  { %v1334_v40 = vsel %vm162_vm0, %v5009_v39, 0.0 }
 0xb9d   :  { %1335 = vadd.xlane.f32.xlu0 %v1334_v40  ;;  %v3859_v40 = vld [vmem:[#allocation7] ss:$0 sm:$0xff] }
 0xb9f   :  { %v5011_v41 = vpop.eup %5010 }
 0xba0   :  { %v1337_v42 = vsel %vm162_vm0, %v5011_v41, 0.0 }
 0xba1   :  { %1338 = vadd.xlane.f32.xlu1 %v1337_v42 }
 0xbb2   :  { %4864 = vrot.lane.b32.xlu1 %v5609_v14, %s5337_s27 }
 0xbb3   :  { %4859 = vrot.lane.b32.xlu0 %v5599_v10, %s5337_s27 }
 0xbb6   :  { %1461 = vrot.lane.b32.xlu1 %v5751_v22, %s5338_s10 }
 0xbb7   :  { %1477 = vrot.lane.b32.xlu0 %v1160_v58, %s5319_s1 }
 0xbba   :  { %1463 = vrot.lane.b32.xlu1 %v5749_v21, %s5338_s10 }
 0xbbb   :  { %1465 = vrot.lane.b32.xlu0 %v5755_v24, %s5338_s10 }
 0xbbe   :  { %1479 = vrot.lane.b32.xlu1 %v4266_v56, %s5319_s1 }
 0xbc2   :  { %1467 = vrot.lane.b32.xlu1 %v5753_v23, %s5338_s10 }
 0xc25   :  { %v1333_v10 = vpop.xlane.xlu1 %1332 }
 0xc26   :  { %v1330_v14 = vpop.xlane.xlu0 %1329 }
 0xc27   :  { %5012 = vrcp.f32 %v1330_v14 }
 0xc28   :  { %5014 = vrcp.f32 %v1333_v10 }
 0xc2a   :  { %v1336_v43 = vpop.xlane.xlu0 %1335 }
 0xc2b   :  { %5016 = vrcp.f32 %v1336_v43 }
 0xc2e   :  { %v1339_v22 = vpop.xlane.xlu1 %1338  ;;  %v4860_v44 = vpop.permute.xlu0 %4859 }
 0xc2f   :  { %v4862_v45 = vunpack.i.h.bf16 %v4860_v44  ;;  %v4861_v46 = vunpack.i.l.bf16 %v4860_v44  ;;  %5018 = vrcp.f32 %v1339_v22 }
 0xc31   :  { %v5013_v21 = vpop.eup %5012  ;;  %v4604_v51 = vpack.c.bf16 %v4862_v45, %v4861_v46 }
 0xc32   :  { %v4865_v52 = vpop.permute.xlu1 %4864  ;;  %v1344_v24 = vmul.f32 %v5013_v21, %v5007_v35  ;;  %v5015_v55 = vpop.eup %5014 }
 0xc33   :  { %v4867_v53 = vunpack.i.h.bf16 %v4865_v52  ;;  %v4866_v54 = vunpack.i.l.bf16 %v4865_v52  ;;  %4605 = vmatprep.subr.bf16.mxu1 %v4604_v51  ;;  %v1345_v58 = vmul.f32 %v5015_v55, %v5005_v33  ;;  %v1478_v28 = vpop.permute.xlu0 %1477 }
 0xc34   :  { %4607 = vmatpush3.bf16.msra.mxu1 %v4604_v51  ;;  %4292 = vmatprep.mubr.msk.f32.mxu1 %vm162_vm0, %v1344_v24 }
 0xc35   :  { %v4608_v23 = vpack.c.bf16 %v4867_v53, %v4866_v54  ;;  %v5017_v56 = vpop.eup %5016 }
 0xc36   :  { %v1346_v62 = vmul.f32 %v5017_v56, %v5009_v39  ;;  %v1462_v20 = vpop.permute.xlu1 %1461 }
 0xc37   :  { %4609 = vmatprep.subr.bf16.mxu1 %v4608_v23  ;;  %v1466_v29 = vpop.permute.xlu0 %1465  ;;  %v1505_v8 = vsel %vm360_vm1, %v5699_v48, %v1462_v20 }
 0xc38   :  { %4611 = vmatpush3.bf16.msra.mxu1 %v4608_v23  ;;  %v1507_v11 = vsel %vm360_vm1, %v5703_v50, %v1466_v29 }
 0xc39   :  { %v5019_v61 = vpop.eup %5018  ;;  %4613 = vmatprep.subr.bf16.mxu1 %v4612_v7 }
 0xc3a   :  { %v1347_v0 = vmul.f32 %v5019_v61, %v5011_v41  ;;  %v1464_v26 = vpop.permute.xlu1 %1463 }
 0xc3b   :  { %4293 = vmatmul.mubr.msk.f32.vlgmr.msra.gmra.mrb[16].mxu1 %vm162_vm0, %v1345_v58  ;;  %v1506_v30 = vsel %vm360_vm1, %v5697_v47, %v1464_v26  ;;  %v1707_v26 = vld [vmem:[%s6361_s11 + $0x10] sm:$0xff] }
 0xc3c   :  { %4295 = vmatprep.mubr.msk.f32.mxu1 %vm162_vm0, %v1346_v62  ;;  %4615 = vmatpush3.bf16.msra.mxu1 %v4612_v7 }
 0xc3d   :  { %4617 = vmatprep.subr.bf16.mxu1 %v4616_v12 }
 0xc3e   :  { %v1480_v25 = vpop.permute.xlu1 %1479 }
 0xc3f   :  { %4296 = vmatmul.mubr.msk.f32.gmra.mrb[18].mxu1 %vm162_vm0, %v1347_v0  ;;  %v1511_v6 = vsel %vm1509_vm3, %v1506_v30, %v1480_v25  ;;  %v1708_v25 = vld [vmem:[%s6361_s11 + $0x18] sm:$0xff] }
 0xc40   :  { %4619 = vmatpush3.bf16.msra.mxu1 %v4616_v12 }
 0xc42   :  { %v1468_v27 = vpop.permute.xlu1 %1467 }
 0xc43   :  { %v1508_v47 = vsel %vm360_vm1, %v5701_v49, %v1468_v27 }
 0xd0e   :  { %v4294_v15 = vpop.f32.mrb[16].mxu1 }
 0xd0f   :  { %1495 = vrot.lane.b32.xlu1 %v4294_v15, %s5339_s25  ;;  %v1438_v16 = vpop.f32.mrb[17].mxu1 }
 0xd10   :  { %1493 = vrot.lane.b32.xlu0 %v1438_v16, %s5339_s25 }
 0xd12   :  { %v4297_v17 = vpop.f32.mrb[18].mxu1 }
 0xd13   :  { %1483 = vrot.lane.b32.xlu1 %v5801_v59, %s5319_s1  ;;  %v1448_v19 = vpop.f32.mrb[19].mxu1 }
 0xd14   :  { %1481 = vrot.lane.b32.xlu0 %v5803_v60, %s5319_s1  ;;  %v1510_v60 = vsel %vm1509_vm3, %v1505_v8, %v1478_v28  ;;  %v4624_v28 = vpack.c.bf16 %v1708_v25, %v1707_v26 }
 0xd17   :  { %1499 = vrot.lane.b32.xlu1 %v4297_v17, %s5339_s25  ;;  %v1705_v17 = vld [vmem:[%s6361_s11] sm:$0xff] }
 0xd18   :  { %1497 = vrot.lane.b32.xlu0 %v1448_v19, %s5339_s25  ;;  %v1706_v19 = vld [vmem:[%s6361_s11 + $0x8] sm:$0xff] }
 0xd19   :  { %v4620_v20 = vpack.c.bf16 %v1706_v19, %v1705_v17 }
 0xd1b   :  { %4621 = vmatprep.subr.bf16.mxu0 %v4620_v20 }
 0xd1c   :  { %4623 = vmatpush3.bf16.msra.mxu0 %v4620_v20 }
 0xd1d   :  { %4625 = vmatprep.subr.bf16.mxu0 %v4624_v28 }
 0xd20   :  { %4627 = vmatpush3.bf16.msra.mxu0 %v4624_v28 }
 0xd81   :  { %v1496_v59 = vpop.permute.xlu1 %1495 }
 0xd82   :  { %v1494_v31 = vpop.permute.xlu0 %1493  ;;  %v1516_v13 = vsel %vm1514_vm4, %v1511_v6, %v1496_v59 }
 0xd83   :  { %v1515_v32 = vsel %vm1514_vm4, %v1510_v60, %v1494_v31 }
 0xd84   :  { %4306 = vmatprep.mubr.msk.f32.mxu1 %vm162_vm0, %v1515_v32 }
 0xd85   :  { %v1484_v37 = vpop.permute.xlu1 %1483  ;;  %4307 = vmatmul.mubr.msk.f32.vlgmr.msra.gmra.mrb[20].mxu1 %vm162_vm0, %v1516_v13 }
 0xd86   :  { %v1482_v48 = vpop.permute.xlu0 %1481  ;;  %v1513_v36 = vsel %vm1509_vm3, %v1508_v47, %v1484_v37 }
 0xd87   :  { %v1512_v33 = vsel %vm1509_vm3, %v1507_v11, %v1482_v48  ;;  %v3864_v11 = vld [vmem:[#allocation8] ss:$0 sm:$0xff] }
 0xd89   :  { %v1500_v34 = vpop.permute.xlu1 %1499 }
 0xd8a   :  { %v1498_v35 = vpop.permute.xlu0 %1497  ;;  %v1518_v39 = vsel %vm1514_vm4, %v1513_v36, %v1500_v34  ;;  %v3865_v36 = vld [vmem:[#allocation10] ss:$0 sm:$0xff] }
 0xd8b   :  { %v1517_v38 = vsel %vm1514_vm4, %v1512_v33, %v1498_v35 }
 0xd8c   :  { %4309 = vmatprep.mubr.msk.f32.mxu1 %vm162_vm0, %v1517_v38 }
 0xd8d   :  { %4310 = vmatmul.mubr.msk.f32.gmra.mrb[22].mxu1 %vm162_vm0, %v1518_v39 }
 0xe58   :  { %v4308_v41 = vpop.f32.mrb[20].mxu1 }
 0xe59   :  { %v1614_v50 = vadd.f32 %v4308_v41, %v3859_v40  ;;  %v1608_v42 = vpop.f32.mrb[21].mxu1 }
 0xe5a   :  { %v1609_v14 = vadd.f32 %v3859_v40, %v1608_v42 }
 0xe5b   :  { %v1628_v49 = vadd.f32 %v1614_v50, %v5579_v63 }
 0xe5c   :  { %v1627_v10 = vadd.f32 %v1609_v14, %v5575_v57 }
 0xe5d   :  { %v1636_v43 = vsel %vm162_vm0, %v1628_v49, 0.0 }
 0xe5e   :  { %1637 = vadd.xlane.f32.xlu1 %v1636_v43  ;;  %v1633_v22 = vsel %vm162_vm0, %v1627_v10, 0.0 }
 0xe5f   :  { %1634 = vadd.xlane.f32.xlu0 %v1633_v22 }
 0xe60   :  { %v4311_v44 = vpop.f32.mrb[22].mxu1 }
 0xe61   :  { %v1618_v45 = vpop.f32.mrb[23].mxu1  ;;  %v1624_v46 = vadd.f32 %v4311_v44, %v3859_v40 }
 0xe62   :  { %v1619_v21 = vadd.f32 %v3859_v40, %v1618_v45  ;;  %v1833_v45 = vld [vmem:[%s6363_s13] sm:$0xff] }
 0xe63   :  { %v1630_v24 = vadd.f32 %v1624_v46, %v5587_v3  ;;  %v1834_v46 = vld [vmem:[%s6363_s13 + $0x8] sm:$0xff] }
 0xe64   :  { %v1629_v51 = vadd.f32 %v1619_v21, %v5581_v1  ;;  %v4628_v21 = vpack.c.bf16 %v1834_v46, %v1833_v45 }
 0xe65   :  { %v1642_v63 = vsel %vm162_vm0, %v1630_v24, 0.0 }
 0xe66   :  { %v1639_v52 = vsel %vm162_vm0, %v1629_v51, 0.0  ;;  %4629 = vmatprep.subr.bf16.mxu1 %v4628_v21 }
 0xe67   :  { %1640 = vadd.xlane.f32.xlu0 %v1639_v52  ;;  %4631 = vmatpush3.bf16.msra.mxu1 %v4628_v21  ;;  %v1836_v52 = vld [vmem:[%s6363_s13 + $0x18] sm:$0xff] }
 0xe6b   :  { %1643 = vadd.xlane.f32.xlu0 %v1642_v63  ;;  %v1837_v63 = vld [vmem:[%s6363_s13 + $0x20] sm:$0xff] }
 0xeeb   :  { %v1638_v57 = vpop.xlane.xlu1 %1637 }
 0xeec   :  { %v1646_v53 = vmul.f32 0.03125, %v1638_v57  ;;  %v1635_v54 = vpop.xlane.xlu0 %1634  ;;  %v1838_v57 = vld [vmem:[%s6363_s13 + $0x28] sm:$0xff] }
 0xeed   :  { %v1645_v23 = vmul.f32 0.03125, %v1635_v54  ;;  %v1839_v54 = vld [vmem:[%s6363_s13 + $0x30] sm:$0xff] }
 0xeee   :  { %v1650_v55 = vsub.f32 %v1628_v49, %v1646_v53  ;;  %v4636_v53 = vpack.c.bf16 %v1838_v57, %v1837_v63 }
 0xeef   :  { %v1649_v56 = vsub.f32 %v1627_v10, %v1645_v23  ;;  %v1840_v23 = vld [vmem:[%s6363_s13 + $0x38] sm:$0xff] }
 0xef0   :  { %v1654_v58 = vmul.f32 %v1650_v55, %v1650_v55 }
 0xef1   :  { %v1653_v61 = vmul.f32 %v1649_v56, %v1649_v56 }
 0xef2   :  { %v1660_v62 = vsel %vm162_vm0, %v1654_v58, 0.0 }
 0xef3   :  { %1661 = vadd.xlane.f32.xlu1 %v1660_v62  ;;  %v1657_v1 = vsel %vm162_vm0, %v1653_v61, 0.0 }
 0xef4   :  { %1658 = vadd.xlane.f32.xlu0 %v1657_v1  ;;  %v1641_v0 = vpop.xlane.xlu0 %1640 }
 0xef5   :  { %v1647_v3 = vmul.f32 0.03125, %v1641_v0 }
 0xef7   :  { %v1651_v2 = vsub.f32 %v1629_v51, %v1647_v3  ;;  %v1835_v51 = vld [vmem:[%s6363_s13 + $0x10] sm:$0xff] }
 0xef8   :  { %v1644_v4 = vpop.xlane.xlu0 %1643 }
 0xef9   :  { %v1648_v5 = vmul.f32 0.03125, %v1644_v4  ;;  %v1655_v7 = vmul.f32 %v1651_v2, %v1651_v2 }
 0xefb   :  { %v1652_v9 = vsub.f32 %v1630_v24, %v1648_v5  ;;  %v1663_v12 = vsel %vm162_vm0, %v1655_v7, 0.0  ;;  %v4632_v24 = vpack.c.bf16 %v1836_v52, %v1835_v51 }
 0xefc   :  { %1664 = vadd.xlane.f32.xlu0 %v1663_v12 }
 0xefd   :  { %v1656_v15 = vmul.f32 %v1652_v9, %v1652_v9  ;;  %4633 = vmatprep.subr.bf16.mxu1 %v4632_v24 }
 0xefe   :  { %4635 = vmatpush3.bf16.msra.mxu1 %v4632_v24 }
 0xeff   :  { %v1666_v16 = vsel %vm162_vm0, %v1656_v15, 0.0  ;;  %4637 = vmatprep.subr.bf16.mxu1 %v4636_v53 }
 0xf00   :  { %1667 = vadd.xlane.f32.xlu1 %v1666_v16 }
 0xf02   :  { %4639 = vmatpush3.bf16.msra.mxu1 %v4636_v53 }
 0xf80   :  { %v1662_v27 = vpop.xlane.xlu1 %1661 }
 0xf81   :  { %v1670_v29 = vmul.f32 0.03125, %v1662_v27  ;;  %v1659_v8 = vpop.xlane.xlu0 %1658 }
 0xf82   :  { %v1669_v59 = vmul.f32 0.03125, %v1659_v8 }
 0xf83   :  { %v1674_v30 = vadd.f32 1e-12, %v1670_v29 }
 0xf84   :  { %v1673_v60 = vadd.f32 1e-12, %v1669_v59 }
 0xf85   :  { %5020 = vrsqrt.f32 %v1674_v30 }
 0xf86   :  { %5022 = vrsqrt.f32 %v1673_v60 }
 0xf89   :  { %v1665_v31 = vpop.xlane.xlu0 %1664 }
 0xf8a   :  { %v1671_v6 = vmul.f32 0.03125, %v1665_v31 }
 0xf8c   :  { %v1675_v32 = vadd.f32 1e-12, %v1671_v6 }
 0xf8d   :  { %v1668_v13 = vpop.xlane.xlu1 %1667 }
 0xf8e   :  { %5024 = vrsqrt.f32 %v1675_v32  ;;  %v1672_v37 = vmul.f32 0.03125, %v1668_v13  ;;  %v3871_v32 = vld [vmem:[#allocation13] ss:$0 sm:$0xff] }
 0xf8f   :  { %v5021_v48 = vpop.eup %5020 }
 0xf90   :  { %v5023_v34 = vpop.eup %5022  ;;  %v1682_v47 = vmul.f32 %v5021_v48, %v1650_v55  ;;  %v1676_v33 = vadd.f32 1e-12, %v1672_v37  ;;  %v4640_v55 = vpack.c.bf16 %v1840_v23, %v1839_v54 }
 0xf91   :  { %v1681_v35 = vmul.f32 %v5023_v34, %v1649_v56  ;;  %v3866_v56 = vld [vmem:[#allocation11] ss:$0 sm:$0xff] }
 0xf92   :  { %5026 = vrsqrt.f32 %v1676_v33  ;;  %v1692_v38 = vmul.f32 %v3864_v11, %v1682_v47  ;;  %4641 = vmatprep.subr.bf16.mxu1 %v4640_v55 }
 0xf93   :  { %v1691_v39 = vmul.f32 %v3864_v11, %v1681_v35  ;;  %4643 = vmatpush3.bf16.msra.mxu1 %v4640_v55 }
 0xf94   :  { %v5901_v41 = vadd.f32 %v3865_v36, %v1692_v38 }
 0xf95   :  { %v5899_v40 = vadd.f32 %v3865_v36, %v1691_v39 }
 0xf97   :  { %4320 = vmatprep.mubr.msk.f32.mxu0 %vm162_vm0, %v5899_v40 }
 0xf98   :  { %v5025_v50 = vpop.eup %5024  ;;  %4321 = vmatmul.mubr.msk.f32.vlgmr.msra.gmra.mrb[16].mxu0 %vm162_vm0, %v5901_v41 }
 0xf99   :  { %v1683_v42 = vmul.f32 %v5025_v50, %v1651_v2 }
 0xf9b   :  { %v1693_v14 = vmul.f32 %v3864_v11, %v1683_v42 }
 0xf9c   :  { %v5027_v49 = vpop.eup %5026 }
 0xf9d   :  { %v5907_v10 = vadd.f32 %v3865_v36, %v1693_v14  ;;  %v1684_v43 = vmul.f32 %v5027_v49, %v1652_v9 }
 0xf9f   :  { %4323 = vmatprep.mubr.msk.f32.mxu0 %vm162_vm0, %v5907_v10  ;;  %v1694_v22 = vmul.f32 %v3864_v11, %v1684_v43 }
 0xfa1   :  { %v5911_v44 = vadd.f32 %v3865_v36, %v1694_v22 }
 0xfa3   :  { %4324 = vmatmul.mubr.msk.f32.gmra.mrb[18].mxu0 %vm162_vm0, %v5911_v44 }
0x106b   :  { %v4322_v58 = vpop.f32.mrb[16].mxu0 }
0x106c   :  { %v1800_v61 = vadd.f32 %v4322_v58, %v3866_v56  ;;  %v1794_v62 = vpop.f32.mrb[17].mxu0 }
0x106d   :  { %v1795_v1 = vadd.f32 %v3866_v56, %v1794_v62  ;;  %v3878_v62 = vld [vmem:[%s6355_s5 + $0x20] sm:$0xff] }
0x106e   :  { %v1818_v0 = vmul.f32 0.70710677, %v1800_v61  ;;  %v1814_v26 = vmul.f32 0.5, %v1800_v61 }
0x106f   :  { %v1817_v3 = vmul.f32 0.70710677, %v1795_v1  ;;  %v1813_v19 = vmul.f32 0.5, %v1795_v1  ;;  %v3879_v1 = vld [vmem:[%s6355_s5 + $0x28] sm:$0xff] }
0x1070   :  { %5028 = verf.f32 %v1818_v0  ;;  %v4644_v0 = vpack.c.bf16 %v3879_v1, %v3878_v62 }
0x1071   :  { %5030 = verf.f32 %v1817_v3  ;;  %v3880_v3 = vld [vmem:[%s6355_s5 + $0x30] sm:$0xff] }
0x1072   :  { %4645 = vmatprep.subr.bf16.mxu0 %v4644_v0 }
0x1073   :  { %4647 = vmatpush3.bf16.msra.mxu0 %v4644_v0 }
0x1076   :  { %v4325_v2 = vpop.f32.mrb[18].mxu0 }
0x1077   :  { %v1810_v4 = vadd.f32 %v4325_v2, %v3866_v56  ;;  %v1804_v5 = vpop.f32.mrb[19].mxu0  ;;  %v3881_v2 = vld [vmem:[%s6355_s5 + $0x38] sm:$0xff] }
0x1078   :  { %v1805_v7 = vadd.f32 %v3866_v56, %v1804_v5 }
0x1079   :  { %v1820_v9 = vmul.f32 0.70710677, %v1810_v4  ;;  %v1816_v60 = vmul.f32 0.5, %v1810_v4  ;;  %v4648_v4 = vpack.c.bf16 %v3881_v2, %v3880_v3 }
0x107a   :  { %v5029_v12 = vpop.eup %5028  ;;  %v1819_v15 = vmul.f32 0.70710677, %v1805_v7  ;;  %v1815_v59 = vmul.f32 0.5, %v1805_v7 }
0x107b   :  { %v5031_v16 = vpop.eup %5030  ;;  %v1826_v17 = vadd.f32 1.0, %v5029_v12  ;;  %5032 = verf.f32 %v1820_v9  ;;  %4649 = vmatprep.subr.bf16.mxu0 %v4648_v4 }
0x107c   :  { %v1825_v20 = vadd.f32 1.0, %v5031_v16  ;;  %5034 = verf.f32 %v1819_v15  ;;  %4651 = vmatpush3.bf16.msra.mxu0 %v4648_v4 }
0x107d   :  { %v1830_v28 = vmul.f32 %v1826_v17, %v1814_v26 }
0x107e   :  { %v1829_v25 = vmul.f32 %v1825_v20, %v1813_v19 }
0x1080   :  { %4342 = vmatprep.mubr.msk.f32.mxu1 %vm1848_vm5, %v1829_v25 }
0x1081   :  { %4343 = vmatmul.mubr.msk.f32.vlgmr.msra.gmra.mrb[24].mxu1 %vm1848_vm5, %v1830_v28 }
0x1085   :  { %v5033_v27 = vpop.eup %5032 }
0x1086   :  { %v5035_v29 = vpop.eup %5034  ;;  %v1828_v8 = vadd.f32 1.0, %v5033_v27 }
0x1087   :  { %v1827_v30 = vadd.f32 1.0, %v5035_v29  ;;  %v3876_v29 = vld [vmem:[%s6365_s15] ss:$0 sm:$0xff] }
0x1088   :  { %v1832_v6 = vmul.f32 %v1828_v8, %v1816_v60  ;;  %v3877_v60 = vld [vmem:[%s6366_s16] ss:$0 sm:$0xff] }
0x1089   :  { %v1831_v31 = vmul.f32 %v1827_v30, %v1815_v59 }
0x108b   :  { %4345 = vmatprep.mubr.msk.f32.mxu1 %vm1848_vm5, %v1831_v31 }
0x108c   :  { %4346 = vmatmul.mubr.msk.f32.gmra.mrb[26].mxu1 %vm1848_vm5, %v1832_v6 }
0x1154   :  { %v4344_v13 = vpop.f32.mrb[24].mxu1 }
0x1155   :  { %v1933_v37 = vadd.f32 %v4344_v13, %v3871_v32  ;;  %v1927_v48 = vpop.f32.mrb[25].mxu1 }
0x1156   :  { %v1928_v11 = vadd.f32 %v3871_v32, %v1927_v48 }
0x1157   :  { %v1947_v34 = vadd.f32 %v1933_v37, %v5901_v41 }
0x1158   :  { %v1946_v47 = vadd.f32 %v1928_v11, %v5899_v40 }
0x1159   :  { %v1955_v33 = vsel %vm162_vm0, %v1947_v34, 0.0 }
0x115a   :  { %1956 = vadd.xlane.f32.xlu1 %v1955_v33  ;;  %v1952_v35 = vsel %vm162_vm0, %v1946_v47, 0.0 }
0x115b   :  { %1953 = vadd.xlane.f32.xlu0 %v1952_v35 }
0x115f   :  { %v4347_v36 = vpop.f32.mrb[26].mxu1 }
0x1160   :  { %v1943_v38 = vadd.f32 %v4347_v36, %v3871_v32  ;;  %v1937_v39 = vpop.f32.mrb[27].mxu1 }
0x1161   :  { %v1938_v50 = vadd.f32 %v3871_v32, %v1937_v39 }
0x1162   :  { %v1949_v42 = vadd.f32 %v1943_v38, %v5911_v44  ;;  %v3882_v38 = vld [vmem:[#allocation5 + $0x1] ss:$0 sm:$0xff] }
0x1163   :  { %v1948_v14 = vadd.f32 %v1938_v50, %v5907_v10 }
0x1164   :  { %v1961_v49 = vsel %vm162_vm0, %v1949_v42, 0.0 }
0x1165   :  { %1962 = vadd.xlane.f32.xlu1 %v1961_v49  ;;  %v1958_v41 = vsel %vm162_vm0, %v1948_v14, 0.0 }
0x1166   :  { %1959 = vadd.xlane.f32.xlu0 %v1958_v41 }
0x11e7   :  { %v1957_v40 = vpop.xlane.xlu1 %1956 }
0x11e8   :  { %v1965_v43 = vmul.f32 0.03125, %v1957_v40  ;;  %v1954_v22 = vpop.xlane.xlu0 %1953 }
0x11e9   :  { %v1964_v45 = vmul.f32 0.03125, %v1954_v22 }
0x11ea   :  { %v1969_v46 = vsub.f32 %v1947_v34, %v1965_v43 }
0x11eb   :  { %v1968_v21 = vsub.f32 %v1946_v47, %v1964_v45 }
0x11ec   :  { %v1973_v51 = vmul.f32 %v1969_v46, %v1969_v46 }
0x11ed   :  { %v1972_v52 = vmul.f32 %v1968_v21, %v1968_v21 }
0x11ee   :  { %v1979_v24 = vsel %vm162_vm0, %v1973_v51, 0.0 }
0x11ef   :  { %1980 = vadd.xlane.f32.xlu1 %v1979_v24  ;;  %v1976_v44 = vsel %vm162_vm0, %v1972_v52, 0.0 }
0x11f0   :  { %1977 = vadd.xlane.f32.xlu0 %v1976_v44 }
0x11f2   :  { %v1963_v10 = vpop.xlane.xlu1 %1962 }
0x11f3   :  { %v1967_v63 = vmul.f32 0.03125, %v1963_v10  ;;  %v1960_v57 = vpop.xlane.xlu0 %1959 }
0x11f4   :  { %v1966_v53 = vmul.f32 0.03125, %v1960_v57 }
0x11f5   :  { %v1971_v54 = vsub.f32 %v1949_v42, %v1967_v63 }
0x11f6   :  { %v1970_v23 = vsub.f32 %v1948_v14, %v1966_v53 }
0x11f7   :  { %v1975_v55 = vmul.f32 %v1971_v54, %v1971_v54 }
0x11f8   :  { %v1974_v56 = vmul.f32 %v1970_v23, %v1970_v23 }
0x11f9   :  { %v1985_v58 = vsel %vm162_vm0, %v1975_v55, 0.0  ;;  %v6028_v55 = vld [vmem:[%s6352_s2 + $0x8] sm:$0xff] }
0x11fa   :  { %1986 = vadd.xlane.f32.xlu1 %v1985_v58  ;;  %v1982_v61 = vsel %vm162_vm0, %v1974_v56, 0.0  ;;  %v6034_v58 = vld [vmem:[%s6352_s2] sm:$0xff] }
0x11fb   :  { %1983 = vadd.xlane.f32.xlu0 %v1982_v61 }
0x127c   :  { %v1981_v5 = vpop.xlane.xlu1 %1980 }
0x127d   :  { %v1989_v7 = vmul.f32 0.03125, %v1981_v5  ;;  %v1978_v9 = vpop.xlane.xlu0 %1977  ;;  %v6042_v5 = vld [vmem:[%s6352_s2 + $0x18] sm:$0xff] }
0x127e   :  { %v1988_v12 = vmul.f32 0.03125, %v1978_v9  ;;  %v6048_v9 = vld [vmem:[%s6352_s2 + $0x10] sm:$0xff] }
0x127f   :  { %v1993_v15 = vadd.f32 1e-12, %v1989_v7 }
0x1280   :  { %v1992_v16 = vadd.f32 1e-12, %v1988_v12 }
0x1281   :  { %5036 = vrsqrt.f32 %v1993_v15 }
0x1282   :  { %5038 = vrsqrt.f32 %v1992_v16 }
0x1287   :  { %v1987_v17 = vpop.xlane.xlu1 %1986 }
0x1288   :  { %v1991_v19 = vmul.f32 0.03125, %v1987_v17  ;;  %v1984_v20 = vpop.xlane.xlu0 %1983 }
0x1289   :  { %v1990_v26 = vmul.f32 0.03125, %v1984_v20 }
0x128a   :  { %v1995_v25 = vadd.f32 1e-12, %v1991_v19 }
0x128b   :  { %v5037_v28 = vpop.eup %5036  ;;  %v1994_v27 = vadd.f32 1e-12, %v1990_v26 }
0x128c   :  { %v5039_v8 = vpop.eup %5038  ;;  %v2001_v59 = vmul.f32 %v5037_v28, %v1969_v46  ;;  %5040 = vrsqrt.f32 %v1995_v25 }
0x128d   :  { %5042 = vrsqrt.f32 %v1994_v27  ;;  %v2000_v30 = vmul.f32 %v5039_v8, %v1968_v21 }
0x128e   :  { %v2011_v31 = vmul.f32 %v3876_v29, %v2001_v59 }
0x128f   :  { %v2010_v6 = vmul.f32 %v3876_v29, %v2000_v30 }
0x1290   :  { %v5975_v13 = vadd.f32 %v3877_v60, %v2011_v31 }
0x1291   :  { %v5973_v32 = vadd.f32 %v3877_v60, %v2010_v6 }
0x1293   :  { %4356 = vmatprep.mubr.msk.f32.mxu0 %vm162_vm0, %v5973_v32 }
0x1294   :  { %4357 = vmatmul.mubr.msk.f32.vlgmr.msra.gmra.mrb[20].mxu0 %vm162_vm0, %v5975_v13 }
0x1296   :  { %v5041_v37 = vpop.eup %5040 }
0x1297   :  { %v5043_v48 = vpop.eup %5042  ;;  %v2003_v11 = vmul.f32 %v5041_v37, %v1971_v54 }
0x1298   :  { %v2002_v34 = vmul.f32 %v5043_v48, %v1970_v23 }
0x1299   :  { %v2013_v47 = vmul.f32 %v3876_v29, %v2003_v11 }
0x129a   :  { %v2012_v33 = vmul.f32 %v3876_v29, %v2002_v34 }
0x129b   :  { %v5983_v36 = vadd.f32 %v3877_v60, %v2013_v47 }
0x129c   :  { %v5981_v35 = vadd.f32 %v3877_v60, %v2012_v33 }
0x129e   :  { %4359 = vmatprep.mubr.msk.f32.mxu0 %vm162_vm0, %v5981_v35 }
0x129f   :  { %4360 = vmatmul.mubr.msk.f32.gmra.mrb[22].mxu0 %vm162_vm0, %v5983_v36 }
0x1367   :  { %v4358_v39 = vpop.f32.mrb[20].mxu0 }
0x1368   :  { %v5989_v50 = vadd.f32 %v4358_v39, %v3882_v38  ;;  %v2115_v42 = vpop.f32.mrb[21].mxu0 }
0x1369   :  { %v5991_v14 = vadd.f32 %v3882_v38, %v2115_v42 }
0x136b   :  { %4370 = vmatprep.mubr.msk.f32.mxu0 %vm360_vm1, %v5991_v14  ;;  %v5997_v49 = vpack.i.bf16 %v5989_v50, %v5991_v14 }
0x136d   :  { %4869 = vrot.lane.b32.xlu0 %v5997_v49, %s5327_s3 }
0x1372   :  { %v4361_v41 = vpop.f32.mrb[22].mxu0 }
0x1373   :  { %v6001_v40 = vadd.f32 %v4361_v41, %v3882_v38  ;;  %v2125_v43 = vpop.f32.mrb[23].mxu0 }
0x1374   :  { %v6003_v22 = vadd.f32 %v3882_v38, %v2125_v43 }
0x1376   :  { %v6007_v45 = vpack.i.bf16 %v6001_v40, %v6003_v22 }
0x1378   :  { %4874 = vrot.lane.b32.xlu1 %v6007_v45, %s5327_s3 }
0x13df   :  { %v4870_v46 = vpop.permute.xlu0 %4869 }
0x13e0   :  { %v4872_v21 = vunpack.i.h.bf16 %v4870_v46  ;;  %v4871_v51 = vunpack.i.l.bf16 %v4870_v46 }
0x13e2   :  { %v4652_v52 = vpack.c.bf16 %v4872_v21, %v4871_v51 }
0x13e4   :  { %4654 = vmatprep.subr.msk.bf16.mxu0 %vm5615_vm2, %v4652_v52 }
0x13e5   :  { %4657 = vmatpush3.bf16.xpose.msk.msra.mxu0 %vm5615_vm2, %v4652_v52 }
0x13ea   :  { %v4875_v24 = vpop.permute.xlu1 %4874 }
0x13eb   :  { %v4877_v44 = vunpack.i.h.bf16 %v4875_v24  ;;  %v4876_v10 = vunpack.i.l.bf16 %v4875_v24 }
0x13ed   :  { %v4658_v63 = vpack.c.bf16 %v4877_v44, %v4876_v10 }
0x13ef   :  { %4660 = vmatprep.subr.msk.bf16.mxu0 %vm5615_vm2, %v4658_v63 }
0x13f0   :  { %4663 = vmatpush3.bf16.xpose.msk.msra.mxu0 %vm5615_vm2, %v4658_v63 }
0x13f7   :  { %4371 = vmatmul.mubr.msk.f32.vlgmr.msra.gmra.mrb[24].mxu0 %vm360_vm1, %v5989_v50 }
0x13f8   :  { %4373 = vmatprep.mubr.msk.f32.mxu0 %vm360_vm1, %v6003_v22 }
0x13fb   :  { %4374 = vmatmul.mubr.msk.f32.gmra.mrb[26].mxu0 %vm360_vm1, %v6001_v40 }
0x14ca   :  { %v4372_v57 = vpop.f32.mrb[24].mxu0 }
0x14cb   :  { %v2248_v53 = vmul.f32 0.35355338, %v4372_v57  ;;  %v2228_v54 = vpop.f32.mrb[25].mxu0 }
0x14cc   :  { %v2247_v23 = vmul.f32 0.35355338, %v2228_v54 }
0x14cd   :  { %v2252_v56 = vadd.f32 %v6028_v55, %v2248_v53 }
0x14ce   :  { %v2251_v61 = vadd.f32 %v6034_v58, %v2247_v23  ;;  %v4375_v62 = vpop.f32.mrb[26].mxu0 }
0x14cf   :  { %v2250_v1 = vmul.f32 0.35355338, %v4375_v62  ;;  %v2238_v0 = vpop.f32.mrb[27].mxu0  ;;  %v2258_v3 = vsel %vm162_vm0, %v2252_v56, -inf }
0x14d0   :  { %v2249_v2 = vmul.f32 0.35355338, %v2238_v0  ;;  %2259 = vmax.xlane.f32.xlu0 %v2258_v3  ;;  %v2255_v4 = vsel %vm162_vm0, %v2251_v61, -inf }
0x14d1   :  { %v2254_v7 = vadd.f32 %v6042_v5, %v2250_v1  ;;  %2256 = vmax.xlane.f32.xlu1 %v2255_v4 }
0x14d2   :  { %v2253_v12 = vadd.f32 %v6048_v9, %v2249_v2 }
0x14d3   :  { %v2264_v15 = vsel %vm162_vm0, %v2254_v7, -inf }
0x14d4   :  { %v2261_v16 = vsel %vm162_vm0, %v2253_v12, -inf }
0x14d5   :  { %2265 = vmax.xlane.f32.xlu1 %v2264_v15  ;;  %2262 = vmax.xlane.f32.xlu0 %v2261_v16 }
0x155d   :  { %v2260_v17 = vpop.xlane.xlu0 %2259 }
0x155e   :  { %v2268_v19 = vsub.f32 %v2252_v56, %v2260_v17  ;;  %v2257_v20 = vpop.xlane.xlu1 %2256 }
0x155f   :  { %v2267_v26 = vsub.f32 %v2251_v61, %v2257_v20 }
0x1560   :  { %v2273_v25 = vmul.f32 1.442695, %v2268_v19 }
0x1561   :  { %v2271_v28 = vmul.f32 1.442695, %v2267_v26 }
0x1562   :  { %5044 = vpow2.f32 %v2273_v25  ;;  %v2263_v30 = vpop.xlane.xlu0 %2262  ;;  %v2266_v31 = vpop.xlane.xlu1 %2265 }
0x1563   :  { %5046 = vpow2.f32 %v2271_v28  ;;  %v2269_v60 = vsub.f32 %v2253_v12, %v2263_v30  ;;  %v2270_v37 = vsub.f32 %v2254_v7, %v2266_v31 }
0x1565   :  { %v2275_v6 = vmul.f32 1.442695, %v2269_v60  ;;  %v2277_v48 = vmul.f32 1.442695, %v2270_v37 }
0x1567   :  { %5048 = vpow2.f32 %v2275_v6 }
0x1568   :  { %5050 = vpow2.f32 %v2277_v48 }
0x156c   :  { %v5045_v27 = vpop.eup %5044 }
0x156d   :  { %v5047_v29 = vpop.eup %5046  ;;  %v2282_v8 = vsel %vm162_vm0, %v5045_v27, 0.0 }
0x156e   :  { %2283 = vadd.xlane.f32.xlu1 %v2282_v8  ;;  %v2279_v59 = vsel %vm162_vm0, %v5047_v29, 0.0 }
0x156f   :  { %2280 = vadd.xlane.f32.xlu0 %v2279_v59 }
0x1571   :  { %v5049_v11 = vpop.eup %5048 }
0x1572   :  { %v2285_v34 = vsel %vm162_vm0, %v5049_v11, 0.0  ;;  %v5051_v47 = vpop.eup %5050 }
0x1573   :  { %v2288_v33 = vsel %vm162_vm0, %v5051_v47, 0.0 }
0x157f   :  { %4884 = vrot.lane.b32.xlu1 %v6007_v45, %s5328_s12 }
0x1583   :  { %4889 = vrot.lane.b32.xlu1 %v5997_v49, %s5329_s21 }
0x1585   :  { %4879 = vrot.lane.b32.xlu0 %v5997_v49, %s5328_s12 }
0x1587   :  { %4894 = vrot.lane.b32.xlu1 %v6007_v45, %s5329_s21 }
0x15a4   :  { %2286 = vadd.xlane.f32.xlu0 %v2285_v34 }
0x15ab   :  { %2289 = vadd.xlane.f32.xlu1 %v2288_v33 }
0x15ba   :  { %2408 = vrot.lane.b32.xlu0 %v5991_v14, %s5330_s22 }
0x15bc   :  { %2410 = vrot.lane.b32.xlu1 %v5989_v50, %s5330_s22 }
0x15be   :  { %2412 = vrot.lane.b32.xlu0 %v6003_v22, %s5330_s22 }
0x15c0   :  { %2414 = vrot.lane.b32.xlu1 %v6001_v40, %s5330_s22 }
0x15fb   :  { %v2284_v38 = vpop.xlane.xlu1 %2283 }
0x15fc   :  { %v2281_v39 = vpop.xlane.xlu0 %2280 }
0x15fd   :  { %5052 = vrcp.f32 %v2281_v39 }
0x15fe   :  { %5054 = vrcp.f32 %v2284_v38 }
0x15ff   :  { %v4885_v42 = vpop.permute.xlu1 %4884 }
0x1600   :  { %v4880_v41 = vpop.permute.xlu0 %4879  ;;  %v4887_v43 = vunpack.i.h.bf16 %v4885_v42  ;;  %v4886_v46 = vunpack.i.l.bf16 %v4885_v42 }
0x1601   :  { %v4882_v21 = vunpack.i.h.bf16 %v4880_v41  ;;  %v4881_v51 = vunpack.i.l.bf16 %v4880_v41 }
0x1602   :  { %v4668_v44 = vpack.c.bf16 %v4887_v43, %v4886_v46 }
0x1603   :  { %v4664_v52 = vpack.c.bf16 %v4882_v21, %v4881_v51  ;;  %v4890_v24 = vpop.permute.xlu1 %4889 }
0x1604   :  { %v4892_v10 = vunpack.i.h.bf16 %v4890_v24  ;;  %v4891_v63 = vunpack.i.l.bf16 %v4890_v24 }
0x1605   :  { %4665 = vmatprep.subr.bf16.mxu1 %v4664_v52 }
0x1606   :  { %4667 = vmatpush3.bf16.msra.mxu1 %v4664_v52  ;;  %v4672_v23 = vpack.c.bf16 %v4892_v10, %v4891_v63 }
0x1607   :  { %v5053_v57 = vpop.eup %5052  ;;  %4669 = vmatprep.subr.bf16.mxu1 %v4668_v44  ;;  %v4895_v61 = vpop.permute.xlu1 %4894 }
0x1608   :  { %v5055_v53 = vpop.eup %5054  ;;  %v2295_v54 = vmul.f32 %v5053_v57, %v5047_v29  ;;  %v4897_v62 = vunpack.i.h.bf16 %v4895_v61  ;;  %v4896_v1 = vunpack.i.l.bf16 %v4895_v61 }
0x1609   :  { %v2296_v56 = vmul.f32 %v5055_v53, %v5045_v27 }
0x160a   :  { %4671 = vmatpush3.bf16.msra.mxu1 %v4668_v44  ;;  %4384 = vmatprep.mubr.msk.f32.mxu1 %vm162_vm0, %v2295_v54  ;;  %v4678_v0 = vpack.c.bf16 %v4897_v62, %v4896_v1 }
0x160b   :  { %4674 = vmatprep.subr.msk.bf16.mxu1 %vm5615_vm2, %v4672_v23 }
0x160d   :  { %4385 = vmatmul.mubr.msk.f32.vlgmr.msra.gmra.mrb[28].mxu1 %vm162_vm0, %v2296_v56 }
0x1613   :  { %4677 = vmatpush3.bf16.xpose.msk.msra.mxu1 %vm5615_vm2, %v4672_v23 }
0x1614   :  { %4680 = vmatprep.subr.msk.bf16.mxu1 %vm5615_vm2, %v4678_v0 }
0x161b   :  { %4683 = vmatpush3.bf16.xpose.msk.msra.mxu1 %vm5615_vm2, %v4678_v0 }
0x1631   :  { %v2287_v3 = vpop.xlane.xlu0 %2286 }
0x1632   :  { %5056 = vrcp.f32 %v2287_v3 }
0x1635   :  { %v2409_v15 = vpop.permute.xlu0 %2408 }
0x1638   :  { %v2290_v2 = vpop.xlane.xlu1 %2289 }
0x1639   :  { %5058 = vrcp.f32 %v2290_v2  ;;  %v2413_v19 = vpop.permute.xlu0 %2412 }
0x163c   :  { %v5057_v4 = vpop.eup %5056  ;;  %v2411_v17 = vpop.permute.xlu1 %2410 }
0x163d   :  { %v2297_v7 = vmul.f32 %v5057_v4, %v5049_v11 }
0x163f   :  { %4387 = vmatprep.mubr.msk.f32.mxu1 %vm162_vm0, %v2297_v7 }
0x1640   :  { %v2415_v20 = vpop.permute.xlu1 %2414 }
0x1643   :  { %v5059_v12 = vpop.eup %5058 }
0x1644   :  { %v2298_v16 = vmul.f32 %v5059_v12, %v5051_v47 }
0x1646   :  { %4388 = vmatmul.mubr.msk.f32.gmra.mrb[30].mxu1 %vm162_vm0, %v2298_v16 }
0x1647   :  { %4398 = vmatprep.mubr.msk.f32.mxu1 %vm360_vm1, %v2409_v15 }
0x164a   :  { %4399 = vmatmul.mubr.msk.f32.vlgmr.msra.gmra.mrb[32].mxu1 %vm360_vm1, %v2411_v17 }
0x164b   :  { %4401 = vmatprep.mubr.msk.f32.mxu1 %vm360_vm1, %v2413_v19 }
0x164e   :  { %4402 = vmatmul.mubr.msk.f32.gmra.mrb[34].mxu1 %vm360_vm1, %v2415_v20 }
0x16e0   :  { %v6089_v26 = vpop.f32.mrb[28].mxu1 }
0x16e1   :  { %v6091_v25 = vpop.f32.mrb[29].mxu1 }
0x1719   :  { %v6093_v28 = vpop.f32.mrb[30].mxu1 }
0x171a   :  { %v6095_v27 = vpop.f32.mrb[31].mxu1 }
0x171d   :  { %v4400_v29 = vpop.f32.mrb[32].mxu1 }
0x171e   :  { %v2526_v8 = vmul.f32 0.35355338, %v4400_v29  ;;  %v2506_v59 = vpop.f32.mrb[33].mxu1 }
0x171f   :  { %v2525_v30 = vmul.f32 0.35355338, %v2506_v59 }
0x1720   :  { %v2530_v60 = vadd.f32 %v6028_v55, %v2526_v8 }
0x1721   :  { %v2529_v31 = vadd.f32 %v6034_v58, %v2525_v30  ;;  %v4403_v6 = vpop.f32.mrb[34].mxu1 }
0x1722   :  { %v2516_v37 = vpop.f32.mrb[35].mxu1  ;;  %v2536_v48 = vsel %vm162_vm0, %v2530_v60, -inf  ;;  %v2528_v11 = vmul.f32 0.35355338, %v4403_v6 }
0x1723   :  { %v2527_v34 = vmul.f32 0.35355338, %v2516_v37  ;;  %2537 = vmax.xlane.f32.xlu1 %v2536_v48  ;;  %v2533_v47 = vsel %vm162_vm0, %v2529_v31, -inf }
0x1724   :  { %2534 = vmax.xlane.f32.xlu0 %v2533_v47  ;;  %v2532_v38 = vadd.f32 %v6042_v5, %v2528_v11 }
0x1725   :  { %v2531_v33 = vadd.f32 %v6048_v9, %v2527_v34 }
0x1726   :  { %v2542_v42 = vsel %vm162_vm0, %v2532_v38, -inf }
0x1727   :  { %v2539_v39 = vsel %vm162_vm0, %v2531_v33, -inf }
0x1728   :  { %2540 = vmax.xlane.f32.xlu0 %v2539_v39 }
0x172c   :  { %2543 = vmax.xlane.f32.xlu0 %v2542_v42 }
0x17b0   :  { %v2538_v41 = vpop.xlane.xlu1 %2537 }
0x17b1   :  { %v2546_v43 = vsub.f32 %v2530_v60, %v2538_v41  ;;  %v2535_v46 = vpop.xlane.xlu0 %2534 }
0x17b2   :  { %v2545_v21 = vsub.f32 %v2529_v31, %v2535_v46 }
0x17b3   :  { %v2551_v51 = vmul.f32 1.442695, %v2546_v43 }
0x17b4   :  { %v2549_v52 = vmul.f32 1.442695, %v2545_v21 }
0x17b5   :  { %5060 = vpow2.f32 %v2551_v51  ;;  %v2541_v57 = vpop.xlane.xlu0 %2540 }
0x17b6   :  { %5062 = vpow2.f32 %v2549_v52  ;;  %v2547_v53 = vsub.f32 %v2531_v33, %v2541_v57 }
0x17b8   :  { %v2553_v54 = vmul.f32 1.442695, %v2547_v53 }
0x17b9   :  { %v2544_v23 = vpop.xlane.xlu0 %2543 }
0x17ba   :  { %v2548_v56 = vsub.f32 %v2532_v38, %v2544_v23  ;;  %5064 = vpow2.f32 %v2553_v54 }
0x17bc   :  { %v2555_v61 = vmul.f32 1.442695, %v2548_v56 }
0x17be   :  { %5066 = vpow2.f32 %v2555_v61 }
0x17bf   :  { %v5061_v24 = vpop.eup %5060 }
0x17c0   :  { %v5063_v44 = vpop.eup %5062  ;;  %v2560_v10 = vsel %vm162_vm0, %v5061_v24, 0.0 }
0x17c1   :  { %2561 = vadd.xlane.f32.xlu1 %v2560_v10  ;;  %v2557_v63 = vsel %vm162_vm0, %v5063_v44, 0.0 }
0x17c2   :  { %2558 = vadd.xlane.f32.xlu0 %v2557_v63 }
0x17c4   :  { %v5065_v62 = vpop.eup %5064 }
0x17c5   :  { %v2563_v1 = vsel %vm162_vm0, %v5065_v62, 0.0 }
0x17c8   :  { %v5067_v0 = vpop.eup %5066 }
0x17c9   :  { %v2566_v3 = vsel %vm162_vm0, %v5067_v0, 0.0 }
0x17d2   :  { %4904 = vrot.lane.b32.xlu1 %v6007_v45, %s5331_s17 }
0x17d6   :  { %4909 = vrot.lane.b32.xlu1 %v5997_v49, %s5332_s23 }
0x17d8   :  { %4899 = vrot.lane.b32.xlu0 %v5997_v49, %s5331_s17 }
0x17da   :  { %4914 = vrot.lane.b32.xlu1 %v6007_v45, %s5332_s23 }
0x17f7   :  { %2564 = vadd.xlane.f32.xlu0 %v2563_v1 }
0x17fe   :  { %2567 = vadd.xlane.f32.xlu1 %v2566_v3 }
0x180d   :  { %2686 = vrot.lane.b32.xlu0 %v5991_v14, %s5333_s4 }
0x180f   :  { %2688 = vrot.lane.b32.xlu1 %v5989_v50, %s5333_s4 }
0x1811   :  { %2690 = vrot.lane.b32.xlu0 %v6003_v22, %s5333_s4 }
0x1813   :  { %2692 = vrot.lane.b32.xlu1 %v6001_v40, %s5333_s4 }
0x184e   :  { %v2562_v2 = vpop.xlane.xlu1 %2561 }
0x184f   :  { %v2559_v4 = vpop.xlane.xlu0 %2558 }
0x1850   :  { %5068 = vrcp.f32 %v2559_v4 }
0x1851   :  { %5070 = vrcp.f32 %v2562_v2 }
0x1852   :  { %v4905_v7 = vpop.permute.xlu1 %4904 }
0x1853   :  { %v4900_v12 = vpop.permute.xlu0 %4899  ;;  %v4907_v15 = vunpack.i.h.bf16 %v4905_v7  ;;  %v4906_v16 = vunpack.i.l.bf16 %v4905_v7 }
0x1854   :  { %v4902_v17 = vunpack.i.h.bf16 %v4900_v12  ;;  %v4901_v19 = vunpack.i.l.bf16 %v4900_v12 }
0x1855   :  { %v4688_v8 = vpack.c.bf16 %v4907_v15, %v4906_v16 }
0x1856   :  { %v4684_v20 = vpack.c.bf16 %v4902_v17, %v4901_v19  ;;  %v4910_v29 = vpop.permute.xlu1 %4909 }
0x1857   :  { %v4912_v59 = vunpack.i.h.bf16 %v4910_v29  ;;  %v4911_v30 = vunpack.i.l.bf16 %v4910_v29 }
0x1858   :  { %4685 = vmatprep.subr.bf16.mxu0 %v4684_v20 }
0x1859   :  { %4687 = vmatpush3.bf16.msra.mxu0 %v4684_v20  ;;  %v4692_v37 = vpack.c.bf16 %v4912_v59, %v4911_v30 }
0x185a   :  { %v5069_v60 = vpop.eup %5068  ;;  %4689 = vmatprep.subr.bf16.mxu0 %v4688_v8  ;;  %v4915_v11 = vpop.permute.xlu1 %4914 }
0x185b   :  { %v5071_v31 = vpop.eup %5070  ;;  %v2573_v6 = vmul.f32 %v5069_v60, %v5063_v44  ;;  %v4917_v34 = vunpack.i.h.bf16 %v4915_v11  ;;  %v4916_v47 = vunpack.i.l.bf16 %v4915_v11 }
0x185c   :  { %v2574_v48 = vmul.f32 %v5071_v31, %v5061_v24 }
0x185d   :  { %4691 = vmatpush3.bf16.msra.mxu0 %v4688_v8  ;;  %4412 = vmatprep.mubr.msk.f32.mxu0 %vm162_vm0, %v2573_v6  ;;  %v4698_v33 = vpack.c.bf16 %v4917_v34, %v4916_v47 }
0x185e   :  { %4694 = vmatprep.subr.msk.bf16.mxu0 %vm5615_vm2, %v4692_v37 }
0x1860   :  { %4413 = vmatmul.mubr.msk.f32.vlgmr.msra.gmra.mrb[28].mxu0 %vm162_vm0, %v2574_v48 }
0x1866   :  { %4697 = vmatpush3.bf16.xpose.msk.msra.mxu0 %vm5615_vm2, %v4692_v37 }
0x1867   :  { %4700 = vmatprep.subr.msk.bf16.mxu0 %vm5615_vm2, %v4698_v33 }
0x186e   :  { %4703 = vmatpush3.bf16.xpose.msk.msra.mxu0 %vm5615_vm2, %v4698_v33 }
0x1884   :  { %v2565_v38 = vpop.xlane.xlu0 %2564 }
0x1885   :  { %5072 = vrcp.f32 %v2565_v38 }
0x1888   :  { %v2687_v46 = vpop.permute.xlu0 %2686 }
0x188b   :  { %v2568_v39 = vpop.xlane.xlu1 %2567 }
0x188c   :  { %5074 = vrcp.f32 %v2568_v39  ;;  %v2691_v52 = vpop.permute.xlu0 %2690 }
0x188f   :  { %v5073_v42 = vpop.eup %5072  ;;  %v2689_v51 = vpop.permute.xlu1 %2688 }
0x1890   :  { %v2575_v41 = vmul.f32 %v5073_v42, %v5065_v62 }
0x1892   :  { %4415 = vmatprep.mubr.msk.f32.mxu0 %vm162_vm0, %v2575_v41 }
0x1893   :  { %v2693_v24 = vpop.permute.xlu1 %2692 }
0x1896   :  { %v5075_v43 = vpop.eup %5074 }
0x1897   :  { %v2576_v21 = vmul.f32 %v5075_v43, %v5067_v0 }
0x1899   :  { %4416 = vmatmul.mubr.msk.f32.gmra.mrb[30].mxu0 %vm162_vm0, %v2576_v21 }
0x189a   :  { %4426 = vmatprep.mubr.msk.f32.mxu0 %vm360_vm1, %v2687_v46 }
0x189d   :  { %4427 = vmatmul.mubr.msk.f32.vlgmr.msra.gmra.mrb[32].mxu0 %vm360_vm1, %v2689_v51 }
0x189e   :  { %4429 = vmatprep.mubr.msk.f32.mxu0 %vm360_vm1, %v2691_v52 }
0x18a1   :  { %4430 = vmatmul.mubr.msk.f32.gmra.mrb[34].mxu0 %vm360_vm1, %v2693_v24 }
0x1933   :  { %v6141_v44 = vpop.f32.mrb[28].mxu0 }
0x1934   :  { %v6143_v10 = vpop.f32.mrb[29].mxu0 }
0x196c   :  { %v6145_v63 = vpop.f32.mrb[30].mxu0 }
0x196d   :  { %v6147_v57 = vpop.f32.mrb[31].mxu0 }
0x1970   :  { %v4428_v53 = vpop.f32.mrb[32].mxu0 }
0x1971   :  { %v2804_v54 = vmul.f32 0.35355338, %v4428_v53  ;;  %v2784_v23 = vpop.f32.mrb[33].mxu0 }
0x1972   :  { %v2803_v56 = vmul.f32 0.35355338, %v2784_v23 }
0x1973   :  { %v2808_v61 = vadd.f32 %v6028_v55, %v2804_v54 }
0x1974   :  { %v2807_v62 = vadd.f32 %v6034_v58, %v2803_v56  ;;  %v4431_v1 = vpop.f32.mrb[34].mxu0 }
0x1975   :  { %v2794_v0 = vpop.f32.mrb[35].mxu0  ;;  %v2814_v3 = vsel %vm162_vm0, %v2808_v61, -inf  ;;  %v2806_v2 = vmul.f32 0.35355338, %v4431_v1 }
0x1976   :  { %v2805_v4 = vmul.f32 0.35355338, %v2794_v0  ;;  %2815 = vmax.xlane.f32.xlu1 %v2814_v3  ;;  %v2811_v7 = vsel %vm162_vm0, %v2807_v62, -inf }
0x1977   :  { %2812 = vmax.xlane.f32.xlu0 %v2811_v7  ;;  %v2810_v15 = vadd.f32 %v6042_v5, %v2806_v2 }
0x1978   :  { %v2809_v12 = vadd.f32 %v6048_v9, %v2805_v4 }
0x1979   :  { %v2820_v17 = vsel %vm162_vm0, %v2810_v15, -inf }
0x197a   :  { %v2817_v16 = vsel %vm162_vm0, %v2809_v12, -inf }
0x197b   :  { %2818 = vmax.xlane.f32.xlu0 %v2817_v16 }
0x197f   :  { %2821 = vmax.xlane.f32.xlu0 %v2820_v17 }
0x1a03   :  { %v2816_v19 = vpop.xlane.xlu1 %2815 }
0x1a04   :  { %v2824_v20 = vsub.f32 %v2808_v61, %v2816_v19  ;;  %v2813_v29 = vpop.xlane.xlu0 %2812 }
0x1a05   :  { %v2823_v8 = vsub.f32 %v2807_v62, %v2813_v29 }
0x1a06   :  { %v2829_v59 = vmul.f32 1.442695, %v2824_v20 }
0x1a07   :  { %v2827_v30 = vmul.f32 1.442695, %v2823_v8 }
0x1a08   :  { %5076 = vpow2.f32 %v2829_v59  ;;  %v2819_v48 = vpop.xlane.xlu0 %2818 }
0x1a09   :  { %5078 = vpow2.f32 %v2827_v30  ;;  %v2825_v11 = vsub.f32 %v2809_v12, %v2819_v48 }
0x1a0b   :  { %v2831_v34 = vmul.f32 1.442695, %v2825_v11 }
0x1a0c   :  { %v2822_v47 = vpop.xlane.xlu0 %2821 }
0x1a0d   :  { %v2826_v33 = vsub.f32 %v2810_v15, %v2822_v47  ;;  %5080 = vpow2.f32 %v2831_v34 }
0x1a0f   :  { %v2833_v38 = vmul.f32 1.442695, %v2826_v33 }
0x1a11   :  { %5082 = vpow2.f32 %v2833_v38 }
0x1a12   :  { %v5077_v60 = vpop.eup %5076 }
0x1a13   :  { %v5079_v31 = vpop.eup %5078  ;;  %v2838_v6 = vsel %vm162_vm0, %v5077_v60, 0.0 }
0x1a14   :  { %2839 = vadd.xlane.f32.xlu1 %v2838_v6  ;;  %v2835_v37 = vsel %vm162_vm0, %v5079_v31, 0.0 }
0x1a15   :  { %2836 = vadd.xlane.f32.xlu0 %v2835_v37 }
0x1a17   :  { %v5081_v39 = vpop.eup %5080 }
0x1a18   :  { %v2841_v42 = vsel %vm162_vm0, %v5081_v39, 0.0 }
0x1a1b   :  { %v5083_v41 = vpop.eup %5082 }
0x1a1c   :  { %v2844_v43 = vsel %vm162_vm0, %v5083_v41, 0.0 }
0x1a25   :  { %4924 = vrot.lane.b32.xlu1 %v6007_v45, %s5334_s19 }
0x1a29   :  { %4929 = vrot.lane.b32.xlu1 %v5997_v49, %s5335_s26 }
0x1a2b   :  { %4919 = vrot.lane.b32.xlu0 %v5997_v49, %s5334_s19 }
0x1a2d   :  { %4934 = vrot.lane.b32.xlu1 %v6007_v45, %s5335_s26 }
0x1a4a   :  { %2842 = vadd.xlane.f32.xlu0 %v2841_v42 }
0x1a51   :  { %2845 = vadd.xlane.f32.xlu1 %v2844_v43 }
0x1a60   :  { %2964 = vrot.lane.b32.xlu0 %v5991_v14, %s5336_s29 }
0x1a62   :  { %2966 = vrot.lane.b32.xlu1 %v5989_v50, %s5336_s29 }
0x1a64   :  { %2968 = vrot.lane.b32.xlu0 %v6003_v22, %s5336_s29 }
0x1a66   :  { %2970 = vrot.lane.b32.xlu1 %v6001_v40, %s5336_s29 }
0x1aa1   :  { %v2840_v46 = vpop.xlane.xlu1 %2839 }
0x1aa2   :  { %v2837_v21 = vpop.xlane.xlu0 %2836 }
0x1aa3   :  { %5084 = vrcp.f32 %v2837_v21 }
0x1aa4   :  { %5086 = vrcp.f32 %v2840_v46 }
0x1aa5   :  { %v4925_v51 = vpop.permute.xlu1 %4924 }
0x1aa6   :  { %v4920_v52 = vpop.permute.xlu0 %4919  ;;  %v4927_v24 = vunpack.i.h.bf16 %v4925_v51  ;;  %v4926_v53 = vunpack.i.l.bf16 %v4925_v51 }
0x1aa7   :  { %v4922_v54 = vunpack.i.h.bf16 %v4920_v52  ;;  %v4921_v23 = vunpack.i.l.bf16 %v4920_v52 }
0x1aa8   :  { %v4708_v61 = vpack.c.bf16 %v4927_v24, %v4926_v53 }
0x1aa9   :  { %v4704_v14 = vpack.c.bf16 %v4922_v54, %v4921_v23  ;;  %v4930_v56 = vpop.permute.xlu1 %4929 }
0x1aaa   :  { %v4932_v50 = vunpack.i.h.bf16 %v4930_v56  ;;  %v4931_v62 = vunpack.i.l.bf16 %v4930_v56 }
0x1aab   :  { %4705 = vmatprep.subr.bf16.mxu1 %v4704_v14 }
0x1aac   :  { %4707 = vmatpush3.bf16.msra.mxu1 %v4704_v14  ;;  %v4712_v0 = vpack.c.bf16 %v4932_v50, %v4931_v62 }
0x1aad   :  { %v5085_v22 = vpop.eup %5084  ;;  %4709 = vmatprep.subr.bf16.mxu1 %v4708_v61  ;;  %v4935_v2 = vpop.permute.xlu1 %4934 }
0x1aae   :  { %v5087_v40 = vpop.eup %5086  ;;  %v2851_v1 = vmul.f32 %v5085_v22, %v5079_v31  ;;  %v4937_v4 = vunpack.i.h.bf16 %v4935_v2  ;;  %v4936_v7 = vunpack.i.l.bf16 %v4935_v2 }
0x1aaf   :  { %v2852_v3 = vmul.f32 %v5087_v40, %v5077_v60 }
0x1ab0   :  { %4711 = vmatpush3.bf16.msra.mxu1 %v4708_v61  ;;  %4440 = vmatprep.mubr.msk.f32.mxu1 %vm162_vm0, %v2851_v1  ;;  %v4718_v12 = vpack.c.bf16 %v4937_v4, %v4936_v7 }
0x1ab1   :  { %4714 = vmatprep.subr.msk.bf16.mxu1 %vm5615_vm2, %v4712_v0 }
0x1ab3   :  { %4441 = vmatmul.mubr.msk.f32.vlgmr.msra.gmra.mrb[36].mxu1 %vm162_vm0, %v2852_v3 }
0x1ab9   :  { %4717 = vmatpush3.bf16.xpose.msk.msra.mxu1 %vm5615_vm2, %v4712_v0 }
0x1aba   :  { %4720 = vmatprep.subr.msk.bf16.mxu1 %vm5615_vm2, %v4718_v12 }
0x1ac1   :  { %4723 = vmatpush3.bf16.xpose.msk.msra.mxu1 %vm5615_vm2, %v4718_v12 }
0x1ad7   :  { %v2843_v15 = vpop.xlane.xlu0 %2842 }
0x1ad8   :  { %5088 = vrcp.f32 %v2843_v15 }
0x1adb   :  { %v2965_v29 = vpop.permute.xlu0 %2964 }
0x1ade   :  { %v2846_v16 = vpop.xlane.xlu1 %2845 }
0x1adf   :  { %5090 = vrcp.f32 %v2846_v16  ;;  %v2969_v30 = vpop.permute.xlu0 %2968 }
0x1ae2   :  { %v5089_v17 = vpop.eup %5088  ;;  %v2967_v59 = vpop.permute.xlu1 %2966 }
0x1ae3   :  { %v2853_v19 = vmul.f32 %v5089_v17, %v5081_v39 }
0x1ae5   :  { %4443 = vmatprep.mubr.msk.f32.mxu1 %vm162_vm0, %v2853_v19 }
0x1ae6   :  { %v2971_v18 = vpop.permute.xlu1 %2970 }
0x1ae9   :  { %v5091_v20 = vpop.eup %5090 }
0x1aea   :  { %v2854_v8 = vmul.f32 %v5091_v20, %v5083_v41 }
0x1aec   :  { %4444 = vmatmul.mubr.msk.f32.gmra.mrb[38].mxu1 %vm162_vm0, %v2854_v8 }
0x1aed   :  { %4454 = vmatprep.mubr.msk.f32.mxu1 %vm360_vm1, %v2965_v29 }
0x1af0   :  { %4455 = vmatmul.mubr.msk.f32.vlgmr.msra.gmra.mrb[40].mxu1 %vm360_vm1, %v2967_v59 }
0x1af1   :  { %4457 = vmatprep.mubr.msk.f32.mxu1 %vm360_vm1, %v2969_v30 }
0x1af4   :  { %4458 = vmatmul.mubr.msk.f32.gmra.mrb[42].mxu1 %vm360_vm1, %v2971_v18 }
0x1b86   :  { %v4442_v60 = vpop.f32.mrb[36].mxu1 }
0x1b87   :  { %v2945_v31 = vpop.f32.mrb[37].mxu1 }
0x1bbf   :  { %v4445_v6 = vpop.f32.mrb[38].mxu1 }
0x1bc0   :  { %v2955_v37 = vpop.f32.mrb[39].mxu1 }
0x1bc3   :  { %v4456_v48 = vpop.f32.mrb[40].mxu1 }
0x1bc4   :  { %v3082_v11 = vmul.f32 0.35355338, %v4456_v48  ;;  %v3062_v34 = vpop.f32.mrb[41].mxu1  ;;  %v3935_v48 = vld [vmem:[%s6357_s7 + $0x20] sm:$0xff] }
0x1bc5   :  { %v3081_v47 = vmul.f32 0.35355338, %v3062_v34  ;;  %v3937_v34 = vld [vmem:[%s6357_s7 + $0x30] sm:$0xff] }
0x1bc6   :  { %v3086_v33 = vadd.f32 %v6028_v55, %v3082_v11  ;;  %v3936_v11 = vld [vmem:[%s6357_s7 + $0x28] sm:$0xff] }
0x1bc7   :  { %v3085_v38 = vadd.f32 %v6034_v58, %v3081_v47  ;;  %v4459_v39 = vpop.f32.mrb[42].mxu1  ;;  %v4732_v47 = vpack.c.bf16 %v3936_v11, %v3935_v48 }
0x1bc8   :  { %v3072_v42 = vpop.f32.mrb[43].mxu1  ;;  %v3092_v41 = vsel %vm162_vm0, %v3086_v33, -inf  ;;  %v3084_v43 = vmul.f32 0.35355338, %v4459_v39 }
0x1bc9   :  { %v3083_v46 = vmul.f32 0.35355338, %v3072_v42  ;;  %3093 = vmax.xlane.f32.xlu1 %v3092_v41  ;;  %v3089_v21 = vsel %vm162_vm0, %v3085_v38, -inf }
0x1bca   :  { %3090 = vmax.xlane.f32.xlu0 %v3089_v21  ;;  %v3088_v52 = vadd.f32 %v6042_v5, %v3084_v43 }
0x1bcb   :  { %v3087_v51 = vadd.f32 %v6048_v9, %v3083_v46 }
0x1bcc   :  { %v3098_v55 = vsel %vm162_vm0, %v3088_v52, -inf }
0x1bcd   :  { %v3095_v24 = vsel %vm162_vm0, %v3087_v51, -inf }
0x1bce   :  { %3096 = vmax.xlane.f32.xlu0 %v3095_v24 }
0x1bd2   :  { %3099 = vmax.xlane.f32.xlu0 %v3098_v55 }
0x1c56   :  { %v3094_v58 = vpop.xlane.xlu1 %3093 }
0x1c57   :  { %v3102_v53 = vsub.f32 %v3086_v33, %v3094_v58  ;;  %v3091_v54 = vpop.xlane.xlu0 %3090  ;;  %v3938_v33 = vld [vmem:[%s6357_s7 + $0x38] sm:$0xff]  ;;  %s5340_s7 = smov [#allocation14]  }
0x1c58   :  { %v3101_v23 = vsub.f32 %v3085_v38, %v3091_v54  ;;  %v4736_v38 = vpack.c.bf16 %v3938_v33, %v3937_v34  ;;  %s3789_s19 = sshll.u32 %s5340_s7, 4  ;;  %s3790_s19 = int_to_ptr.vmem [resolvable:$true] %s3789_s19 }
0x1c59   :  { %v3107_v14 = vmul.f32 1.442695, %v3102_v53  ;;  %s5286_s26 = scalar_lea.vmem %s3790_s19, 256  ;;  %p5291_p1 = scmp.lt.s32.totalorder %s3790_s19, %s3790_s19 }
0x1c5a   :  { %v3105_v56 = vmul.f32 1.442695, %v3101_v23  ;;  %p5287_p0 = scmp.ne.s32.totalorder %s3790_s19, %s5286_s26  ;;  %p5292_p2 = scmp.lt.s32.totalorder %s5286_s26, %s5286_s26 }
0x1c5b   :  { %5092 = vpow2.f32 %v3107_v14  ;;  %v3097_v61 = vpop.xlane.xlu0 %3096 }
0x1c5c   :  { %5094 = vpow2.f32 %v3105_v56  ;;  %v3103_v50 = vsub.f32 %v3087_v51, %v3097_v61  ;;  %p5293_p3 = por %p5292_p2, %p5291_p1 }
0x1c5e   :  { %v3109_v62 = vmul.f32 1.442695, %v3103_v50  ;;  %p5294_p4 = pnand %p5293_p3, %p5287_p0 }
0x1c5f   :  { %v3100_v9 = vpop.xlane.xlu0 %3099 }
0x1c60   :  { %5096 = vpow2.f32 %v3109_v62  ;;  %v3104_v5 = vsub.f32 %v3088_v52, %v3100_v9 }
0x1c62   :  { %v3111_v22 = vmul.f32 1.442695, %v3104_v5 }
0x1c64   :  { %5098 = vpow2.f32 %v3111_v22 }
0x1c65   :  { %v5093_v40 = vpop.eup %5092 }
0x1c66   :  { %v5095_v1 = vpop.eup %5094  ;;  %v3116_v0 = vsel %vm162_vm0, %v5093_v40, 0.0 }
0x1c67   :  { %3117 = vadd.xlane.f32.xlu1 %v3116_v0  ;;  %v3113_v3 = vsel %vm162_vm0, %v5095_v1, 0.0 }
0x1c68   :  { %3114 = vadd.xlane.f32.xlu0 %v3113_v3 }
0x1c6a   :  { %v5097_v2 = vpop.eup %5096 }
0x1c6b   :  { %v3119_v4 = vsel %vm162_vm0, %v5097_v2, 0.0 }
0x1c6c   :  { %3120 = vadd.xlane.f32.xlu0 %v3119_v4 }
0x1c6e   :  { %v5099_v7 = vpop.eup %5098 }
0x1c6f   :  { %v3122_v12 = vsel %vm162_vm0, %v5099_v7, 0.0 }
0x1c70   :  { %3123 = vadd.xlane.f32.xlu1 %v3122_v12 }
0x1c81   :  { %4944 = vrot.lane.b32.xlu1 %v6007_v45, %s5337_s27 }
0x1c82   :  { %4939 = vrot.lane.b32.xlu0 %v5997_v49, %s5337_s27 }
0x1c85   :  { %3246 = vrot.lane.b32.xlu1 %v6143_v10, %s5338_s10 }
0x1c86   :  { %3262 = vrot.lane.b32.xlu0 %v2945_v31, %s5319_s1 }
0x1c89   :  { %3248 = vrot.lane.b32.xlu1 %v6141_v44, %s5338_s10 }
0x1c8a   :  { %3250 = vrot.lane.b32.xlu0 %v6147_v57, %s5338_s10 }
0x1c8d   :  { %3264 = vrot.lane.b32.xlu1 %v4442_v60, %s5319_s1 }
0x1c8e   :  { %3266 = vrot.lane.b32.xlu0 %v2955_v37, %s5319_s1 }
0x1c91   :  { %3252 = vrot.lane.b32.xlu1 %v6145_v63, %s5338_s10 }
0x1c95   :  { %3268 = vrot.lane.b32.xlu1 %v4445_v6, %s5319_s1 }
0x1cf4   :  { %v3118_v45 = vpop.xlane.xlu1 %3117 }
0x1cf5   :  { %v3115_v49 = vpop.xlane.xlu0 %3114 }
0x1cf6   :  { %5100 = vrcp.f32 %v3115_v49 }
0x1cf7   :  { %5102 = vrcp.f32 %v3118_v45 }
0x1cf9   :  { %v3121_v10 = vpop.xlane.xlu0 %3120 }
0x1cfa   :  { %5104 = vrcp.f32 %v3121_v10 }
0x1cfd   :  { %v3124_v15 = vpop.xlane.xlu1 %3123  ;;  %v4940_v44 = vpop.permute.xlu0 %4939 }
0x1cfe   :  { %v4942_v16 = vunpack.i.h.bf16 %v4940_v44  ;;  %v4941_v17 = vunpack.i.l.bf16 %v4940_v44  ;;  %5106 = vrcp.f32 %v3124_v15 }
0x1d00   :  { %v5101_v57 = vpop.eup %5100  ;;  %v4724_v19 = vpack.c.bf16 %v4942_v16, %v4941_v17 }
0x1d01   :  { %v4945_v20 = vpop.permute.xlu1 %4944  ;;  %v3129_v29 = vmul.f32 %v5101_v57, %v5095_v1  ;;  %v5103_v30 = vpop.eup %5102 }
0x1d02   :  { %v4947_v8 = vunpack.i.h.bf16 %v4945_v20  ;;  %v4946_v59 = vunpack.i.l.bf16 %v4945_v20  ;;  %4725 = vmatprep.subr.bf16.mxu0 %v4724_v19  ;;  %v3130_v60 = vmul.f32 %v5103_v30, %v5093_v40  ;;  %v3263_v52 = vpop.permute.xlu0 %3262 }
0x1d03   :  { %4727 = vmatpush3.bf16.msra.mxu0 %v4724_v19  ;;  %4468 = vmatprep.mubr.msk.f32.mxu0 %vm162_vm0, %v3129_v29 }
0x1d04   :  { %v4728_v63 = vpack.c.bf16 %v4947_v8, %v4946_v59  ;;  %v5105_v18 = vpop.eup %5104 }
0x1d05   :  { %v3131_v6 = vmul.f32 %v5105_v18, %v5097_v2  ;;  %v3247_v46 = vpop.permute.xlu1 %3246 }
0x1d06   :  { %4729 = vmatprep.subr.bf16.mxu0 %v4728_v63  ;;  %v3251_v55 = vpop.permute.xlu0 %3250  ;;  %v3290_v54 = vsel %vm360_vm1, %v6091_v25, %v3247_v46  ;;  %v3948_v46 = vld [vmem:[%s6361_s11 + $0x30] sm:$0xff] }
0x1d07   :  { %4731 = vmatpush3.bf16.msra.mxu0 %v4728_v63  ;;  %v3294_v56 = vsel %vm1509_vm3, %v3290_v54, %v3263_v52  ;;  %v3292_v5 = vsel %vm360_vm1, %v6095_v27, %v3251_v55  ;;  %v3939_v27 = vld [vmem:[#allocation7 + $0x1] ss:$0 sm:$0xff] }
0x1d08   :  { %v5107_v31 = vpop.eup %5106  ;;  %4733 = vmatprep.subr.bf16.mxu0 %v4732_v47 }
0x1d09   :  { %v3132_v37 = vmul.f32 %v5107_v31, %v5099_v7  ;;  %v3249_v21 = vpop.permute.xlu1 %3248 }
0x1d0a   :  { %4469 = vmatmul.mubr.msk.f32.vlgmr.msra.gmra.mrb[36].mxu0 %vm162_vm0, %v3130_v60  ;;  %v3267_v53 = vpop.permute.xlu0 %3266  ;;  %v3291_v14 = vsel %vm360_vm1, %v6089_v26, %v3249_v21  ;;  %v3949_v21 = vld [vmem:[%s6361_s11 + $0x38] sm:$0xff] }
0x1d0b   :  { %4471 = vmatprep.mubr.msk.f32.mxu0 %vm162_vm0, %v3131_v6  ;;  %4735 = vmatpush3.bf16.msra.mxu0 %v4732_v47  ;;  %v3296_v22 = vsel %vm1509_vm3, %v3292_v5, %v3267_v53  ;;  %v3944_v5 = vld [vmem:[#allocation8 + $0x1] ss:$0 sm:$0xff] }
0x1d0c   :  { %4737 = vmatprep.subr.bf16.mxu0 %v4736_v38 }
0x1d0d   :  { %v3265_v51 = vpop.permute.xlu1 %3264 }
0x1d0e   :  { %4472 = vmatmul.mubr.msk.f32.gmra.mrb[38].mxu0 %vm162_vm0, %v3132_v37  ;;  %v3295_v50 = vsel %vm1509_vm3, %v3291_v14, %v3265_v51  ;;  %v4744_v51 = vpack.c.bf16 %v3949_v21, %v3948_v46 }
0x1d0f   :  { %4739 = vmatpush3.bf16.msra.mxu0 %v4736_v38 }
0x1d11   :  { %v3253_v24 = vpop.permute.xlu1 %3252 }
0x1d12   :  { %v3293_v26 = vsel %vm360_vm1, %v6093_v28, %v3253_v24 }
0x1d15   :  { %v3269_v58 = vpop.permute.xlu1 %3268 }
0x1d16   :  { %v3297_v1 = vsel %vm1509_vm3, %v3293_v26, %v3269_v58 }
0x1ddd   :  { %v4470_v39 = vpop.f32.mrb[36].mxu0 }
0x1dde   :  { %3280 = vrot.lane.b32.xlu1 %v4470_v39, %s5339_s25  ;;  %v3223_v42 = vpop.f32.mrb[37].mxu0 }
0x1ddf   :  { %3278 = vrot.lane.b32.xlu0 %v3223_v42, %s5339_s25  ;;  %v3946_v42 = vld [vmem:[%s6361_s11 + $0x20] sm:$0xff] }
0x1de1   :  { %v4473_v41 = vpop.f32.mrb[38].mxu0 }
0x1de2   :  { %3284 = vrot.lane.b32.xlu1 %v4473_v41, %s5339_s25  ;;  %v3233_v43 = vpop.f32.mrb[39].mxu0  ;;  %v3947_v41 = vld [vmem:[%s6361_s11 + $0x28] sm:$0xff] }
0x1de3   :  { %3282 = vrot.lane.b32.xlu0 %v3233_v43, %s5339_s25  ;;  %v4740_v43 = vpack.c.bf16 %v3947_v41, %v3946_v42 }
0x1de5   :  { %4741 = vmatprep.subr.bf16.mxu1 %v4740_v43 }
0x1de6   :  { %4743 = vmatpush3.bf16.msra.mxu1 %v4740_v43 }
0x1de7   :  { %4745 = vmatprep.subr.bf16.mxu1 %v4744_v51 }
0x1dea   :  { %4747 = vmatpush3.bf16.msra.mxu1 %v4744_v51 }
0x1e50   :  { %v3281_v23 = vpop.permute.xlu1 %3280 }
0x1e51   :  { %v3279_v61 = vpop.permute.xlu0 %3278  ;;  %v3299_v9 = vsel %vm1514_vm4, %v3295_v50, %v3281_v23 }
0x1e52   :  { %v3298_v62 = vsel %vm1514_vm4, %v3294_v56, %v3279_v61 }
0x1e53   :  { %4482 = vmatprep.mubr.msk.f32.mxu0 %vm162_vm0, %v3298_v62 }
0x1e54   :  { %4483 = vmatmul.mubr.msk.f32.vlgmr.msra.gmra.mrb[40].mxu0 %vm162_vm0, %v3299_v9  ;;  %v3285_v25 = vpop.permute.xlu1 %3284 }
0x1e55   :  { %v3283_v40 = vpop.permute.xlu0 %3282  ;;  %v3301_v3 = vsel %vm1514_vm4, %v3297_v1, %v3285_v25 }
0x1e56   :  { %v3300_v0 = vsel %vm1514_vm4, %v3296_v22, %v3283_v40  ;;  %v3945_v40 = vld [vmem:[#allocation10 + $0x1] ss:$0 sm:$0xff] }
0x1e57   :  { %4485 = vmatprep.mubr.msk.f32.mxu0 %vm162_vm0, %v3300_v0 }
0x1e58   :  { %4486 = vmatmul.mubr.msk.f32.gmra.mrb[42].mxu0 %vm162_vm0, %v3301_v3 }
0x1f27   :  { %v4484_v2 = vpop.f32.mrb[40].mxu0 }
0x1f28   :  { %v3399_v4 = vadd.f32 %v4484_v2, %v3939_v27  ;;  %v3393_v7 = vpop.f32.mrb[41].mxu0 }
0x1f29   :  { %v3394_v12 = vadd.f32 %v3939_v27, %v3393_v7 }
0x1f2a   :  { %v3413_v49 = vadd.f32 %v3399_v4, %v5975_v13 }
0x1f2b   :  { %v3412_v28 = vadd.f32 %v3394_v12, %v5973_v32  ;;  %v4487_v45 = vpop.f32.mrb[42].mxu0 }
0x1f2c   :  { %v3403_v10 = vpop.f32.mrb[43].mxu0  ;;  %v3423_v15 = vsel %vm162_vm0, %v3413_v49, 0.0  ;;  %v3409_v44 = vadd.f32 %v4487_v45, %v3939_v27 }
0x1f2d   :  { %v3404_v16 = vadd.f32 %v3939_v27, %v3403_v10  ;;  %3424 = vadd.xlane.f32.xlu1 %v3423_v15  ;;  %v3420_v17 = vsel %vm162_vm0, %v3412_v28, 0.0  ;;  %v3955_v15 = vld [vmem:[%s6363_s13 + $0x40] sm:$0xff] }
0x1f2e   :  { %3421 = vadd.xlane.f32.xlu0 %v3420_v17  ;;  %v3415_v19 = vadd.f32 %v3409_v44, %v5983_v36  ;;  %v3956_v44 = vld [vmem:[%s6363_s13 + $0x48] sm:$0xff]  ;;  %v3957_v17 = vld [vmem:[%s6363_s13 + $0x50] sm:$0xff] }
0x1f2f   :  { %v3414_v57 = vadd.f32 %v3404_v16, %v5981_v35  ;;  %v4748_v16 = vpack.c.bf16 %v3956_v44, %v3955_v15 }
0x1f30   :  { %v3429_v13 = vsel %vm162_vm0, %v3415_v19, 0.0 }
0x1f31   :  { %v3426_v20 = vsel %vm162_vm0, %v3414_v57, 0.0  ;;  %4749 = vmatprep.subr.bf16.mxu0 %v4748_v16 }
0x1f32   :  { %3427 = vadd.xlane.f32.xlu0 %v3426_v20  ;;  %4751 = vmatpush3.bf16.msra.mxu0 %v4748_v16  ;;  %v3959_v20 = vld [vmem:[%s6363_s13 + $0x60] sm:$0xff] }
0x1f36   :  { %3430 = vadd.xlane.f32.xlu0 %v3429_v13  ;;  %v3960_v13 = vld [vmem:[%s6363_s13 + $0x68] sm:$0xff] }
0x1fba   :  { %v3425_v32 = vpop.xlane.xlu1 %3424 }
0x1fbb   :  { %v3433_v29 = vmul.f32 0.03125, %v3425_v32  ;;  %v3422_v8 = vpop.xlane.xlu0 %3421  ;;  %v4756_v32 = vpack.c.bf16 %v3960_v13, %v3959_v20  ;;  %v3971_v13 = vld [vmem:[%s6366_s16 + $0x1] ss:$0 sm:$0xff] }
0x1fbc   :  { %v3432_v59 = vmul.f32 0.03125, %v3422_v8  ;;  %v3962_v8 = vld [vmem:[%s6363_s13 + $0x78] sm:$0xff] }
0x1fbd   :  { %v3437_v63 = vsub.f32 %v3413_v49, %v3433_v29  ;;  %v3961_v29 = vld [vmem:[%s6363_s13 + $0x70] sm:$0xff] }
0x1fbe   :  { %v3436_v30 = vsub.f32 %v3412_v28, %v3432_v59  ;;  %v4760_v59 = vpack.c.bf16 %v3962_v8, %v3961_v29 }
0x1fbf   :  { %v3428_v18 = vpop.xlane.xlu0 %3427  ;;  %v3441_v60 = vmul.f32 %v3437_v63, %v3437_v63 }
0x1fc0   :  { %v3434_v31 = vmul.f32 0.03125, %v3428_v18  ;;  %v3440_v6 = vmul.f32 %v3436_v30, %v3436_v30 }
0x1fc1   :  { %v3447_v35 = vsel %vm162_vm0, %v3441_v60, 0.0 }
0x1fc2   :  { %v3438_v37 = vsub.f32 %v3414_v57, %v3434_v31  ;;  %3448 = vadd.xlane.f32.xlu1 %v3447_v35  ;;  %v3444_v36 = vsel %vm162_vm0, %v3440_v6, 0.0  ;;  %v3958_v57 = vld [vmem:[%s6363_s13 + $0x58] sm:$0xff] }
0x1fc3   :  { %3445 = vadd.xlane.f32.xlu0 %v3444_v36  ;;  %v3431_v48 = vpop.xlane.xlu0 %3430 }
0x1fc4   :  { %v3435_v11 = vmul.f32 0.03125, %v3431_v48  ;;  %v3442_v34 = vmul.f32 %v3438_v37, %v3438_v37 }
0x1fc6   :  { %v3439_v47 = vsub.f32 %v3415_v19, %v3435_v11  ;;  %v3450_v33 = vsel %vm162_vm0, %v3442_v34, 0.0  ;;  %v4752_v19 = vpack.c.bf16 %v3958_v57, %v3957_v17 }
0x1fc7   :  { %3451 = vadd.xlane.f32.xlu0 %v3450_v33 }
0x1fc8   :  { %v3443_v38 = vmul.f32 %v3439_v47, %v3439_v47  ;;  %4753 = vmatprep.subr.bf16.mxu0 %v4752_v19 }
0x1fc9   :  { %4755 = vmatpush3.bf16.msra.mxu0 %v4752_v19  ;;  %v3970_v19 = vld [vmem:[%s6365_s15 + $0x1] ss:$0 sm:$0xff] }
0x1fca   :  { %v3453_v39 = vsel %vm162_vm0, %v3443_v38, 0.0  ;;  %4757 = vmatprep.subr.bf16.mxu0 %v4756_v32 }
0x1fcb   :  { %3454 = vadd.xlane.f32.xlu1 %v3453_v39 }
0x1fcd   :  { %4759 = vmatpush3.bf16.msra.mxu0 %v4756_v32 }
0x1fce   :  { %4761 = vmatprep.subr.bf16.mxu0 %v4760_v59 }
0x1fd1   :  { %4763 = vmatpush3.bf16.msra.mxu0 %v4760_v59 }
0x204f   :  { %v3449_v52 = vpop.xlane.xlu1 %3448 }
0x2050   :  { %v3457_v24 = vmul.f32 0.03125, %v3449_v52  ;;  %v3446_v55 = vpop.xlane.xlu0 %3445 }
0x2051   :  { %v3456_v58 = vmul.f32 0.03125, %v3446_v55 }
0x2052   :  { %v3461_v53 = vadd.f32 1e-12, %v3457_v24 }
0x2053   :  { %v3460_v54 = vadd.f32 1e-12, %v3456_v58 }
0x2054   :  { %5108 = vrsqrt.f32 %v3461_v53  ;;  %v3452_v23 = vpop.xlane.xlu0 %3451 }
0x2055   :  { %5110 = vrsqrt.f32 %v3460_v54  ;;  %v3458_v14 = vmul.f32 0.03125, %v3452_v23 }
0x2057   :  { %v3462_v56 = vadd.f32 1e-12, %v3458_v14  ;;  %v3963_v14 = vld [vmem:[#allocation13 + $0x1] ss:$0 sm:$0xff] }
0x2058   :  { %v3455_v61 = vpop.xlane.xlu1 %3454 }
0x2059   :  { %5112 = vrsqrt.f32 %v3462_v56  ;;  %v3459_v50 = vmul.f32 0.03125, %v3455_v61 }
0x205b   :  { %v3463_v62 = vadd.f32 1e-12, %v3459_v50 }
0x205d   :  { %5114 = vrsqrt.f32 %v3463_v62 }
0x205e   :  { %v5109_v9 = vpop.eup %5108 }
0x205f   :  { %v5111_v25 = vpop.eup %5110  ;;  %v3469_v22 = vmul.f32 %v5109_v9, %v3437_v63  ;;  %v3950_v63 = vld [vmem:[#allocation11 + $0x1] ss:$0 sm:$0xff] }
0x2060   :  { %v3468_v26 = vmul.f32 %v5111_v25, %v3436_v30 }
0x2061   :  { %v3479_v1 = vmul.f32 %v3944_v5, %v3469_v22 }
0x2062   :  { %v3478_v0 = vmul.f32 %v3944_v5, %v3468_v26 }
0x2063   :  { %v5113_v3 = vpop.eup %5112  ;;  %v6285_v4 = vadd.f32 %v3945_v40, %v3479_v1 }
0x2064   :  { %v3488_v27 = vadd.f32 %v3945_v40, %v3478_v0  ;;  %v3470_v2 = vmul.f32 %v5113_v3, %v3438_v37 }
0x2066   :  { %4496 = vmatprep.mubr.msk.f32.mxu1 %vm162_vm0, %v3488_v27  ;;  %v3480_v7 = vmul.f32 %v3944_v5, %v3470_v2 }
0x2067   :  { %v5115_v12 = vpop.eup %5114  ;;  %4497 = vmatmul.mubr.msk.f32.vlgmr.msra.gmra.mrb[44].mxu1 %vm162_vm0, %v6285_v4 }
0x2068   :  { %v3490_v49 = vadd.f32 %v3945_v40, %v3480_v7  ;;  %v3471_v28 = vmul.f32 %v5115_v12, %v3439_v47 }
0x206a   :  { %4499 = vmatprep.mubr.msk.f32.mxu1 %vm162_vm0, %v3490_v49  ;;  %v3481_v45 = vmul.f32 %v3944_v5, %v3471_v28 }
0x206c   :  { %v6291_v10 = vadd.f32 %v3945_v40, %v3481_v45 }
0x206e   :  { %4500 = vmatmul.mubr.msk.f32.gmra.mrb[46].mxu1 %vm162_vm0, %v6291_v10 }
0x213a   :  { %v4498_v30 = vpop.f32.mrb[44].mxu1 }
0x213b   :  { %v3589_v18 = vadd.f32 %v4498_v30, %v3950_v63  ;;  %v3583_v60 = vpop.f32.mrb[45].mxu1 }
0x213c   :  { %v3584_v31 = vadd.f32 %v3950_v63, %v3583_v60 }
0x213d   :  { %v3607_v6 = vmul.f32 0.70710677, %v3589_v18  ;;  %v3603_v43 = vmul.f32 0.5, %v3589_v18 }
0x213e   :  { %v3606_v35 = vmul.f32 0.70710677, %v3584_v31  ;;  %v3602_v42 = vmul.f32 0.5, %v3584_v31 }
0x213f   :  { %5116 = verf.f32 %v3607_v6 }
0x2140   :  { %5118 = verf.f32 %v3606_v35 }
0x2141   :  { %v4501_v37 = vpop.f32.mrb[46].mxu1 }
0x2142   :  { %v3599_v36 = vadd.f32 %v4501_v37, %v3950_v63  ;;  %v3593_v48 = vpop.f32.mrb[47].mxu1 }
0x2143   :  { %v3594_v11 = vadd.f32 %v3950_v63, %v3593_v48 }
0x2144   :  { %v3609_v34 = vmul.f32 0.70710677, %v3599_v36  ;;  %v3605_v53 = vmul.f32 0.5, %v3599_v36 }
0x2145   :  { %v3608_v47 = vmul.f32 0.70710677, %v3594_v11  ;;  %v3604_v55 = vmul.f32 0.5, %v3594_v11 }
0x2146   :  { %5120 = verf.f32 %v3609_v34 }
0x2147   :  { %5122 = verf.f32 %v3608_v47 }
0x2149   :  { %v5117_v33 = vpop.eup %5116 }
0x214a   :  { %v5119_v38 = vpop.eup %5118  ;;  %v3615_v39 = vadd.f32 1.0, %v5117_v33 }
0x214b   :  { %v3614_v41 = vadd.f32 1.0, %v5119_v38 }
0x214c   :  { %v3619_v21 = vmul.f32 %v3615_v39, %v3603_v43 }
0x214d   :  { %v3618_v46 = vmul.f32 %v3614_v41, %v3602_v42 }
0x214f   :  { %4518 = vmatprep.mubr.msk.f32.mxu0 %vm1848_vm5, %v3618_v46 }
0x2150   :  { %v5121_v51 = vpop.eup %5120  ;;  %4519 = vmatmul.mubr.msk.f32.vlgmr.msra.gmra.mrb[44].mxu0 %vm1848_vm5, %v3619_v21 }
0x2151   :  { %v5123_v52 = vpop.eup %5122  ;;  %v3617_v24 = vadd.f32 1.0, %v5121_v51 }
0x2152   :  { %v3616_v58 = vadd.f32 1.0, %v5123_v52 }
0x2153   :  { %v3621_v23 = vmul.f32 %v3617_v24, %v3605_v53 }
0x2154   :  { %v3620_v54 = vmul.f32 %v3616_v58, %v3604_v55 }
0x2156   :  { %4521 = vmatprep.mubr.msk.f32.mxu0 %vm1848_vm5, %v3620_v54 }
0x2157   :  { %4522 = vmatmul.mubr.msk.f32.gmra.mrb[46].mxu0 %vm1848_vm5, %v3621_v23 }
0x2223   :  { %v4520_v56 = vpop.f32.mrb[44].mxu0 }
0x2224   :  { %v3722_v61 = vadd.f32 %v4520_v56, %v3963_v14  ;;  %v3717_v50 = vpop.f32.mrb[45].mxu0 }
0x2226   :  { %v3734_v62 = vadd.f32 %v3722_v61, %v6285_v4 }
0x2228   :  { %v3740_v9 = vsel %vm162_vm0, %v3734_v62, 0.0 }
0x2229   :  { %3741 = vadd.xlane.f32.xlu0 %v3740_v9 }
0x222a   :  { %v4523_v5 = vpop.f32.mrb[46].mxu0 }
0x222b   :  { %v3731_v25 = vadd.f32 %v4523_v5, %v3963_v14  ;;  %v3726_v22 = vpop.f32.mrb[47].mxu0 }
0x222d   :  { %v3735_v26 = vadd.f32 %v3731_v25, %v6291_v10 }
0x222f   :  { %v3743_v40 = vsel %vm162_vm0, %v3735_v26, 0.0 }
0x2230   :  { %3744 = vadd.xlane.f32.xlu1 %v3743_v40 }
0x22b6   :  { %v3742_v1 = vpop.xlane.xlu0 %3741 }
0x22b7   :  { %v3746_v0 = vmul.f32 0.03125, %v3742_v1 }
0x22b9   :  { %v3748_v3 = vsub.f32 %v3734_v62, %v3746_v0 }
0x22bb   :  { %v3750_v27 = vmul.f32 %v3748_v3, %v3748_v3 }
0x22bd   :  { %v3745_v2 = vpop.xlane.xlu1 %3744  ;;  %v3752_v7 = vsel %vm162_vm0, %v3750_v27, 0.0 }
0x22be   :  { %v3747_v12 = vmul.f32 0.03125, %v3745_v2  ;;  %3753 = vadd.xlane.f32.xlu0 %v3752_v7 }
0x22c0   :  { %v3749_v4 = vsub.f32 %v3735_v26, %v3747_v12 }
0x22c2   :  { %v3751_v49 = vmul.f32 %v3749_v4, %v3749_v4 }
0x22c4   :  { %v3755_v28 = vsel %vm162_vm0, %v3751_v49, 0.0 }
0x22c5   :  { %3756 = vadd.xlane.f32.xlu1 %v3755_v28 }
0x234b   :  { %v3754_v45 = vpop.xlane.xlu0 %3753 }
0x234c   :  { %v3758_v15 = vmul.f32 0.03125, %v3754_v45 }
0x234e   :  { %v3760_v10 = vadd.f32 1e-12, %v3758_v15 }
0x2350   :  { %5124 = vrsqrt.f32 %v3760_v10 }
0x2352   :  { %v3757_v44 = vpop.xlane.xlu1 %3756 }
0x2353   :  { %v3759_v16 = vmul.f32 0.03125, %v3757_v44 }
0x2355   :  { %v3761_v17 = vadd.f32 1e-12, %v3759_v16 }
0x2357   :  { %5126 = vrsqrt.f32 %v3761_v17 }
0x235a   :  { %v5125_v57 = vpop.eup %5124 }
0x235b   :  { %v3764_v20 = vmul.f32 %v5125_v57, %v3748_v3 }
0x235d   :  { %v3772_v32 = vmul.f32 %v3970_v19, %v3764_v20 }
0x235f   :  { %v3780_v29 = vadd.f32 %v3971_v13, %v3772_v32 }
0x2361   :  { %v5127_v8 = vpop.eup %5126  ;;  %3782 = vst.msk [vmem:[#allocation14] sm:$0xff] %vm162_vm0, %v3780_v29 }
0x2362   :  { %v3765_v59 = vmul.f32 %v5127_v8, %v3749_v4 }
0x2364   :  { %v3773_v63 = vmul.f32 %v3970_v19, %v3765_v59 }
0x2366   :  { %v3781_v30 = vadd.f32 %v3971_v13, %v3773_v63 }
0x2368   :  { %3783 = vst.msk [vmem:[#allocation14 + $0x8] sm:$0xff] %vm162_vm0, %v3781_v30 }
0x2369   :  { %5297 = shalt.err (!%p5294_p4)
}
0x236a   :  { %s6378_s29 = sld [smem:[#allocation22_spill]] }
0x2370   :  { %s5298_s27 = scalar_lea.hbm %s6378_s29, 256 }
0x2371   :  { %p5299_p5 = scmp.ne.s32.totalorder %s6378_s29, %s5298_s27  ;;  %p5302_p6 = scmp.lt.u32.totalorder %s5298_s27, %s6378_s29 }
0x2373   :  { %p5304_p7 = pnand %p5302_p6, %p5299_p5 }
0x2375   :  { %5307 = shalt.err (!%p5304_p7)
}
0x2376   :  { %s5341_s0 = smov 128  }
0x2377   :  { %3795 = dma.vmem_to_hbm [thread:$0]  %s3790_s19, 256, %s6378_s29, [#allocation4], %s5341_s0, %s5341_s0, %s5338_s10  }
0x2378   :  { %5316 = dma.done.wait [#allocation4], 256  }
0x2379   :  { %5317 = vsyncadd [#allocation4], 4294967040 }
0x237a   :  { %3799 = vsyncpa [#allocation3], 1 }
0x237b   :  { %3800 = vsyncpa [#allocation6], 1 }
0x237c   :  { %3801 = vsyncpa [#allocation9], 1 }
0x237d   :  { %3802 = vsyncpa [#allocation12], 1 }
0x237e   :  { %3803 = vsyncpa [#allocation4], 1 }

</bundles_post_ra>
